<compile_context>
chip_gen: v6e
topology: v6e:2x2x1
jax: 0.10.0
libtpu: 0.0.40
codegen_flags: <defaults>
</compile_context>

<pallas_src>
import functools

import jax
import jax.numpy as jnp
from jax import lax
from jax.experimental import pallas as pl
from jax.experimental.pallas import tpu as pltpu

LANE = 128                        # TPU lane width; channel padding granularity
_TARGET_TILE_ROWS = 1024          # target rows (th * Wp) per grid step
_VMEM_LIMIT = 48 * 1024 * 1024    # safe on v7x (64 MiB) and v5e/v6e (128 MiB)
_INV_SQRT2 = 0.7071067811865475


def _round_up(x, m):
    return (x + m - 1) // m * m


def _pick_th(h, wp, target_rows=_TARGET_TILE_ROWS):
    """Largest divisor of H whose row tile (th * Wp) stays near the target."""
    best = 1
    for th in range(1, h + 1):
        if h % th == 0 and th * wp <= target_rows:
            best = th
    return best


# ----------------------------- Pallas kernels --------------------------------

def _conv_stats_kernel(xh_ref, w_ref, y_ref, s1_ref, s2_ref, *, img_w, wp):
    """3x3 conv (9 shifted bf16 matmuls, f32 acc) + per-tile BN partial sums.

    xh_ref: (1, Rin, Cp)      bf16  halo'd, W-padded, row-flattened input tile
    w_ref : (9, Cp, Coutp)    bf16  per-tap weight matrices (tap = 3*dh + dw)
    y_ref : (1, Rout, Coutp)  f32   conv output tile (Rout = th * Wp rows)
    s1_ref: (1, 1, Coutp)     f32   per-tile per-channel sum
    s2_ref: (1, 1, Coutp)     f32   per-tile per-channel sum of squares
    """
    rout = y_ref.shape[1]
    coutp = y_ref.shape[2]

    acc = jnp.zeros((rout, coutp), jnp.float32)
    for dh in range(3):
        for dw in range(3):
            off = dh * wp + dw                        # static shift of the tile
            tap = xh_ref[0, off:off + rout, :]        # (Rout, Cp) bf16
            acc = acc + jnp.dot(tap, w_ref[3 * dh + dw],
                                preferred_element_type=jnp.float32)
    y_ref[0] = acc

    # Mask the 2 wrap-around columns per image row so BN stats are exact.
    col = lax.broadcasted_iota(jnp.int32, (rout, 1), 0) % wp
    a = jnp.where(col < img_w, acc, 0.0)
    s1_ref[0] = jnp.sum(a, axis=0, keepdims=True)
    s2_ref[0] = jnp.sum(a * a, axis=0, keepdims=True)


def _bn_gelu_kernel(*refs, add_residual):
    """y*scale + shift -> exact-erf GELU -> (+ residual)."""
    if add_residual:
        y_ref, scale_ref, shift_ref, res_ref, o_ref = refs
    else:
        y_ref, scale_ref, shift_ref, o_ref = refs
    y = y_ref[0] * scale_ref[...] + shift_ref[...]
    y = 0.5 * y * (1.0 + lax.erf(y * _INV_SQRT2))
    if add_residual:
        y = y + res_ref[0]
    o_ref[0] = y.astype(o_ref.dtype)


# ------------------------------ stage wrapper ---------------------------------

def _conv_bn_gelu_stage(x_nhwc, w_taps, gamma, beta, *, residual=None,
                        eps=1e-5, out_dtype=jnp.float32):
    """Conv3x3(pad=1, no bias) -> BN(train stats) -> GELU (+ residual).

    x_nhwc  : (N, H, W, Cp)     activation, channels already padded to LANE
    w_taps  : (9, Cp, Coutp)    bf16 per-tap weight matrices
    gamma/beta: (Coutp,)        f32 BN affine (padded channels are 0)
    residual: (N, H, W, Coutp)  optional f32 residual added after GELU
    returns : (N, H, W, Coutp)  out_dtype
    """
    n, h, w, cp = x_nhwc.shape
    coutp = w_taps.shape[-1]
    wp = w + 2
    th = _pick_th(h, wp)
    n_th = h // th
    g = n * n_th
    rout = th * wp
    rin = _round_up((th + 2) * wp + 2, 8)

    # Wrapper glue: halo'd, W-padded, row-flattened bf16 tiles (~1.1x activation).
    xp = jnp.pad(x_nhwc.astype(jnp.bfloat16), ((0, 0), (1, 1), (1, 1), (0, 0)))
    xh = jnp.stack([xp[:, t * th:t * th + th + 2] for t in range(n_th)], axis=1)
    xh = xh.reshape(g, (th + 2) * wp, cp)
    xh = jnp.pad(xh, ((0, 0), (0, rin - (th + 2) * wp), (0, 0)))

    cparams = pltpu.CompilerParams(dimension_semantics=("parallel",),
                                   vmem_limit_bytes=_VMEM_LIMIT)

    # ---- pass 1: conv + per-tile BN partial stats --------------------------------
    kern1 = functools.partial(_conv_stats_kernel, img_w=w, wp=wp)
    y, s1, s2 = pl.pallas_call(
        kern1,
        grid=(g,),
        in_specs=[pl.BlockSpec((1, rin, cp), lambda i: (i, 0, 0)),
                  pl.BlockSpec((9, cp, coutp), lambda i: (0, 0, 0))],
        out_specs=[pl.BlockSpec((1, rout, coutp), lambda i: (i, 0, 0)),
                   pl.BlockSpec((1, 1, coutp), lambda i: (i, 0, 0)),
                   pl.BlockSpec((1, 1, coutp), lambda i: (i, 0, 0))],
        out_shape=[jax.ShapeDtypeStruct((g, rout, coutp), jnp.float32),
                   jax.ShapeDtypeStruct((g, 1, coutp), jnp.float32),
                   jax.ShapeDtypeStruct((g, 1, coutp), jnp.float32)],
        compiler_params=cparams,
    )(xh, w_taps)

    # ---- finalize global train-mode BN stats (tiny XLA reduction) ----------------
    count = jnp.float32(n * h * w)
    mean = jnp.sum(s1[:, 0, :], axis=0) / count
    var = jnp.maximum(jnp.sum(s2[:, 0, :], axis=0) / count - mean * mean, 0.0)
    scale = (gamma * lax.rsqrt(var + eps)).astype(jnp.float32)
    shift = (beta - mean * scale).astype(jnp.float32)
    scale = scale.reshape(1, coutp)
    shift = shift.reshape(1, coutp)

    # ---- pass 2: normalize + GELU (+ residual) ------------------------------------
    args = [y, scale, shift]
    in_specs = [pl.BlockSpec((1, rout, coutp), lambda i: (i, 0, 0)),
                pl.BlockSpec((1, coutp), lambda i: (0, 0)),
                pl.BlockSpec((1, coutp), lambda i: (0, 0))]
    add_res = residual is not None
    if add_res:
        r = jnp.pad(residual.astype(jnp.float32), ((0, 0), (0, 0), (0, 2), (0, 0)))
        args.append(r.reshape(g, rout, coutp))
        in_specs.append(pl.BlockSpec((1, rout, coutp), lambda i: (i, 0, 0)))

    kern2 = functools.partial(_bn_gelu_kernel, add_residual=add_res)
    out = pl.pallas_call(
        kern2,
        grid=(g,),
        in_specs=in_specs,
        out_specs=pl.BlockSpec((1, rout, coutp), lambda i: (i, 0, 0)),
        out_shape=jax.ShapeDtypeStruct((g, rout, coutp), out_dtype),
        compiler_params=cparams,
    )(*args)

    # Drop the 2 wrap columns per image row and restore (N, H, W, Coutp).
    out = out.reshape(n, n_th, th, wp, coutp)[:, :, :, :w, :]
    return out.reshape(n, h, w, coutp)


# ------------------------------ module forward ---------------------------------

def residual_block_forward(x_nchw, params, use_residual=True, eps=1e-5):
    """Pallas implementation of ResidualBlock.forward (norm_type='batch')."""
    # TODO(synk): only norm_type='batch' (training-mode stats, the module default)
    # is implemented; 'instance'/'none' variants are not exercised here.
    w1, b1, g1, be1, w2, b2, g2, be2 = params
    del b1, b2  # conv bias before train-mode BN is exactly cancelled by the mean
    n, cin, h, w = x_nchw.shape
    cout = w1.shape[0]
    use_res = bool(use_residual and cin == cout)

    cin_p = _round_up(cin, LANE)
    cout_p = _round_up(cout, LANE)

    x = jnp.transpose(x_nchw, (0, 2, 3, 1)).astype(jnp.float32)        # NCHW -> NHWC
    x_p = jnp.pad(x, ((0, 0), (0, 0), (0, 0), (0, cin_p - cin)))

    def prep_w(w_pt, cin_real, cin_pad):
        # (Cout, Cin, 3, 3) -> (3, 3, Cin, Cout) -> (9, Cin, Cout) -> pad -> bf16
        wt = jnp.transpose(w_pt, (2, 3, 1, 0)).reshape(9, cin_real, cout)
        wt = jnp.pad(wt, ((0, 0), (0, cin_pad - cin_real), (0, cout_p - cout)))
        return wt.astype(jnp.bfloat16)

    def prep_affine(v):
        return jnp.pad(v.astype(jnp.float32), (0, cout_p - cout))

    a1 = _conv_bn_gelu_stage(x_p, prep_w(w1, cin, cin_p),
                             prep_affine(g1), prep_affine(be1),
                             eps=eps, out_dtype=jnp.bfloat16)
    res = None
    if use_res:
        res = jnp.pad(x, ((0, 0), (0, 0), (0, 0), (0, cout_p - cin)))
    a2 = _conv_bn_gelu_stage(a1, prep_w(w2, cout, cout_p),
                             prep_affine(g2), prep_affine(be2),
                             residual=res, eps=eps, out_dtype=jnp.float32)

    return jnp.transpose(a2[..., :cout], (0, 3, 1, 2))                 # NHWC -> NCHW


# --------------------------- pure-JAX reference ---------------------------------

def reference_forward(x, params, use_residual=True, eps=1e-5):
    """Reference that emulates the kernel's bf16 matmul inputs (f32 elsewhere)."""
    w1, b1, g1, be1, w2, b2, g2, be2 = params

    def bf16(v):
        return v.astype(jnp.bfloat16).astype(jnp.float32)

    def conv(x, w, b):
        y = lax.conv_general_dilated(
            bf16(x), bf16(w), window_strides=(1, 1), padding=((1, 1), (1, 1)),
            dimension_numbers=('NCHW', 'OIHW', 'NCHW'))
        return y + b[None, :, None, None]

    def bn(y, g, be):
        mean = jnp.mean(y, axis=(0, 2, 3), keepdims=True)
        var = jnp.mean((y - mean) ** 2, axis=(0, 2, 3), keepdims=True)
        return ((y - mean) * lax.rsqrt(var + eps) * g[None, :, None, None]
                + be[None, :, None, None])

    def gelu(y):
        return 0.5 * y * (1.0 + lax.erf(y * _INV_SQRT2))

    h = gelu(bn(conv(x, w1, b1), g1, be1))
    h = gelu(bn(conv(h, w2, b2), g2, be2))
    return x + h if (use_residual and x.shape[1] == w1.shape[0]) else h


# ---------------------------------- main ----------------------------------------

if __name__ == "__main__":
    key = jax.random.PRNGKey(0)
    ks = jax.random.split(key, 9)

    N, Cin, Cout, H, W = 2, 4, 4, 16, 16   # in_channels == out_channels -> residual
    x = jax.random.normal(ks[0], (N, Cin, H, W), jnp.float32)

    w1 = 0.1 * jax.random.normal(ks[1], (Cout, Cin, 3, 3), jnp.float32)
    b1 = 0.1 * jax.random.normal(ks[2], (Cout,), jnp.float32)
    g1 = 1.0 + 0.1 * jax.random.normal(ks[3], (Cout,), jnp.float32)
    be1 = 0.1 * jax.random.normal(ks[4], (Cout,), jnp.float32)
    w2 = 0.1 * jax.random.normal(ks[5], (Cout, Cout, 3, 3), jnp.float32)
    b2 = 0.1 * jax.random.normal(ks[6], (Cout,), jnp.float32)
    g2 = 1.0 + 0.1 * jax.random.normal(ks[7], (Cout,), jnp.float32)
    be2 = 0.1 * jax.random.normal(ks[8], (Cout,), jnp.float32)
    params = (w1, b1, g1, be1, w2, b2, g2, be2)

    fwd = jax.jit(functools.partial(residual_block_forward, use_residual=True))
    out = jax.block_until_ready(fwd(x, params))
    assert out.shape == (N, Cout, H, W)

    ref = reference_forward(x, params, use_residual=True)
    max_err = float(jnp.max(jnp.abs(out - ref)))
    assert max_err < 2e-2, f"max abs err {max_err}"

    print("KERNEL_OK")
</pallas_src>

<mosaic_0001>
module attributes {stable_mosaic.version = 11 : i64} {
  func.func @_bn_gelu_kernel(%arg0: i32, %arg1: memref<1x288x128xf32, #tpu.memory_space<vmem>>, %arg2: memref<1x128xf32, #tpu.memory_space<vmem>>, %arg3: memref<1x128xf32, #tpu.memory_space<vmem>>, %arg4: memref<1x288x128xbf16, #tpu.memory_space<vmem>>) attributes {dimension_semantics = [#tpu.dimension_semantics<parallel>], iteration_bounds = array<i64: 2>, scalar_prefetch = 0 : i64, scratch_operands = 0 : i64, tpu.core_type = #tpu.core_type<tc>, window_params = [{transform_indices = @transform_0, window_bounds = array<i64: 1, 288, 128>}, {pipeline_mode = #tpu.pipeline_mode<synchronous>, transform_indices = @transform_1, window_bounds = array<i64: 1, 128>}, {pipeline_mode = #tpu.pipeline_mode<synchronous>, transform_indices = @transform_2, window_bounds = array<i64: 1, 128>}, {transform_indices = @transform_3, window_bounds = array<i64: 1, 288, 128>}]} {
    %c0 = arith.constant 0 : index
    %c0_0 = arith.constant 0 : index
    %c0_1 = arith.constant 0 : index
    %0 = vector.load %arg1[%c0, %c0_0, %c0_1] : memref<1x288x128xf32, #tpu.memory_space<vmem>>, vector<1x288x128xf32>
    %1 = vector.shape_cast %0 : vector<1x288x128xf32> to vector<288x128xf32>
    %c0_2 = arith.constant 0 : index
    %c0_3 = arith.constant 0 : index
    %2 = vector.load %arg2[%c0_2, %c0_3] : memref<1x128xf32, #tpu.memory_space<vmem>>, vector<1x128xf32>
    %3 = vector.broadcast %2 : vector<1x128xf32> to vector<288x128xf32>
    %4 = arith.mulf %1, %3 : vector<288x128xf32>
    %c0_4 = arith.constant 0 : index
    %c0_5 = arith.constant 0 : index
    %5 = vector.load %arg3[%c0_4, %c0_5] : memref<1x128xf32, #tpu.memory_space<vmem>>, vector<1x128xf32>
    %6 = vector.broadcast %5 : vector<1x128xf32> to vector<288x128xf32>
    %7 = arith.addf %4, %6 : vector<288x128xf32>
    %cst = arith.constant 5.000000e-01 : f32
    %8 = vector.broadcast %cst : f32 to vector<288x128xf32>
    %9 = arith.mulf %8, %7 : vector<288x128xf32>
    %cst_6 = arith.constant 0.707106769 : f32
    %10 = vector.broadcast %cst_6 : f32 to vector<288x128xf32>
    %11 = arith.mulf %7, %10 : vector<288x128xf32>
    %12 = math.erf %11 : vector<288x128xf32>
    %cst_7 = arith.constant 1.000000e+00 : f32
    %13 = vector.broadcast %cst_7 : f32 to vector<288x128xf32>
    %14 = arith.addf %13, %12 : vector<288x128xf32>
    %15 = arith.mulf %9, %14 : vector<288x128xf32>
    %16 = arith.truncf %15 : vector<288x128xf32> to vector<288x128xbf16>
    %c0_8 = arith.constant 0 : index
    %c0_9 = arith.constant 0 : index
    %c0_10 = arith.constant 0 : index
    %17 = vector.load %arg4[%c0_8, %c0_9, %c0_10] : memref<1x288x128xbf16, #tpu.memory_space<vmem>>, vector<1x288x128xbf16>
    %18 = vector.shape_cast %17 : vector<1x288x128xbf16> to vector<288x128xbf16>
    %19 = vector.shape_cast %16 : vector<288x128xbf16> to vector<1x288x128xbf16>
    tpu.vector_store %arg4[%c0_8, %c0_9, %c0_10], %19 {strides = array<i32>} : memref<1x288x128xbf16, #tpu.memory_space<vmem>>, vector<1x288x128xbf16>,
    return
  }
  func.func @transform_0(%arg0: i32) -> (i32, i32, i32) {
    %c0_i32 = arith.constant 0 : i32
    %c0_i32_0 = arith.constant 0 : i32
    %c0_i32_1 = arith.constant 0 : i32
    return %arg0, %c0_i32, %c0_i32_0 : i32, i32, i32
  }
  func.func @transform_1(%arg0: i32) -> (i32, i32) {
    %c0_i32 = arith.constant 0 : i32
    %c0_i32_0 = arith.constant 0 : i32
    %c0_i32_1 = arith.constant 0 : i32
    return %c0_i32, %c0_i32_0 : i32, i32
  }
  func.func @transform_2(%arg0: i32) -> (i32, i32) {
    %c0_i32 = arith.constant 0 : i32
    %c0_i32_0 = arith.constant 0 : i32
    %c0_i32_1 = arith.constant 0 : i32
    return %c0_i32, %c0_i32_0 : i32, i32
  }
  func.func @transform_3(%arg0: i32) -> (i32, i32, i32) {
    %c0_i32 = arith.constant 0 : i32
    %c0_i32_0 = arith.constant 0 : i32
    %c0_i32_1 = arith.constant 0 : i32
    return %arg0, %c0_i32, %c0_i32_0 : i32, i32, i32
  }
}

module attributes {stable_mosaic.version = 11 : i64} {
  func.func @_conv_stats_kernel(%arg0: i32, %arg1: memref<1x328x128xbf16, #tpu.memory_space<vmem>>, %arg2: memref<9x128x128xbf16, #tpu.memory_space<vmem>>, %arg3: memref<1x288x128xf32, #tpu.memory_space<vmem>>, %arg4: memref<1x1x128xf32, #tpu.memory_space<vmem>>, %arg5: memref<1x1x128xf32, #tpu.memory_space<vmem>>) attributes {dimension_semantics = [#tpu.dimension_semantics<parallel>], iteration_bounds = array<i64: 2>, scalar_prefetch = 0 : i64, scratch_operands = 0 : i64, tpu.core_type = #tpu.core_type<tc>, window_params = [{transform_indices = @transform_0, window_bounds = array<i64: 1, 328, 128>}, {pipeline_mode = #tpu.pipeline_mode<synchronous>, transform_indices = @transform_1, window_bounds = array<i64: 9, 128, 128>}, {transform_indices = @transform_2, window_bounds = array<i64: 1, 288, 128>}, {transform_indices = @transform_3, window_bounds = array<i64: 1, 1, 128>}, {transform_indices = @transform_4, window_bounds = array<i64: 1, 1, 128>}]} {
    %cst = arith.constant 0.000000e+00 : f32
    %0 = vector.broadcast %cst : f32 to vector<288x128xf32>
    %c0 = arith.constant 0 : index
    %c0_0 = arith.constant 0 : index
    %c0_1 = arith.constant 0 : index
    %1 = vector.load %arg1[%c0, %c0_0, %c0_1] : memref<1x328x128xbf16, #tpu.memory_space<vmem>>, vector<1x288x128xbf16>
    %2 = vector.shape_cast %1 : vector<1x288x128xbf16> to vector<288x128xbf16>
    %c0_2 = arith.constant 0 : index
    %c0_3 = arith.constant 0 : index
    %c0_4 = arith.constant 0 : index
    %3 = vector.load %arg2[%c0_2, %c0_3, %c0_4] : memref<9x128x128xbf16, #tpu.memory_space<vmem>>, vector<1x128x128xbf16>
    %4 = vector.shape_cast %3 : vector<1x128x128xbf16> to vector<128x128xbf16>
    %cst_5 = arith.constant dense<0.000000e+00> : vector<288x128xf32>
    %5 = tpu.matmul %2, %4, %cst_5 {dimension_numbers = #tpu.dot_dimension_numbers<[1], [0], [0], [1], [0, 0, 1, 1], [], []>} : vector<288x128xbf16>, vector<128x128xbf16>, vector<288x128xf32> -> vector<288x128xf32>
    %6 = arith.addf %0, %5 : vector<288x128xf32>
    %c0_6 = arith.constant 0 : index
    %c1 = arith.constant 1 : index
    %c0_7 = arith.constant 0 : index
    %7 = vector.load %arg1[%c0_6, %c1, %c0_7] : memref<1x328x128xbf16, #tpu.memory_space<vmem>>, vector<1x288x128xbf16>
    %8 = vector.shape_cast %7 : vector<1x288x128xbf16> to vector<288x128xbf16>
    %c1_8 = arith.constant 1 : index
    %c0_9 = arith.constant 0 : index
    %c0_10 = arith.constant 0 : index
    %9 = vector.load %arg2[%c1_8, %c0_9, %c0_10] : memref<9x128x128xbf16, #tpu.memory_space<vmem>>, vector<1x128x128xbf16>
    %10 = vector.shape_cast %9 : vector<1x128x128xbf16> to vector<128x128xbf16>
    %cst_11 = arith.constant dense<0.000000e+00> : vector<288x128xf32>
    %11 = tpu.matmul %8, %10, %cst_11 {dimension_numbers = #tpu.dot_dimension_numbers<[1], [0], [0], [1], [0, 0, 1, 1], [], []>} : vector<288x128xbf16>, vector<128x128xbf16>, vector<288x128xf32> -> vector<288x128xf32>
    %12 = arith.addf %6, %11 : vector<288x128xf32>
    %c0_12 = arith.constant 0 : index
    %c2 = arith.constant 2 : index
    %c0_13 = arith.constant 0 : index
    %13 = vector.load %arg1[%c0_12, %c2, %c0_13] : memref<1x328x128xbf16, #tpu.memory_space<vmem>>, vector<1x288x128xbf16>
    %14 = vector.shape_cast %13 : vector<1x288x128xbf16> to vector<288x128xbf16>
    %c2_14 = arith.constant 2 : index
    %c0_15 = arith.constant 0 : index
    %c0_16 = arith.constant 0 : index
    %15 = vector.load %arg2[%c2_14, %c0_15, %c0_16] : memref<9x128x128xbf16, #tpu.memory_space<vmem>>, vector<1x128x128xbf16>
    %16 = vector.shape_cast %15 : vector<1x128x128xbf16> to vector<128x128xbf16>
    %cst_17 = arith.constant dense<0.000000e+00> : vector<288x128xf32>
    %17 = tpu.matmul %14, %16, %cst_17 {dimension_numbers = #tpu.dot_dimension_numbers<[1], [0], [0], [1], [0, 0, 1, 1], [], []>} : vector<288x128xbf16>, vector<128x128xbf16>, vector<288x128xf32> -> vector<288x128xf32>
    %18 = arith.addf %12, %17 : vector<288x128xf32>
    %c0_18 = arith.constant 0 : index
    %c18 = arith.constant 18 : index
    %c0_19 = arith.constant 0 : index
    %19 = vector.load %arg1[%c0_18, %c18, %c0_19] : memref<1x328x128xbf16, #tpu.memory_space<vmem>>, vector<1x288x128xbf16>
    %20 = vector.shape_cast %19 : vector<1x288x128xbf16> to vector<288x128xbf16>
    %c3 = arith.constant 3 : index
    %c0_20 = arith.constant 0 : index
    %c0_21 = arith.constant 0 : index
    %21 = vector.load %arg2[%c3, %c0_20, %c0_21] : memref<9x128x128xbf16, #tpu.memory_space<vmem>>, vector<1x128x128xbf16>
    %22 = vector.shape_cast %21 : vector<1x128x128xbf16> to vector<128x128xbf16>
    %cst_22 = arith.constant dense<0.000000e+00> : vector<288x128xf32>
    %23 = tpu.matmul %20, %22, %cst_22 {dimension_numbers = #tpu.dot_dimension_numbers<[1], [0], [0], [1], [0, 0, 1, 1], [], []>} : vector<288x128xbf16>, vector<128x128xbf16>, vector<288x128xf32> -> vector<288x128xf32>
    %24 = arith.addf %18, %23 : vector<288x128xf32>
    %c0_23 = arith.constant 0 : index
    %c19 = arith.constant 19 : index
    %c0_24 = arith.constant 0 : index
    %25 = vector.load %arg1[%c0_23, %c19, %c0_24] : memref<1x328x128xbf16, #tpu.memory_space<vmem>>, vector<1x288x128xbf16>
    %26 = vector.shape_cast %25 : vector<1x288x128xbf16> to vector<288x128xbf16>
    %c4 = arith.constant 4 : index
    %c0_25 = arith.constant 0 : index
    %c0_26 = arith.constant 0 : index
    %27 = vector.load %arg2[%c4, %c0_25, %c0_26] : memref<9x128x128xbf16, #tpu.memory_space<vmem>>, vector<1x128x128xbf16>
    %28 = vector.shape_cast %27 : vector<1x128x128xbf16> to vector<128x128xbf16>
    %cst_27 = arith.constant dense<0.000000e+00> : vector<288x128xf32>
    %29 = tpu.matmul %26, %28, %cst_27 {dimension_numbers = #tpu.dot_dimension_numbers<[1], [0], [0], [1], [0, 0, 1, 1], [], []>} : vector<288x128xbf16>, vector<128x128xbf16>, vector<288x128xf32> -> vector<288x128xf32>
    %30 = arith.addf %24, %29 : vector<288x128xf32>
    %c0_28 = arith.constant 0 : index
    %c20 = arith.constant 20 : index
    %c0_29 = arith.constant 0 : index
    %31 = vector.load %arg1[%c0_28, %c20, %c0_29] : memref<1x328x128xbf16, #tpu.memory_space<vmem>>, vector<1x288x128xbf16>
    %32 = vector.shape_cast %31 : vector<1x288x128xbf16> to vector<288x128xbf16>
    %c5 = arith.constant 5 : index
    %c0_30 = arith.constant 0 : index
    %c0_31 = arith.constant 0 : index
    %33 = vector.load %arg2[%c5, %c0_30, %c0_31] : memref<9x128x128xbf16, #tpu.memory_space<vmem>>, vector<1x128x128xbf16>
    %34 = vector.shape_cast %33 : vector<1x128x128xbf16> to vector<128x128xbf16>
    %cst_32 = arith.constant dense<0.000000e+00> : vector<288x128xf32>
    %35 = tpu.matmul %32, %34, %cst_32 {dimension_numbers = #tpu.dot_dimension_numbers<[1], [0], [0], [1], [0, 0, 1, 1], [], []>} : vector<288x128xbf16>, vector<128x128xbf16>, vector<288x128xf32> -> vector<288x128xf32>
    %36 = arith.addf %30, %35 : vector<288x128xf32>
    %c0_33 = arith.constant 0 : index
    %c36 = arith.constant 36 : index
    %c0_34 = arith.constant 0 : index
    %37 = vector.load %arg1[%c0_33, %c36, %c0_34] : memref<1x328x128xbf16, #tpu.memory_space<vmem>>, vector<1x288x128xbf16>
    %38 = vector.shape_cast %37 : vector<1x288x128xbf16> to vector<288x128xbf16>
    %c6 = arith.constant 6 : index
    %c0_35 = arith.constant 0 : index
    %c0_36 = arith.constant 0 : index
    %39 = vector.load %arg2[%c6, %c0_35, %c0_36] : memref<9x128x128xbf16, #tpu.memory_space<vmem>>, vector<1x128x128xbf16>
    %40 = vector.shape_cast %39 : vector<1x128x128xbf16> to vector<128x128xbf16>
    %cst_37 = arith.constant dense<0.000000e+00> : vector<288x128xf32>
    %41 = tpu.matmul %38, %40, %cst_37 {dimension_numbers = #tpu.dot_dimension_numbers<[1], [0], [0], [1], [0, 0, 1, 1], [], []>} : vector<288x128xbf16>, vector<128x128xbf16>, vector<288x128xf32> -> vector<288x128xf32>
    %42 = arith.addf %36, %41 : vector<288x128xf32>
    %c0_38 = arith.constant 0 : index
    %c37 = arith.constant 37 : index
    %c0_39 = arith.constant 0 : index
    %43 = vector.load %arg1[%c0_38, %c37, %c0_39] : memref<1x328x128xbf16, #tpu.memory_space<vmem>>, vector<1x288x128xbf16>
    %44 = vector.shape_cast %43 : vector<1x288x128xbf16> to vector<288x128xbf16>
    %c7 = arith.constant 7 : index
    %c0_40 = arith.constant 0 : index
    %c0_41 = arith.constant 0 : index
    %45 = vector.load %arg2[%c7, %c0_40, %c0_41] : memref<9x128x128xbf16, #tpu.memory_space<vmem>>, vector<1x128x128xbf16>
    %46 = vector.shape_cast %45 : vector<1x128x128xbf16> to vector<128x128xbf16>
    %cst_42 = arith.constant dense<0.000000e+00> : vector<288x128xf32>
    %47 = tpu.matmul %44, %46, %cst_42 {dimension_numbers = #tpu.dot_dimension_numbers<[1], [0], [0], [1], [0, 0, 1, 1], [], []>} : vector<288x128xbf16>, vector<128x128xbf16>, vector<288x128xf32> -> vector<288x128xf32>
    %48 = arith.addf %42, %47 : vector<288x128xf32>
    %c0_43 = arith.constant 0 : index
    %c38 = arith.constant 38 : index
    %c0_44 = arith.constant 0 : index
    %49 = vector.load %arg1[%c0_43, %c38, %c0_44] : memref<1x328x128xbf16, #tpu.memory_space<vmem>>, vector<1x288x128xbf16>
    %50 = vector.shape_cast %49 : vector<1x288x128xbf16> to vector<288x128xbf16>
    %c8 = arith.constant 8 : index
    %c0_45 = arith.constant 0 : index
    %c0_46 = arith.constant 0 : index
    %51 = vector.load %arg2[%c8, %c0_45, %c0_46] : memref<9x128x128xbf16, #tpu.memory_space<vmem>>, vector<1x128x128xbf16>
    %52 = vector.shape_cast %51 : vector<1x128x128xbf16> to vector<128x128xbf16>
    %cst_47 = arith.constant dense<0.000000e+00> : vector<288x128xf32>
    %53 = tpu.matmul %50, %52, %cst_47 {dimension_numbers = #tpu.dot_dimension_numbers<[1], [0], [0], [1], [0, 0, 1, 1], [], []>} : vector<288x128xbf16>, vector<128x128xbf16>, vector<288x128xf32> -> vector<288x128xf32>
    %54 = arith.addf %48, %53 : vector<288x128xf32>
    %c0_48 = arith.constant 0 : index
    %c0_49 = arith.constant 0 : index
    %c0_50 = arith.constant 0 : index
    %55 = vector.load %arg3[%c0_48, %c0_49, %c0_50] : memref<1x288x128xf32, #tpu.memory_space<vmem>>, vector<1x288x128xf32>
    %56 = vector.shape_cast %55 : vector<1x288x128xf32> to vector<288x128xf32>
    %57 = vector.shape_cast %54 : vector<288x128xf32> to vector<1x288x128xf32>
    tpu.vector_store %arg3[%c0_48, %c0_49, %c0_50], %57 {strides = array<i32>} : memref<1x288x128xf32, #tpu.memory_space<vmem>>, vector<1x288x128xf32>,
    %58 = tpu.iota {dimensions = array<i32: 0>} : vector<288x1xi32>
    %c18_i32 = arith.constant 18 : i32
    %c0_i32 = arith.constant 0 : i32
    %59 = arith.cmpi eq, %c18_i32, %c0_i32 : i32
    %c1_i32 = arith.constant 1 : i32
    %60 = arith.select %59, %c1_i32, %c18_i32 : i32
    %61 = vector.broadcast %60 : i32 to vector<288x1xi32>
    %62 = arith.remsi %58, %61 : vector<288x1xi32>
    %c0_i32_51 = arith.constant 0 : i32
    %63 = vector.broadcast %c0_i32_51 : i32 to vector<288x1xi32>
    %64 = arith.cmpi ne, %62, %63 : vector<288x1xi32>
    %c0_i32_52 = arith.constant 0 : i32
    %65 = vector.broadcast %c0_i32_52 : i32 to vector<288x1xi32>
    %66 = arith.cmpi slt, %62, %65 : vector<288x1xi32>
    %c0_i32_53 = arith.constant 0 : i32
    %67 = arith.cmpi slt, %60, %c0_i32_53 : i32
    %68 = vector.broadcast %67 : i1 to vector<288x1xi1>
    %69 = vector.broadcast %68 : vector<288x1xi1> to vector<288x1xi1>
    %70 = arith.xori %66, %69 : vector<288x1xi1>
    %71 = arith.andi %70, %64 : vector<288x1xi1>
    %72 = vector.broadcast %60 : i32 to vector<288x1xi32>
    %73 = arith.addi %62, %72 : vector<288x1xi32>
    %74 = arith.select %71, %73, %62 : vector<288x1xi1>, vector<288x1xi32>
    %c16_i32 = arith.constant 16 : i32
    %75 = vector.broadcast %c16_i32 : i32 to vector<288x1xi32>
    %76 = arith.cmpi slt, %74, %75 : vector<288x1xi32>
    %cst_54 = arith.constant 0.000000e+00 : f32
    %77 = vector.shape_cast %76 : vector<288x1xi1> to vector<288x1xi1>
    %78 = vector.broadcast %77 : vector<288x1xi1> to vector<288x128xi1>
    %79 = vector.broadcast %cst_54 : f32 to vector<288x128xf32>
    %80 = arith.select %78, %54, %79 : vector<288x128xi1>, vector<288x128xf32>
    %cst_55 = arith.constant dense<0.000000e+00> : vector<128xf32>
    %81 = vector.multi_reduction <add>, %80, %cst_55 [0] : vector<288x128xf32> to vector<128xf32>
    %82 = vector.shape_cast %81 : vector<128xf32> to vector<1x128xf32>
    %c0_56 = arith.constant 0 : index
    %c0_57 = arith.constant 0 : index
    %c0_58 = arith.constant 0 : index
    %83 = vector.load %arg4[%c0_56, %c0_57, %c0_58] : memref<1x1x128xf32, #tpu.memory_space<vmem>>, vector<1x1x128xf32>
    %84 = vector.shape_cast %83 : vector<1x1x128xf32> to vector<1x128xf32>
    %85 = vector.shape_cast %82 : vector<1x128xf32> to vector<1x1x128xf32>
    tpu.vector_store %arg4[%c0_56, %c0_57, %c0_58], %85 {strides = array<i32>} : memref<1x1x128xf32, #tpu.memory_space<vmem>>, vector<1x1x128xf32>,
    %86 = arith.mulf %80, %80 : vector<288x128xf32>
    %cst_59 = arith.constant dense<0.000000e+00> : vector<128xf32>
    %87 = vector.multi_reduction <add>, %86, %cst_59 [0] : vector<288x128xf32> to vector<128xf32>
    %88 = vector.shape_cast %87 : vector<128xf32> to vector<1x128xf32>
    %c0_60 = arith.constant 0 : index
    %c0_61 = arith.constant 0 : index
    %c0_62 = arith.constant 0 : index
    %89 = vector.load %arg5[%c0_60, %c0_61, %c0_62] : memref<1x1x128xf32, #tpu.memory_space<vmem>>, vector<1x1x128xf32>
    %90 = vector.shape_cast %89 : vector<1x1x128xf32> to vector<1x128xf32>
    %91 = vector.shape_cast %88 : vector<1x128xf32> to vector<1x1x128xf32>
    tpu.vector_store %arg5[%c0_60, %c0_61, %c0_62], %91 {strides = array<i32>} : memref<1x1x128xf32, #tpu.memory_space<vmem>>, vector<1x1x128xf32>,
    return
  }
  func.func @transform_0(%arg0: i32) -> (i32, i32, i32) {
    %c0_i32 = arith.constant 0 : i32
    %c0_i32_0 = arith.constant 0 : i32
    %c0_i32_1 = arith.constant 0 : i32
    return %arg0, %c0_i32, %c0_i32_0 : i32, i32, i32
  }
  func.func @transform_1(%arg0: i32) -> (i32, i32, i32) {
    %c0_i32 = arith.constant 0 : i32
    %c0_i32_0 = arith.constant 0 : i32
    %c0_i32_1 = arith.constant 0 : i32
    %c0_i32_2 = arith.constant 0 : i32
    return %c0_i32, %c0_i32_0, %c0_i32_1 : i32, i32, i32
  }
  func.func @transform_2(%arg0: i32) -> (i32, i32, i32) {
    %c0_i32 = arith.constant 0 : i32
    %c0_i32_0 = arith.constant 0 : i32
    %c0_i32_1 = arith.constant 0 : i32
    return %arg0, %c0_i32, %c0_i32_0 : i32, i32, i32
  }
  func.func @transform_3(%arg0: i32) -> (i32, i32, i32) {
    %c0_i32 = arith.constant 0 : i32
    %c0_i32_0 = arith.constant 0 : i32
    %c0_i32_1 = arith.constant 0 : i32
    return %arg0, %c0_i32, %c0_i32_0 : i32, i32, i32
  }
  func.func @transform_4(%arg0: i32) -> (i32, i32, i32) {
    %c0_i32 = arith.constant 0 : i32
    %c0_i32_0 = arith.constant 0 : i32
    %c0_i32_1 = arith.constant 0 : i32
    return %arg0, %c0_i32, %c0_i32_0 : i32, i32, i32
  }
}

module attributes {stable_mosaic.version = 11 : i64} {
  func.func @_bn_gelu_kernel(%arg0: i32, %arg1: memref<1x288x128xf32, #tpu.memory_space<vmem>>, %arg2: memref<1x128xf32, #tpu.memory_space<vmem>>, %arg3: memref<1x128xf32, #tpu.memory_space<vmem>>, %arg4: memref<1x288x128xf32, #tpu.memory_space<vmem>>, %arg5: memref<1x288x128xf32, #tpu.memory_space<vmem>>) attributes {dimension_semantics = [#tpu.dimension_semantics<parallel>], iteration_bounds = array<i64: 2>, scalar_prefetch = 0 : i64, scratch_operands = 0 : i64, tpu.core_type = #tpu.core_type<tc>, window_params = [{transform_indices = @transform_0, window_bounds = array<i64: 1, 288, 128>}, {pipeline_mode = #tpu.pipeline_mode<synchronous>, transform_indices = @transform_1, window_bounds = array<i64: 1, 128>}, {pipeline_mode = #tpu.pipeline_mode<synchronous>, transform_indices = @transform_2, window_bounds = array<i64: 1, 128>}, {transform_indices = @transform_3, window_bounds = array<i64: 1, 288, 128>}, {transform_indices = @transform_4, window_bounds = array<i64: 1, 288, 128>}]} {
    %c0 = arith.constant 0 : index
    %c0_0 = arith.constant 0 : index
    %c0_1 = arith.constant 0 : index
    %0 = vector.load %arg1[%c0, %c0_0, %c0_1] : memref<1x288x128xf32, #tpu.memory_space<vmem>>, vector<1x288x128xf32>
    %1 = vector.shape_cast %0 : vector<1x288x128xf32> to vector<288x128xf32>
    %c0_2 = arith.constant 0 : index
    %c0_3 = arith.constant 0 : index
    %2 = vector.load %arg2[%c0_2, %c0_3] : memref<1x128xf32, #tpu.memory_space<vmem>>, vector<1x128xf32>
    %3 = vector.broadcast %2 : vector<1x128xf32> to vector<288x128xf32>
    %4 = arith.mulf %1, %3 : vector<288x128xf32>
    %c0_4 = arith.constant 0 : index
    %c0_5 = arith.constant 0 : index
    %5 = vector.load %arg3[%c0_4, %c0_5] : memref<1x128xf32, #tpu.memory_space<vmem>>, vector<1x128xf32>
    %6 = vector.broadcast %5 : vector<1x128xf32> to vector<288x128xf32>
    %7 = arith.addf %4, %6 : vector<288x128xf32>
    %cst = arith.constant 5.000000e-01 : f32
    %8 = vector.broadcast %cst : f32 to vector<288x128xf32>
    %9 = arith.mulf %8, %7 : vector<288x128xf32>
    %cst_6 = arith.constant 0.707106769 : f32
    %10 = vector.broadcast %cst_6 : f32 to vector<288x128xf32>
    %11 = arith.mulf %7, %10 : vector<288x128xf32>
    %12 = math.erf %11 : vector<288x128xf32>
    %cst_7 = arith.constant 1.000000e+00 : f32
    %13 = vector.broadcast %cst_7 : f32 to vector<288x128xf32>
    %14 = arith.addf %13, %12 : vector<288x128xf32>
    %15 = arith.mulf %9, %14 : vector<288x128xf32>
    %c0_8 = arith.constant 0 : index
    %c0_9 = arith.constant 0 : index
    %c0_10 = arith.constant 0 : index
    %16 = vector.load %arg4[%c0_8, %c0_9, %c0_10] : memref<1x288x128xf32, #tpu.memory_space<vmem>>, vector<1x288x128xf32>
    %17 = vector.shape_cast %16 : vector<1x288x128xf32> to vector<288x128xf32>
    %18 = arith.addf %15, %17 : vector<288x128xf32>
    %c0_11 = arith.constant 0 : index
    %c0_12 = arith.constant 0 : index
    %c0_13 = arith.constant 0 : index
    %19 = vector.load %arg5[%c0_11, %c0_12, %c0_13] : memref<1x288x128xf32, #tpu.memory_space<vmem>>, vector<1x288x128xf32>
    %20 = vector.shape_cast %19 : vector<1x288x128xf32> to vector<288x128xf32>
    %21 = vector.shape_cast %18 : vector<288x128xf32> to vector<1x288x128xf32>
    tpu.vector_store %arg5[%c0_11, %c0_12, %c0_13], %21 {strides = array<i32>} : memref<1x288x128xf32, #tpu.memory_space<vmem>>, vector<1x288x128xf32>,
    return
  }
  func.func @transform_0(%arg0: i32) -> (i32, i32, i32) {
    %c0_i32 = arith.constant 0 : i32
    %c0_i32_0 = arith.constant 0 : i32
    %c0_i32_1 = arith.constant 0 : i32
    return %arg0, %c0_i32, %c0_i32_0 : i32, i32, i32
  }
  func.func @transform_1(%arg0: i32) -> (i32, i32) {
    %c0_i32 = arith.constant 0 : i32
    %c0_i32_0 = arith.constant 0 : i32
    %c0_i32_1 = arith.constant 0 : i32
    return %c0_i32, %c0_i32_0 : i32, i32
  }
  func.func @transform_2(%arg0: i32) -> (i32, i32) {
    %c0_i32 = arith.constant 0 : i32
    %c0_i32_0 = arith.constant 0 : i32
    %c0_i32_1 = arith.constant 0 : i32
    return %c0_i32, %c0_i32_0 : i32, i32
  }
  func.func @transform_3(%arg0: i32) -> (i32, i32, i32) {
    %c0_i32 = arith.constant 0 : i32
    %c0_i32_0 = arith.constant 0 : i32
    %c0_i32_1 = arith.constant 0 : i32
    return %arg0, %c0_i32, %c0_i32_0 : i32, i32, i32
  }
  func.func @transform_4(%arg0: i32) -> (i32, i32, i32) {
    %c0_i32 = arith.constant 0 : i32
    %c0_i32_0 = arith.constant 0 : i32
    %c0_i32_1 = arith.constant 0 : i32
    return %arg0, %c0_i32, %c0_i32_0 : i32, i32, i32
  }
}

</mosaic_0001>

<bundles_post_ra>
// kernel: residual_block_forward.5
= control target key start
LH: loop header
LB: loop body
LE: loop exit
PB: predicated region body
PF: predicated region fallthrough
CT: control target
= control target key end

     0   :  { %s1008_s12 = smov 0   ;;  %s1280_s0 = inlined_call_operand.vmem [shape: f32[2,288,128], index: 0, kind: input, shape index: {}]   ;;  %s1281_s1 = inlined_call_operand.vmem [shape: f32[1,128], index: 1, kind: input, shape index: {}]   ;;  %s1282_s2 = inlined_call_operand.vmem [shape: f32[1,128], index: 2, kind: input, shape index: {}]   ;;  %s1283_s3 = inlined_call_operand.vmem [shape: bf16[2,288,128], index: 3, kind: output, shape index: {}]  }
   0x1 LB: > { %s708_s13 = sadd.s32 4294967295, %s986_s12   ;;  %p712_p0 = scmp.ge.s32.totalorder %s986_s12, 1  ;;  %s986_s12 = sphi %s1008_s12, %s13_s12  }
   0x2   : > { %p137_p1 = scmp.lt.s32.totalorder %s986_s12, 3 }
   0x4   : > { %p138_p2 = pnand %p712_p0, %p137_p1 }
   0x5   : > { %p161_p3 = scmp.lt.s32.totalorder (!%p138_p2), %s708_s13, 1 }
   0x6   : > { %141 = sbr.rel (%p138_p2) target bundleno = 97 (0x61), region = 32 }
   0xb   : > { %s1285_s13 = smov (!%p161_p3, %s708_s13), 1  ;;  %v1022_v0 = vld [vmem:[%s1281_s1] ss:$0 sm:$0xff] }
   0xc   : > { %s898_s14 = smul.u32 288, %s1285_s13  ;;  %v1032_v1 = vld [vmem:[%s1282_s2] ss:$0 sm:$0xff] }
   0xd   : > { %s899_s22 = smul.u32 144, %s1285_s13 }
   0xe   : > { %s1027_s19 = scalar_lea.vmem %s1280_s0, %s898_s14 }
   0xf   : > { %v171_v2 = vld [vmem:[%s1027_s19] sm:$0xff]  ;;  %v172_v3 = vld [vmem:[%s1027_s19 + $0x8] sm:$0xff]  ;;  %v173_v4 = vld [vmem:[%s1027_s19 + $0x10] sm:$0xff]  ;;  %s1134_s25 = scalar_lea.vmem %s1283_s3, %s899_s22 }
  0x10   : > { %v214_v5 = vmul.f32 %v1022_v0, %v171_v2  ;;  %v215_v6 = vmul.f32 %v1022_v0, %v172_v3  ;;  %v174_v7 = vld [vmem:[%s1027_s19 + $0x18] sm:$0xff]  ;;  %v216_v8 = vmul.f32 %v1022_v0, %v173_v4  ;;  %v175_v9 = vld [vmem:[%s1027_s19 + $0x20] sm:$0xff]  ;;  %v176_v10 = vld [vmem:[%s1027_s19 + $0x28] sm:$0xff] }
  0x11   : > { %v217_v11 = vmul.f32 %v1022_v0, %v174_v7  ;;  %v218_v12 = vmul.f32 %v1022_v0, %v175_v9  ;;  %v219_v13 = vmul.f32 %v1022_v0, %v176_v10  ;;  %v177_v14 = vld [vmem:[%s1027_s19 + $0x30] sm:$0xff]  ;;  %v178_v15 = vld [vmem:[%s1027_s19 + $0x38] sm:$0xff]  ;;  %v179_v26 = vld [vmem:[%s1027_s19 + $0x40] sm:$0xff] }
  0x12   : > { %v257_v16 = vadd.f32 %v1032_v1, %v214_v5  ;;  %v258_v17 = vadd.f32 %v1032_v1, %v215_v6  ;;  %v259_v18 = vadd.f32 %v1032_v1, %v216_v8  ;;  %v220_v19 = vmul.f32 %v1022_v0, %v177_v14  ;;  %v180_v29 = vld [vmem:[%s1027_s19 + $0x48] sm:$0xff]  ;;  %v181_v30 = vld [vmem:[%s1027_s19 + $0x50] sm:$0xff]  ;;  %v182_v38 = vld [vmem:[%s1027_s19 + $0x58] sm:$0xff] }
  0x13   : > { %v260_v20 = vadd.f32 %v1032_v1, %v217_v11  ;;  %v261_v21 = vadd.f32 %v1032_v1, %v218_v12  ;;  %v262_v22 = vadd.f32 %v1032_v1, %v219_v13  ;;  %v221_v23 = vmul.f32 %v1022_v0, %v178_v15  ;;  %v183_v40 = vld [vmem:[%s1027_s19 + $0x60] sm:$0xff]  ;;  %v184_v49 = vld [vmem:[%s1027_s19 + $0x68] sm:$0xff]  ;;  %v185_v54 = vld [vmem:[%s1027_s19 + $0x70] sm:$0xff] }
  0x14   : > { %v329_v24 = vmul.f32 0.70710677, %v257_v16  ;;  %v330_v25 = vmul.f32 0.70710677, %v258_v17  ;;  %v331_v27 = vmul.f32 0.70710677, %v259_v18  ;;  %v263_v34 = vadd.f32 %v1032_v1, %v220_v19 }
  0x15   : > { %v332_v28 = vmul.f32 0.70710677, %v260_v20  ;;  %v1059_v31 = vmul.f32 0.5, %v257_v16  ;;  %v333_v32 = vmul.f32 0.70710677, %v261_v21  ;;  %v264_v35 = vadd.f32 %v1032_v1, %v221_v23  ;;  %v186_v61 = vld [vmem:[%s1027_s19 + $0x78] sm:$0xff] }
  0x16   : > { %908 = verf.f32 %v329_v24  ;;  %v334_v33 = vmul.f32 0.70710677, %v262_v22  ;;  %v222_v36 = vmul.f32 %v1022_v0, %v179_v26  ;;  %v223_v37 = vmul.f32 %v1022_v0, %v180_v29  ;;  %v187_v62 = vld [vmem:[%s1027_s19 + $0x80] sm:$0xff]  ;;  %v188_v4 = vld [vmem:[%s1027_s19 + $0x88] sm:$0xff]  ;;  %v189_v19 = vld [vmem:[%s1027_s19 + $0x90] sm:$0xff] }
  0x17   : > { %910 = verf.f32 %v330_v25  ;;  %v224_v39 = vmul.f32 %v1022_v0, %v181_v30  ;;  %v1068_v41 = vmul.f32 0.5, %v258_v17  ;;  %v1070_v42 = vmul.f32 0.5, %v259_v18 }
  0x18   : > { %912 = verf.f32 %v331_v27  ;;  %v335_v43 = vmul.f32 0.70710677, %v263_v34  ;;  %v336_v44 = vmul.f32 0.70710677, %v264_v35  ;;  %v265_v45 = vadd.f32 %v1032_v1, %v222_v36 }
  0x19   : > { %914 = verf.f32 %v332_v28  ;;  %v266_v46 = vadd.f32 %v1032_v1, %v223_v37  ;;  %v225_v47 = vmul.f32 %v1022_v0, %v182_v38  ;;  %v267_v48 = vadd.f32 %v1032_v1, %v224_v39  ;;  %v190_v28 = vld [vmem:[%s1027_s19 + $0x98] sm:$0xff] }
  0x1a   : > { %916 = verf.f32 %v333_v32  ;;  %v226_v50 = vmul.f32 %v1022_v0, %v183_v40  ;;  %v1078_v51 = vmul.f32 0.5, %v260_v20  ;;  %v1080_v52 = vmul.f32 0.5, %v261_v21 }
  0x1b   : > { %918 = verf.f32 %v334_v33  ;;  %v337_v53 = vmul.f32 0.70710677, %v265_v45  ;;  %v1083_v55 = vmul.f32 0.5, %v262_v22  ;;  %v338_v56 = vmul.f32 0.70710677, %v266_v46 }
  0x1c   : > { %920 = verf.f32 %v335_v43  ;;  %v268_v57 = vadd.f32 %v1032_v1, %v225_v47  ;;  %v339_v58 = vmul.f32 0.70710677, %v267_v48  ;;  %v227_v59 = vmul.f32 %v1022_v0, %v184_v49 }
  0x1d   : > { %922 = verf.f32 %v336_v44  ;;  %v269_v60 = vadd.f32 %v1032_v1, %v226_v50  ;;  %v1090_v63 = vmul.f32 0.5, %v263_v34  ;;  %v228_v3 = vmul.f32 %v1022_v0, %v185_v54 }
  0x1e   : > { %924 = verf.f32 %v337_v53  ;;  %v340_v2 = vmul.f32 0.70710677, %v268_v57  ;;  %v1094_v5 = vmul.f32 0.5, %v264_v35  ;;  %v270_v6 = vadd.f32 %v1032_v1, %v227_v59 }
  0x1f   : > { %926 = verf.f32 %v338_v56  ;;  %v341_v7 = vmul.f32 0.70710677, %v269_v60  ;;  %v229_v8 = vmul.f32 %v1022_v0, %v186_v61  ;;  %v1099_v9 = vadd.f32 %v1032_v1, %v228_v3 }
  0x20   : > { %928 = verf.f32 %v339_v58  ;;  %v230_v10 = vmul.f32 %v1022_v0, %v187_v62  ;;  %v1102_v11 = vmul.f32 0.5, %v265_v45  ;;  %v342_v12 = vmul.f32 0.70710677, %v270_v6  ;;  %v191_v62 = vld [vmem:[%s1027_s19 + $0xa0] sm:$0xff] }
  0x21   : > { %930 = verf.f32 %v340_v2  ;;  %v231_v13 = vmul.f32 %v1022_v0, %v188_v4  ;;  %v1105_v15 = vmul.f32 0.5, %v266_v46  ;;  %v1108_v16 = vadd.f32 %v1032_v1, %v229_v8  ;;  %v192_v8 = vld [vmem:[%s1027_s19 + $0xa8] sm:$0xff] }
  0x22   : > { %932 = verf.f32 %v341_v7  ;;  %v343_v17 = vmul.f32 0.70710677, %v1099_v9  ;;  %v1112_v18 = vadd.f32 %v1032_v1, %v230_v10  ;;  %v1116_v22 = vmul.f32 0.5, %v267_v48 }
  0x23   : > { %v909_v14 = vpop.eup %908  ;;  %934 = verf.f32 %v342_v12  ;;  %v1119_v23 = vadd.f32 %v1032_v1, %v231_v13  ;;  %v1121_v26 = vmul.f32 0.5, %v268_v57  ;;  %v344_v27 = vmul.f32 0.70710677, %v1108_v16  ;;  %v193_v13 = vld [vmem:[%s1027_s19 + $0xb0] sm:$0xff] }
  0x24   : > { %v911_v20 = vpop.eup %910  ;;  %v401_v21 = vadd.f32 1.0, %v909_v14  ;;  %936 = verf.f32 %v343_v17  ;;  %v1126_v33 = vmul.f32 0.5, %v269_v60  ;;  %v232_v34 = vmul.f32 %v1022_v0, %v189_v19 }
  0x25   : > { %v913_v24 = vpop.eup %912  ;;  %v402_v25 = vadd.f32 1.0, %v911_v20  ;;  %938 = verf.f32 %v344_v27  ;;  %v345_v38 = vmul.f32 0.70710677, %v1112_v18  ;;  %v346_v43 = vmul.f32 0.70710677, %v1119_v23 }
  0x26   : > { %v915_v29 = vpop.eup %914  ;;  %v437_v30 = vmul.f32 %v401_v21, %v1059_v31  ;;  %v403_v32 = vadd.f32 1.0, %v913_v24  ;;  %v233_v44 = vmul.f32 %v1022_v0, %v190_v28  ;;  %v306_v60 = vmul.f32 0.5, %v270_v6  ;;  %v194_v21 = vld [vmem:[%s1027_s19 + $0xb8] sm:$0xff] }
  0x27   : > { %v917_v35 = vpop.eup %916  ;;  %v438_v36 = vmul.f32 %v402_v25, %v1068_v41  ;;  %v404_v37 = vadd.f32 1.0, %v915_v29  ;;  %940 = verf.f32 %v345_v38  ;;  %v307_v7 = vmul.f32 0.5, %v1099_v9 }
  0x28   : > { %v919_v39 = vpop.eup %918  ;;  %v439_v31 = vmul.f32 %v403_v32, %v1070_v42  ;;  %v405_v40 = vadd.f32 1.0, %v917_v35  ;;  %942 = verf.f32 %v346_v43  ;;  %v1142_v42 = vadd.f32 %v1032_v1, %v232_v34 }
  0x29   : > { %v921_v45 = vpop.eup %920  ;;  %v794_v41 = vpack.c.bf16 %v438_v36, %v437_v30  ;;  %v440_v46 = vmul.f32 %v404_v37, %v1078_v51  ;;  %v406_v47 = vadd.f32 1.0, %v919_v39  ;;  %v1147_v51 = vadd.f32 %v1032_v1, %v233_v44 }
  0x2a   : > { %v923_v48 = vpop.eup %922  ;;  %v441_v49 = vmul.f32 %v405_v40, %v1080_v52  ;;  %v407_v50 = vadd.f32 1.0, %v921_v45  ;;  %v347_v61 = vmul.f32 0.70710677, %v1142_v42  ;;  %v234_v20 = vmul.f32 %v1022_v0, %v191_v62  ;;  %v200_v62 = vld [vmem:[%s1027_s19 + $0xe8] sm:$0xff] }
  0x2b   : > { %v925_v53 = vpop.eup %924  ;;  %795 = vst [vmem:[%s1134_s25] sm:$0xff] %v794_v41   ;;  %v799_v54 = vpack.c.bf16 %v440_v46, %v439_v31  ;;  %v442_v56 = vmul.f32 %v406_v47, %v1083_v55  ;;  %v408_v57 = vadd.f32 1.0, %v923_v48  ;;  %v348_v6 = vmul.f32 0.70710677, %v1147_v51  ;;  %v195_v41 = vld [vmem:[%s1027_s19 + $0xc0] sm:$0xff]  ;;  %v196_v46 = vld [vmem:[%s1027_s19 + $0xc8] sm:$0xff] }
  0x2c   : > { %v927_v58 = vpop.eup %926  ;;  %v443_v59 = vmul.f32 %v407_v50, %v1090_v63  ;;  %v409_v52 = vadd.f32 1.0, %v925_v53  ;;  %944 = verf.f32 %v347_v61  ;;  %v1168_v29 = vadd.f32 %v1032_v1, %v234_v20  ;;  %v197_v50 = vld [vmem:[%s1027_s19 + $0xd0] sm:$0xff]  ;;  %v199_v61 = vld [vmem:[%s1027_s19 + $0xe0] sm:$0xff] }
  0x2d   : > { %v929_v2 = vpop.eup %928  ;;  %881 = vst [vmem:[%s1134_s25 + $0x8] sm:$0xff] %v799_v54   ;;  %v804_v3 = vpack.c.bf16 %v442_v56, %v441_v49  ;;  %v444_v4 = vmul.f32 %v408_v57, %v1094_v5  ;;  %v410_v55 = vadd.f32 1.0, %v927_v58  ;;  %946 = verf.f32 %v348_v6 }
  0x2e   : > { %v931_v10 = vpop.eup %930  ;;  %v445_v63 = vmul.f32 %v409_v52, %v1102_v11  ;;  %v411_v12 = vadd.f32 1.0, %v929_v2  ;;  %v235_v11 = vmul.f32 %v1022_v0, %v192_v8  ;;  %v237_v35 = vmul.f32 %v1022_v0, %v194_v21 }
  0x2f   : > { %v933_v14 = vpop.eup %932  ;;  %882 = vst [vmem:[%s1134_s25 + $0x10] sm:$0xff] %v804_v3   ;;  %v809_v17 = vpack.c.bf16 %v444_v4, %v443_v59  ;;  %v446_v19 = vmul.f32 %v410_v55, %v1105_v15  ;;  %v412_v5 = vadd.f32 1.0, %v931_v10  ;;  %v236_v15 = vmul.f32 %v1022_v0, %v193_v13  ;;  %v198_v59 = vld [vmem:[%s1027_s19 + $0xd8] sm:$0xff]  ;;  %v201_v10 = vld [vmem:[%s1027_s19 + $0xf0] sm:$0xff] }
  0x30   : > { %v447_v9 = vmul.f32 %v411_v12, %v1116_v22  ;;  %v413_v24 = vadd.f32 1.0, %v933_v14  ;;  %v935_v25 = vpop.eup %934  ;;  %v1173_v22 = vadd.f32 %v1032_v1, %v235_v11  ;;  %v349_v38 = vmul.f32 0.70710677, %v1168_v29 }
  0x31   : > { %883 = vst [vmem:[%s1134_s25 + $0x18] sm:$0xff] %v809_v17   ;;  %v814_v27 = vpack.c.bf16 %v446_v19, %v445_v63  ;;  %v448_v28 = vmul.f32 %v412_v5, %v1121_v26  ;;  %v937_v30 = vpop.eup %936  ;;  %v414_v32 = vadd.f32 1.0, %v935_v25  ;;  %v308_v26 = vmul.f32 0.5, %v1108_v16 }
  0x32   : > { %v449_v34 = vmul.f32 %v413_v24, %v1126_v33  ;;  %v415_v37 = vadd.f32 1.0, %v937_v30  ;;  %v939_v39 = vpop.eup %938  ;;  %v309_v40 = vmul.f32 0.5, %v1112_v18  ;;  %v350_v33 = vmul.f32 0.70710677, %v1173_v22 }
  0x33   : > { %884 = vst [vmem:[%s1134_s25 + $0x20] sm:$0xff] %v814_v27   ;;  %v819_v36 = vpack.c.bf16 %v448_v28, %v447_v9  ;;  %v450_v31 = vmul.f32 %v414_v32, %v306_v60  ;;  %v1182_v43 = vadd.f32 %v1032_v1, %v236_v15  ;;  %v416_v44 = vadd.f32 1.0, %v939_v39  ;;  %v202_v28 = vld [vmem:[%s1027_s19 + $0xf8] sm:$0xff]  ;;  %v203_v32 = vld [vmem:[%s1027_s19 + $0x100] sm:$0xff] }
  0x34   : > { %v451_v45 = vmul.f32 %v415_v37, %v307_v7  ;;  %948 = verf.f32 %v349_v38  ;;  %v1186_v16 = vadd.f32 %v1032_v1, %v237_v35  ;;  %v941_v47 = vpop.eup %940  ;;  %v310_v18 = vmul.f32 0.5, %v1119_v23 }
  0x35   : > { %885 = vst [vmem:[%s1134_s25 + $0x28] sm:$0xff] %v819_v36   ;;  %v824_v48 = vpack.c.bf16 %v450_v31, %v449_v34  ;;  %950 = verf.f32 %v350_v33  ;;  %v351_v49 = vmul.f32 0.70710677, %v1182_v43  ;;  %v943_v53 = vpop.eup %942  ;;  %v452_v54 = vmul.f32 %v416_v44, %v308_v26  ;;  %v204_v26 = vld [vmem:[%s1027_s19 + $0x108] sm:$0xff] }
  0x36   : > { %v417_v56 = vadd.f32 1.0, %v941_v47  ;;  %v311_v57 = vmul.f32 0.5, %v1142_v42  ;;  %v352_v58 = vmul.f32 0.70710677, %v1186_v16  ;;  %v418_v52 = vadd.f32 1.0, %v943_v53 }
  0x37   : > { %886 = vst [vmem:[%s1134_s25 + $0x30] sm:$0xff] %v824_v48   ;;  %952 = verf.f32 %v351_v49  ;;  %v238_v23 = vmul.f32 %v1022_v0, %v195_v41  ;;  %v239_v60 = vmul.f32 %v1022_v0, %v196_v46  ;;  %v829_v2 = vpack.c.bf16 %v452_v54, %v451_v45 }
  0x38   : > { %v453_v3 = vmul.f32 %v417_v56, %v309_v40  ;;  %954 = verf.f32 %v352_v58  ;;  %v240_v4 = vmul.f32 %v1022_v0, %v197_v50  ;;  %v454_v42 = vmul.f32 %v418_v52, %v310_v18  ;;  %v205_v52 = vld [vmem:[%s1027_s19 + $0x110] sm:$0xff] }
  0x39   : > { %v1203_v55 = vadd.f32 %v1032_v1, %v238_v23  ;;  %v1206_v7 = vadd.f32 %v1032_v1, %v239_v60  ;;  %v241_v8 = vmul.f32 %v1022_v0, %v198_v59  ;;  %v945_v63 = vpop.eup %944  ;;  %887 = vst [vmem:[%s1134_s25 + $0x38] sm:$0xff] %v829_v2   ;;  %v242_v6 = vmul.f32 %v1022_v0, %v199_v61 }
  0x3a   : > { %v1212_v12 = vadd.f32 %v1032_v1, %v240_v4  ;;  %v243_v13 = vmul.f32 %v1022_v0, %v200_v62  ;;  %v834_v14 = vpack.c.bf16 %v454_v42, %v453_v3  ;;  %v312_v17 = vmul.f32 0.5, %v1147_v51  ;;  %v947_v5 = vpop.eup %946 }
  0x3b   : > { %v419_v19 = vadd.f32 1.0, %v945_v63  ;;  %v353_v20 = vmul.f32 0.70710677, %v1203_v55  ;;  %v354_v21 = vmul.f32 0.70710677, %v1206_v7  ;;  %v1220_v9 = vadd.f32 %v1032_v1, %v241_v8 }
  0x3c   : > { %v244_v24 = vmul.f32 %v1022_v0, %v201_v10  ;;  %888 = vst [vmem:[%s1134_s25 + $0x40] sm:$0xff] %v834_v14   ;;  %v420_v11 = vadd.f32 1.0, %v947_v5  ;;  %v355_v27 = vmul.f32 0.70710677, %v1212_v12  ;;  %v1226_v51 = vadd.f32 %v1032_v1, %v242_v6 }
  0x3d   : > { %v455_v25 = vmul.f32 %v419_v19, %v311_v57  ;;  %956 = verf.f32 %v353_v20  ;;  %v356_v15 = vmul.f32 0.70710677, %v1220_v9  ;;  %v1231_v30 = vadd.f32 %v1032_v1, %v243_v13 }
  0x3e   : > { %v456_v34 = vmul.f32 %v420_v11, %v312_v17  ;;  %v313_v35 = vmul.f32 0.5, %v1168_v29  ;;  %958 = verf.f32 %v354_v21  ;;  %v357_v36 = vmul.f32 0.70710677, %v1226_v51 }
  0x3f   : > { %v314_v37 = vmul.f32 0.5, %v1173_v22  ;;  %960 = verf.f32 %v355_v27  ;;  %v358_v38 = vmul.f32 0.70710677, %v1231_v30  ;;  %v245_v39 = vmul.f32 %v1022_v0, %v202_v28 }
  0x40   : > { %v839_v40 = vpack.c.bf16 %v456_v34, %v455_v25  ;;  %962 = verf.f32 %v356_v15  ;;  %v1241_v33 = vadd.f32 %v1032_v1, %v244_v24  ;;  %v246_v29 = vmul.f32 %v1022_v0, %v203_v32 }
  0x41   : > { %v949_v31 = vpop.eup %948  ;;  %964 = verf.f32 %v357_v36  ;;  %v1245_v41 = vadd.f32 %v1032_v1, %v245_v39  ;;  %v247_v22 = vmul.f32 %v1022_v0, %v204_v26  ;;  %v315_v47 = vmul.f32 0.5, %v1182_v43  ;;  %v206_v43 = vld [vmem:[%s1027_s19 + $0x118] sm:$0xff] }
  0x42   : > { %v951_v44 = vpop.eup %950  ;;  %v421_v45 = vadd.f32 1.0, %v949_v31  ;;  %889 = vst [vmem:[%s1134_s25 + $0x48] sm:$0xff] %v839_v40   ;;  %966 = verf.f32 %v358_v38  ;;  %v359_v48 = vmul.f32 0.70710677, %v1241_v33  ;;  %v316_v50 = vmul.f32 0.5, %v1186_v16 }
  0x43   : > { %v422_v46 = vadd.f32 1.0, %v951_v44  ;;  %v360_v53 = vmul.f32 0.70710677, %v1245_v41  ;;  %v289_v54 = vadd.f32 %v1032_v1, %v246_v29  ;;  %v290_v59 = vadd.f32 %v1032_v1, %v247_v22 }
  0x44   : > { %v953_v18 = vpop.eup %952  ;;  %v457_v49 = vmul.f32 %v421_v45, %v313_v35  ;;  %968 = verf.f32 %v359_v48  ;;  %v248_v3 = vmul.f32 %v1022_v0, %v205_v52  ;;  %v249_v4 = vmul.f32 %v1022_v0, %v206_v43 }
  0x45   : > { %v955_v56 = vpop.eup %954  ;;  %v458_v57 = vmul.f32 %v422_v46, %v314_v37  ;;  %v423_v58 = vadd.f32 1.0, %v953_v18  ;;  %970 = verf.f32 %v360_v53  ;;  %v361_v60 = vmul.f32 0.70710677, %v289_v54 }
  0x46   : > { %v424_v23 = vadd.f32 1.0, %v955_v56  ;;  %v362_v16 = vmul.f32 0.70710677, %v290_v59  ;;  %v317_v8 = vmul.f32 0.5, %v1203_v55  ;;  %v291_v10 = vadd.f32 %v1032_v1, %v248_v3 }
  0x47   : > { %v844_v61 = vpack.c.bf16 %v458_v57, %v457_v49  ;;  %v459_v62 = vmul.f32 %v423_v58, %v315_v47  ;;  %972 = verf.f32 %v361_v60  ;;  %v292_v63 = vadd.f32 %v1032_v1, %v249_v4 }
  0x48   : > { %v460_v2 = vmul.f32 %v424_v23, %v316_v50  ;;  %974 = verf.f32 %v362_v16  ;;  %v318_v13 = vmul.f32 0.5, %v1206_v7  ;;  %v319_v19 = vmul.f32 0.5, %v1212_v12 }
  0x49   : > { %890 = vst [vmem:[%s1134_s25 + $0x50] sm:$0xff] %v844_v61   ;;  %v363_v5 = vmul.f32 0.70710677, %v291_v10  ;;  %v320_v21 = vmul.f32 0.5, %v1220_v9  ;;  %v364_v24 = vmul.f32 0.70710677, %v292_v63 }
  0x4a   : > { %v849_v42 = vpack.c.bf16 %v460_v2, %v459_v62  ;;  %v957_v6 = vpop.eup %956  ;;  %v321_v27 = vmul.f32 0.5, %v1226_v51  ;;  %v322_v15 = vmul.f32 0.5, %v1231_v30  ;;  %v323_v26 = vmul.f32 0.5, %v1241_v33 }
  0x4b   : > { %v959_v14 = vpop.eup %958  ;;  %v425_v17 = vadd.f32 1.0, %v957_v6  ;;  %976 = verf.f32 %v363_v5  ;;  %v324_v51 = vmul.f32 0.5, %v1245_v41  ;;  %v325_v44 = vmul.f32 0.5, %v289_v54 }
  0x4c   : > { %891 = vst [vmem:[%s1134_s25 + $0x58] sm:$0xff] %v849_v42   ;;  %v961_v20 = vpop.eup %960  ;;  %v426_v0 = vadd.f32 1.0, %v959_v14  ;;  %978 = verf.f32 %v364_v24  ;;  %v326_v47 = vmul.f32 0.5, %v290_v59  ;;  %v327_v56 = vmul.f32 0.5, %v291_v10 }
  0x4d   : > { %v963_v11 = vpop.eup %962  ;;  %v461_v55 = vmul.f32 %v425_v17, %v317_v8  ;;  %v427_v25 = vadd.f32 1.0, %v961_v20  ;;  %v328_v54 = vmul.f32 0.5, %v292_v63 }
  0x4e   : > { %v965_v1 = vpop.eup %964  ;;  %v462_v7 = vmul.f32 %v426_v0, %v318_v13  ;;  %v428_v28 = vadd.f32 1.0, %v963_v11 }
  0x4f   : > { %v967_v12 = vpop.eup %966  ;;  %v463_v32 = vmul.f32 %v427_v25, %v319_v19  ;;  %v429_v34 = vadd.f32 1.0, %v965_v1 }
  0x50   : > { %v854_v35 = vpack.c.bf16 %v462_v7, %v461_v55  ;;  %v464_v9 = vmul.f32 %v428_v28, %v320_v21  ;;  %v430_v36 = vadd.f32 1.0, %v967_v12 }
  0x51   : > { %v969_v37 = vpop.eup %968  ;;  %v465_v38 = vmul.f32 %v429_v34, %v321_v27 }
  0x52   : > { %v971_v39 = vpop.eup %970  ;;  %892 = vst [vmem:[%s1134_s25 + $0x60] sm:$0xff] %v854_v35   ;;  %v859_v31 = vpack.c.bf16 %v464_v9, %v463_v32  ;;  %v466_v40 = vmul.f32 %v430_v36, %v322_v15  ;;  %v431_v30 = vadd.f32 1.0, %v969_v37 }
  0x53   : > { %v432_v29 = vadd.f32 1.0, %v971_v39 }
  0x54   : > { %v973_v45 = vpop.eup %972  ;;  %893 = vst [vmem:[%s1134_s25 + $0x68] sm:$0xff] %v859_v31   ;;  %v864_v22 = vpack.c.bf16 %v466_v40, %v465_v38  ;;  %v467_v46 = vmul.f32 %v431_v30, %v323_v26 }
  0x55   : > { %v975_v33 = vpop.eup %974  ;;  %v468_v48 = vmul.f32 %v432_v29, %v324_v51  ;;  %v433_v18 = vadd.f32 1.0, %v973_v45 }
  0x56   : > { %894 = vst [vmem:[%s1134_s25 + $0x70] sm:$0xff] %v864_v22   ;;  %v434_v41 = vadd.f32 1.0, %v975_v33 }
  0x57   : > { %v869_v49 = vpack.c.bf16 %v468_v48, %v467_v46  ;;  %v469_v50 = vmul.f32 %v433_v18, %v325_v44 }
  0x58   : > { %v470_v53 = vmul.f32 %v434_v41, %v326_v47  ;;  %v977_v57 = vpop.eup %976 }
  0x59   : > { %895 = vst [vmem:[%s1134_s25 + $0x78] sm:$0xff] %v869_v49   ;;  %v979_v52 = vpop.eup %978  ;;  %v435_v43 = vadd.f32 1.0, %v977_v57 }
  0x5a   : > { %v874_v58 = vpack.c.bf16 %v470_v53, %v469_v50  ;;  %v436_v23 = vadd.f32 1.0, %v979_v52 }
  0x5b   : > { %v471_v59 = vmul.f32 %v435_v43, %v327_v56 }
  0x5c   : > { %896 = vst [vmem:[%s1134_s25 + $0x80] sm:$0xff] %v874_v58   ;;  %v472_v60 = vmul.f32 %v436_v23, %v328_v54 }
  0x5e   : > { %v879_v61 = vpack.c.bf16 %v472_v60, %v471_v59 }
  0x60   : > { %897 = vst [vmem:[%s1134_s25 + $0x88] sm:$0xff] %v879_v61  }
  0x61 PF: > { %s13_s12 = sadd.s32 1, %s986_s12  }
  0x62   : > { %p10_p4 = scmp.ge.s32.totalorder %s13_s12, 4  }
  0x64   :  { %12 = sbr.rel (!%p10_p4) target bundleno = 1 (0x1), region = 62 }

// kernel: residual_block_forward.4
= control target key start
LH: loop header
LB: loop body
LE: loop exit
PB: predicated region body
PF: predicated region fallthrough
CT: control target
= control target key end

     0   :  { %s6152_s15 = smov 0   ;;  %s9114_s0 = inlined_call_operand.vmem [shape: bf16[2,328,128], index: 0, kind: input, shape index: {}]   ;;  %s9115_s1 = inlined_call_operand.vmem [shape: bf16[9,128,128], index: 1, kind: input, shape index: {}]   ;;  %s9116_s2 = inlined_call_operand.vmem [shape: f32[2,288,128], index: 2, kind: output, shape index: {0}]   ;;  %s9117_s3 = inlined_call_operand.vmem [shape: f32[2,1,128], index: 3, kind: output, shape index: {1}]   ;;  %s9118_s4 = inlined_call_operand.vmem [shape: f32[2,1,128], index: 4, kind: output, shape index: {2}]  }
   0x1 LB: > { %s4914_s16 = sadd.s32 4294967295, %s6125_s15   ;;  %p4918_p0 = scmp.ge.s32.totalorder %s6125_s15, 1  ;;  %s6125_s15 = sphi %s6152_s15, %s15_s15  }
   0x2   : > { %p167_p1 = scmp.lt.s32.totalorder %s6125_s15, 3 }
   0x4   : > { %p168_p2 = pnand %p4918_p0, %p167_p1 }
   0x6   : > { %171 = sbr.rel (%p168_p2) target bundleno = 611 (0x263), region = 28 }
   0xb   : > { %v5985_v0 = vld [vmem:[%s9115_s1 + $0x78] sm:$0xff]   ;;  %p199_p3 = scmp.lt.s32.totalorder %s4914_s16, 1  ;;  %v5986_v1 = vld [vmem:[%s9115_s1 + $0x70] sm:$0xff]   ;;  %v5987_v2 = vld [vmem:[%s9115_s1 + $0x68] sm:$0xff]   ;;  %vm379_vm0 = vsmask.f32 7424 }
   0xc   : > { %5887 = vmatprep.subr.bf16.mxu1 %v5985_v0  ;;  %5419 = vmatprep.subr.bf16.mxu0 %v5985_v0  ;;  %v5988_v3 = vld [vmem:[%s9115_s1 + $0x60] sm:$0xff]   ;;  %v5989_v6 = vld [vmem:[%s9115_s1 + $0x58] sm:$0xff]   ;;  %v5990_v17 = vld [vmem:[%s9115_s1 + $0x50] sm:$0xff]   ;;  %vm1035_vm1 = vcmask 1046528   ;;  %vm2307_vm2 = vcmask 1045504   ;;  %vm3579_vm4 = vcmask 1044480  }
   0xd   : > { %s9694_s16 = smov (!%p199_p3, %s4914_s16), 1  ;;  %5895 = vmatpush3.bf16.msra.mxu1 %v5985_v0  ;;  %5420 = vmatpush3.bf16.msra.mxu0 %v5985_v0  ;;  %v5991_v26 = vld [vmem:[%s9115_s1 + $0x48] sm:$0xff]   ;;  %v5992_v32 = vld [vmem:[%s9115_s1 + $0x40] sm:$0xff]   ;;  %v5996_v41 = vld [vmem:[%s9115_s1 + $0x38] sm:$0xff]   ;;  %vm1836_vm3 = vsmask.f32 6400 }
   0xe   : > { %5888 = vmatprep.subr.bf16.mxu1 %v5986_v1  ;;  %5421 = vmatprep.subr.bf16.mxu0 %v5986_v1  ;;  %s5903_s23 = smul.u32 164, %s9694_s16  ;;  %v6001_v47 = vld [vmem:[%s9115_s1 + $0xb8] sm:$0xff]   ;;  %v6000_v52 = vld [vmem:[%s9115_s1 + $0x30] sm:$0xff]   ;;  %vm3108_vm5 = vsmask.f32 5376  ;;  %s211_s6 = scalar_lea.vmem %s9117_s3, %s9694_s16 }
   0xf   : > { %v6004_v62 = vld [vmem:[%s9115_s1 + $0xb0] sm:$0xff]   ;;  %s214_s9 = scalar_lea.vmem %s9118_s4, %s9694_s16 }
  0x10   : > { %s6175_s26 = scalar_lea.vmem %s9114_s0, %s5903_s23 }
  0x11   : > { %5896 = vmatpush3.bf16.msra.mxu1 %v5986_v1  ;;  %5422 = vmatpush3.bf16.msra.mxu0 %v5986_v1  ;;  %v6181_v4 = vld [vmem:[%s6175_s26 + $0x40] sm:$0xff]   ;;  %v6184_v5 = vld [vmem:[%s6175_s26 + $0x48] sm:$0xff]   ;;  %v6213_v22 = vld [vmem:[%s6175_s26 + $0x50] sm:$0xff]  }
  0x12   : > { %5889 = vmatprep.subr.bf16.mxu1 %v5987_v2  ;;  %5423 = vmatprep.subr.bf16.mxu0 %v5987_v2  ;;  %v444_v7 = vshll.u32 %v6181_v4, 16  ;;  %v448_v8 = vshrl.u32 %v6181_v4, 16  ;;  %v452_v9 = vshll.u32 %v6184_v5, 16  ;;  %v216_v10 = vld [vmem:[%s6175_s26] sm:$0xf]  ;;  %v6202_v15 = vld [vmem:[%s6175_s26 + $0x8] sm:$0xff]  }
  0x13   : > { %v6196_v13 = vld [vmem:[%s6175_s26 + $0x4] sm:$0xf]  ;;  %v388_v20 = vshll.u32 %v6202_v15, 16  ;;  %v6216_v25 = vld [vmem:[%s6175_s26 + $0x10] sm:$0xff]   ;;  %v460_v28 = vshll.u32 %v6213_v22, 16  ;;  %v6223_v29 = vld [vmem:[%s6175_s26 + $0x58] sm:$0xff]  }
  0x14   : > { %v6193_v11 = vrot.slane %v444_v7, 1  ;;  %v454_v12 = vrot.slane %v452_v9, 1  ;;  %v6199_v14 = vcombine.low %v216_v10, %v6196_v13  ;;  %v456_v30 = vshrl.u32 %v6184_v5, 16  ;;  %v6233_v35 = vld [vmem:[%s6175_s26 + $0x18] sm:$0xff]   ;;  %v6238_v39 = vld [vmem:[%s6175_s26 + $0x60] sm:$0xff]   ;;  %v6252_v50 = vld [vmem:[%s6175_s26 + $0x68] sm:$0xff]  }
  0x15   : > { %5897 = vmatpush3.bf16.msra.mxu1 %v5987_v2  ;;  %5424 = vmatpush3.bf16.msra.mxu0 %v5987_v2  ;;  %v390_v24 = vrot.slane %v388_v20, 1  ;;  %v392_v33 = vshrl.u32 %v6202_v15, 16  ;;  %v396_v34 = vshll.u32 %v6216_v25, 16  ;;  %v462_v36 = vrot.slane %v460_v28, 1  ;;  %v6246_v46 = vld [vmem:[%s6175_s26 + $0x20] sm:$0xff]   ;;  %v6264_v60 = vld [vmem:[%s6175_s26 + $0x28] sm:$0xff]  }
  0x16   : > { %5890 = vmatprep.subr.bf16.mxu1 %v5988_v3  ;;  %5425 = vmatprep.subr.bf16.mxu0 %v5988_v3  ;;  %v450_v16 = vor.u32 %v448_v8, %v6193_v11  ;;  %v381_v18 = vshrl.u32 %v6199_v14, 16  ;;  %v383_v19 = vshll.u32 %v6199_v14, 16  ;;  %v464_v37 = vshrl.u32 %v6213_v22, 16  ;;  %v6273_v1 = vld [vmem:[%s6175_s26 + $0x70] sm:$0xff]   ;;  %v6005_v2 = vld [vmem:[%s9115_s1 + $0x28] sm:$0xff]  }
  0x17   : > { %v468_v38 = vshll.u32 %v6223_v29, 16  ;;  %v458_v40 = vor.u32 %v456_v30, %v454_v12  ;;  %v400_v42 = vshrl.u32 %v6216_v25, 16  ;;  %v404_v43 = vshll.u32 %v6233_v35, 16 }
  0x18   : > { %v455_v21 = vsel %vm379_vm0, %v450_v16, %v454_v12  ;;  %v385_v23 = vrot.slane %v383_v19, 1  ;;  %v394_v44 = vor.u32 %v392_v33, %v390_v24  ;;  %v398_v45 = vrot.slane %v396_v34, 1  ;;  %v6008_v16 = vld [vmem:[%s9115_s1 + $0xa8] sm:$0xff]   ;;  %v6300_v33 = vld [vmem:[%s6175_s26 + $0x38] sm:$0xff]   ;;  %v6012_v34 = vld [vmem:[%s9115_s1 + $0xa0] sm:$0xff]  }
  0x19   : > { %5898 = vmatpush3.bf16.msra.mxu1 %v5988_v3  ;;  %5426 = vmatpush3.bf16.msra.mxu0 %v5988_v3  ;;  %v466_v48 = vor.u32 %v464_v37, %v462_v36  ;;  %v470_v49 = vrot.slane %v468_v38, 1  ;;  %v463_v51 = vsel %vm379_vm0, %v458_v40, %v462_v36  ;;  %v472_v53 = vshrl.u32 %v6223_v29, 16  ;;  %v6309_v40 = vld [vmem:[%s6175_s26 + $0x80] sm:$0xff]  }
  0x1a   : > { %5891 = vmatprep.subr.bf16.mxu1 %v5989_v6  ;;  %5427 = vmatprep.subr.bf16.mxu0 %v5989_v6  ;;  %v386_v27 = vor.u32 %v385_v23, %v381_v18  ;;  %v402_v54 = vor.u32 %v400_v42, %v398_v45  ;;  %v406_v55 = vrot.slane %v404_v43, 1  ;;  %v399_v56 = vsel %vm379_vm0, %v394_v44, %v398_v45  ;;  %v6290_v23 = vld [vmem:[%s6175_s26 + $0x78] sm:$0xff]  }
  0x1b   : > { %5451 = vmatprep.mubr.bf16.mxu1 %v455_v21  ;;  %v476_v57 = vshll.u32 %v6238_v39, 16  ;;  %v408_v58 = vshrl.u32 %v6233_v35, 16  ;;  %v412_v59 = vshll.u32 %v6246_v46, 16  ;;  %v471_v61 = vsel %vm379_vm0, %v466_v48, %v470_v49 }
  0x1c   : > { %v391_v31 = vsel %vm379_vm0, %v386_v27, %v390_v24  ;;  %v480_v63 = vshrl.u32 %v6238_v39, 16  ;;  %v484_v0 = vshll.u32 %v6252_v50, 16  ;;  %v407_v3 = vsel %vm379_vm0, %v402_v54, %v406_v55  ;;  %v6010_v24 = vld [vmem:[%s9115_s1 + $0x20] sm:$0xff]  }
  0x1d   : > { %5899 = vmatpush3.bf16.msra.mxu1 %v5989_v6  ;;  %5428 = vmatpush3.bf16.msra.mxu0 %v5989_v6  ;;  %v416_v6 = vshrl.u32 %v6246_v46, 16  ;;  %v420_v7 = vshll.u32 %v6264_v60, 16  ;;  %v474_v8 = vor.u32 %v472_v53, %v470_v49  ;;  %v478_v9 = vrot.slane %v476_v57, 1  ;;  %v6019_v57 = vld [vmem:[%s9115_s1 + $0x10] sm:$0xff]  }
  0x1e   : > { %5892 = vmatprep.subr.bf16.mxu1 %v5990_v17  ;;  %5429 = vmatprep.subr.bf16.mxu0 %v5990_v17  ;;  %v410_v10 = vor.u32 %v408_v58, %v406_v55  ;;  %v414_v12 = vrot.slane %v412_v59, 1  ;;  %v486_v19 = vrot.slane %v484_v0, 1  ;;  %v488_v20 = vshrl.u32 %v6252_v50, 16  ;;  %v1014_v0 = vld [vmem:[%s6175_s26] sm:$0xe] }
  0x1f   : > { %5435 = vmatprep.mubr.bf16.mxu0 %v391_v31  ;;  %v482_v18 = vor.u32 %v480_v63, %v478_v9  ;;  %v492_v21 = vshll.u32 %v6273_v1, 16  ;;  %v422_v27 = vrot.slane %v420_v7, 1  ;;  %v424_v28 = vshrl.u32 %v6264_v60, 16  ;;  %v6020_v7 = vld [vmem:[%s9115_s1 + $0x90] sm:$0xff]  }
  0x20   : > { %v479_v30 = vsel %vm379_vm0, %v474_v8, %v478_v9  ;;  %v415_v31 = vsel %vm379_vm0, %v410_v10, %v414_v12  ;;  %v496_v36 = vshrl.u32 %v6273_v1, 16  ;;  %v500_v38 = vshll.u32 %v6290_v23, 16  ;;  %v6025_v8 = vld [vmem:[%s6175_s26 + $0x90] ss:$0 sps:$4 sm:$0x11]  }
  0x21   : > { %5900 = vmatpush3.bf16.msra.mxu1 %v5990_v17  ;;  %5430 = vmatpush3.bf16.msra.mxu0 %v5990_v17  ;;  %v6285_v17 = vld [vmem:[%s6175_s26 + $0x30] sm:$0xff]   ;;  %v487_v37 = vsel %vm379_vm0, %v482_v18, %v486_v19  ;;  %v436_v42 = vshll.u32 %v6300_v33, 16  ;;  %v490_v44 = vor.u32 %v488_v20, %v486_v19  ;;  %v494_v45 = vrot.slane %v492_v21, 1  ;;  %v6022_v19 = vld [vmem:[%s9115_s1 + $0x88] sm:$0xff]  }
  0x22   : > { %5893 = vmatprep.subr.bf16.mxu1 %v5991_v26  ;;  %5431 = vmatprep.subr.bf16.mxu0 %v5991_v26  ;;  %v426_v48 = vor.u32 %v424_v28, %v422_v27  ;;  %v502_v54 = vrot.slane %v500_v38, 1  ;;  %v504_v55 = vshrl.u32 %v6290_v23, 16  ;;  %v6023_v20 = vld [vmem:[%s9115_s1 + $0x8] sm:$0xff]  }
  0x23   : > { %v498_v53 = vor.u32 %v496_v36, %v494_v45  ;;  %v438_v59 = vrot.slane %v436_v42, 1  ;;  %v6027_v36 = vld [vmem:[%s9115_s1] sm:$0xff]   ;;  %v6029_v42 = vld [vmem:[%s9115_s1 + $0xf8] sm:$0xff]  }
  0x25   : > { %5901 = vmatpush3.bf16.msra.mxu1 %v5991_v26  ;;  %5432 = vmatpush3.bf16.msra.mxu0 %v5991_v26  ;;  %v418_v26 = vor.u32 %v416_v6, %v414_v12  ;;  %v503_v6 = vsel %vm379_vm0, %v498_v53, %v502_v54  ;;  %v4988_v12 = vcombine.low %v1014_v0, %v6196_v13  ;;  %v6032_v53 = vld [vmem:[%s9115_s1 + $0x130] sm:$0xff]   ;;  %v1049_v0 = vrot.slane %v6300_v33, 1 }
  0x26   : > { %5894 = vmatprep.subr.bf16.mxu1 %v5992_v32  ;;  %5433 = vmatprep.subr.bf16.mxu0 %v5992_v32 }
  0x27   : > { %v423_v43 = vsel %vm379_vm0, %v418_v26, %v422_v27  ;;  %v1036_v13 = vrot.slane %v4988_v12, 1  ;;  %v1037_v26 = vrot.slane %v6202_v15, 1  ;;  %v6042_v12 = vld [vmem:[%s9115_s1 + $0x108] sm:$0xff]  }
  0x29   : > { %5902 = vmatpush3.bf16.msra.mxu1 %v5992_v32  ;;  %5434 = vmatpush3.bf16.msra.mxu0 %v5992_v32  ;;  %v428_v32 = vshll.u32 %v6285_v17, 16 }
  0x2a   : > { %5471 = vmatprep.subr.bf16.mxu1 %v5996_v41  ;;  %5523 = vmatprep.subr.bf16.mxu0 %v6001_v47 }
  0x2b   : > { %v430_v49 = vrot.slane %v428_v32, 1 }
  0x2c   : > { %5452 = vmatmul.mubr.bf16.vlgmr.msra.gmra.mxu1 %v463_v51  ;;  %5436 = vmatmul.mubr.bf16.vlgmr.msra.gmra.mxu0 %v399_v56  ;;  %v6016_v51 = vld [vmem:[%s9115_s1 + $0x98] sm:$0xff]   ;;  %v508_v56 = vshll.u32 %v6309_v40, 16 }
  0x2d   : > { %5472 = vmatpush3.bf16.msra.mxu1 %v5996_v41  ;;  %5524 = vmatpush3.bf16.msra.mxu0 %v6001_v47  ;;  %v432_v41 = vshrl.u32 %v6285_v17, 16  ;;  %v6014_v47 = vld [vmem:[%s9115_s1 + $0x18] sm:$0xff]   ;;  %v431_v63 = vsel %vm379_vm0, %v426_v48, %v430_v49 }
  0x2e   : > { %5473 = vmatprep.subr.bf16.mxu1 %v6000_v52  ;;  %5455 = vmatprep.mubr.bf16.mxu1 %v471_v61  ;;  %v440_v61 = vshrl.u32 %v6300_v33, 16  ;;  %v510_v9 = vrot.slane %v508_v56, 1  ;;  %v6034_v56 = vld [vmem:[%s9115_s1 + $0x128] sm:$0xff]  }
  0x2f   : > { %5525 = vmatprep.subr.bf16.mxu0 %v6004_v62  ;;  %5439 = vmatprep.mubr.bf16.mxu0 %v407_v3  ;;  %v434_v58 = vor.u32 %v432_v41, %v430_v49  ;;  %v1039_v41 = vrot.slane %v6216_v25, 1 }
  0x30   : > { %v442_v18 = vor.u32 %v440_v61, %v438_v59  ;;  %v6036_v61 = vld [vmem:[%s9115_s1 + $0x120] sm:$0xff]  }
  0x31   : > { %5474 = vmatpush3.bf16.msra.mxu1 %v6000_v52  ;;  %5526 = vmatpush3.bf16.msra.mxu0 %v6004_v62  ;;  %v6321_v52 = vld [vmem:[%s6175_s26 + $0x88] sm:$0xff]   ;;  %v495_v62 = vsel %vm379_vm0, %v490_v44, %v494_v45  ;;  %v439_v10 = vsel %vm379_vm0, %v434_v58, %v438_v59  ;;  %v1041_v45 = vrot.slane %v6233_v35, 1  ;;  %v1040_v49 = vsel %vm1035_vm1, %v1037_v26, %v1039_v41  ;;  %v6031_v59 = vld [vmem:[%s9115_s1 + $0xf0] sm:$0xff]  }
  0x32   : > { %5475 = vmatprep.subr.bf16.mxu1 %v6005_v2  ;;  %5527 = vmatprep.subr.bf16.mxu0 %v6008_v16  ;;  %v516_v3 = vshll.u32 %v6321_v52, 16  ;;  %v447_v28 = vsel %vm379_vm0, %v442_v18, %v6193_v11  ;;  %v1069_v44 = vrot.slane %v6321_v52, 1  ;;  %v1057_v18 = vrot.slane %v6223_v29, 1 }
  0x34   : > { %5456 = vmatmul.mubr.bf16.gmra.mxu1 %v479_v30  ;;  %5440 = vmatmul.mubr.bf16.gmra.mxu0 %v415_v31  ;;  %v520_v30 = vshrl.u32 %v6321_v52, 16  ;;  %v524_v31 = vshll.u32 %v6025_v8, 16 }
  0x35   : > { %5476 = vmatpush3.bf16.msra.mxu1 %v6005_v2  ;;  %5528 = vmatpush3.bf16.msra.mxu0 %v6008_v16  ;;  %v512_v2 = vshrl.u32 %v6309_v40, 16  ;;  %v506_v16 = vor.u32 %v504_v55, %v502_v54  ;;  %v1042_v54 = vsel %vm1035_vm1, %v1039_v41, %v1041_v45  ;;  %v1043_v55 = vrot.slane %v6246_v46, 1 }
  0x36   : > { %5459 = vmatprep.mubr.bf16.mxu1 %v487_v37  ;;  %5477 = vmatprep.subr.bf16.mxu1 %v6010_v24  ;;  %v1038_v37 = vsel %vm1035_vm1, %v1036_v13, %v1037_v26  ;;  %v526_v38 = vrot.slane %v524_v31, 1  ;;  %v1352_v13 = vld [vmem:[%s6175_s26 + $0x8] sm:$0xe]  ;;  %v1353_v26 = vld [vmem:[%s6175_s26 + $0xc] sm:$0xf]  ;;  %v1061_v31 = vrot.slane %v6252_v50, 1 }
  0x37   : > { %5529 = vmatprep.subr.bf16.mxu0 %v6012_v34  ;;  %5443 = vmatprep.mubr.bf16.mxu0 %v423_v43  ;;  %v514_v21 = vor.u32 %v512_v2, %v510_v9  ;;  %v511_v27 = vsel %vm379_vm0, %v506_v16, %v510_v9  ;;  %v6030_v43 = vld [vmem:[%s9115_s1 + $0x138] sm:$0xff]   ;;  %v1044_v58 = vsel %vm1035_vm1, %v1041_v45, %v1043_v55  ;;  %v1055_v16 = vrot.slane %v6213_v22, 1 }
  0x38   : > { %v6037_v9 = vld [vmem:[%s9115_s1 + $0xd8] sm:$0xff]   ;;  %v1065_v45 = vrot.slane %v6290_v23, 1 }
  0x39   : > { %5478 = vmatpush3.bf16.msra.mxu1 %v6010_v24  ;;  %5530 = vmatpush3.bf16.msra.mxu0 %v6012_v34  ;;  %v518_v24 = vrot.slane %v516_v3, 1  ;;  %v6026_v34 = vld [vmem:[%s9115_s1 + $0x80] sm:$0xff]   ;;  %v6038_v3 = vld [vmem:[%s9115_s1 + $0x118] sm:$0xff]  }
  0x3a   : > { %5479 = vmatprep.subr.bf16.mxu1 %v6014_v47  ;;  %5531 = vmatprep.subr.bf16.mxu0 %v6016_v51 }
  0x3b   : > { %v519_v32 = vsel %vm379_vm0, %v514_v21, %v518_v24  ;;  %v522_v11 = vor.u32 %v520_v30, %v518_v24  ;;  %v6043_v21 = vld [vmem:[%s9115_s1 + $0xc0] sm:$0xff]   ;;  %v6445_v24 = vld [vmem:[%s9115_s1 + $0x1b8] sm:$0xff]  }
  0x3c   : > { %5460 = vmatmul.mubr.bf16.gmra.mxu1 %v495_v62  ;;  %5444 = vmatmul.mubr.bf16.gmra.mxu0 %v431_v63  ;;  %v1047_v62 = vrot.slane %v6285_v17, 1  ;;  %v6033_v63 = vld [vmem:[%s9115_s1 + $0xe8] sm:$0xff]   ;;  %v6456_v30 = vld [vmem:[%s6175_s26 + $0x18] sm:$0xff]  }
  0x3d   : > { %5480 = vmatpush3.bf16.msra.mxu1 %v6014_v47  ;;  %5532 = vmatpush3.bf16.msra.mxu0 %v6016_v51  ;;  %v1071_v47 = vrot.slane %v6025_v8, 1  ;;  %v527_v48 = vsel %vm379_vm0, %v522_v11, %v526_v38  ;;  %v1053_v8 = vrot.slane %v6184_v5, 1  ;;  %v1063_v38 = vrot.slane %v6273_v1, 1 }
  0x3e   : > { %5463 = vmatprep.mubr.bf16.mxu1 %v503_v6  ;;  %5481 = vmatprep.subr.bf16.mxu1 %v6019_v57  ;;  %v1050_v2 = vsel %vm1035_vm1, %v1047_v62, %v1049_v0  ;;  %v1051_v6 = vrot.slane %v6181_v4, 1 }
  0x3f   : > { %5533 = vmatprep.subr.bf16.mxu0 %v6020_v7  ;;  %5447 = vmatprep.mubr.bf16.mxu0 %v439_v10  ;;  %v6374_v51 = vsel %vm1035_vm1, %v1069_v44, %v1071_v47  ;;  %v6039_v10 = vld [vmem:[%s9115_s1 + $0xd0] sm:$0xff]   ;;  %v1064_v47 = vsel %vm1035_vm1, %v1061_v31, %v1063_v38 }
  0x41   : > { %5482 = vmatpush3.bf16.msra.mxu1 %v6019_v57  ;;  %5534 = vmatpush3.bf16.msra.mxu0 %v6020_v7  ;;  %v1045_v57 = vrot.slane %v6264_v60, 1  ;;  %v6040_v7 = vld [vmem:[%s9115_s1 + $0x110] sm:$0xff]  }
  0x42   : > { %5535 = vmatprep.subr.bf16.mxu0 %v6022_v19  ;;  %5483 = vmatprep.subr.bf16.mxu1 %v6023_v20 }
  0x44   : > { %5464 = vmatmul.mubr.bf16.gmra.mxu1 %v511_v27  ;;  %5448 = vmatmul.mubr.bf16.gmra.mxu0 %v447_v28  ;;  %v6451_v27 = vld [vmem:[%s6175_s26 + $0x10] sm:$0xff]   ;;  %v1059_v28 = vrot.slane %v6238_v39, 1 }
  0x45   : > { %5536 = vmatpush3.bf16.msra.mxu0 %v6022_v19  ;;  %5467 = vmatprep.mubr.bf16.mxu1 %v519_v32  ;;  %v6041_v19 = vld [vmem:[%s9115_s1 + $0xc8] sm:$0xff]   ;;  %v2309_v32 = vrot.slane %v6451_v27, 2 }
  0x46   : > { %5484 = vmatpush3.bf16.msra.mxu1 %v6023_v20  ;;  %5537 = vmatprep.subr.bf16.mxu0 %v6026_v34  ;;  %v1058_v20 = vsel %vm1035_vm1, %v1055_v16, %v1057_v18 }
  0x47   : > { %5485 = vmatprep.subr.bf16.mxu1 %v6027_v36  ;;  %5539 = vmatprep.mubr.bf16.mxu0 %v1038_v37  ;;  %v1062_v37 = vsel %vm1035_vm1, %v1059_v28, %v1061_v31 }
  0x49   : > { %5538 = vmatpush3.bf16.msra.mxu0 %v6026_v34  ;;  %v1060_v34 = vsel %vm1035_vm1, %v1057_v18, %v1059_v28 }
  0x4a   : > { %5486 = vmatpush3.bf16.msra.mxu1 %v6027_v36  ;;  %5627 = vmatprep.subr.bf16.mxu0 %v6030_v43  ;;  %v6468_v36 = vcombine.low %v1352_v13, %v1353_v26 }
  0x4b   : > { %5575 = vmatprep.subr.bf16.mxu1 %v6029_v42 }
  0x4c   : > { %5468 = vmatmul.mubr.bf16.gmra.mxu1 %v527_v48  ;;  %5540 = vmatmul.mubr.bf16.vlgmr.msra.gmra.mxu0 %v1040_v49  ;;  %v1838_v41 = vshrl.u32 %v6468_v36, 16  ;;  %v1849_v48 = vshll.u32 %v6451_v27, 16  ;;  %v1858_v49 = vshll.u32 %v6456_v30, 16 }
  0x4d   : > { %5487 = vmatprep.mubr.bf16.mxu1 %v6199_v14  ;;  %5628 = vmatpush3.bf16.msra.mxu0 %v6030_v43  ;;  %v1046_v14 = vsel %vm1035_vm1, %v1043_v55, %v1045_v57  ;;  %v1846_v43 = vshrl.u32 %v6451_v27, 16 }
  0x4e   : > { %5543 = vmatprep.mubr.bf16.mxu0 %v1042_v54  ;;  %5629 = vmatprep.subr.bf16.mxu0 %v6032_v53  ;;  %v1840_v54 = vrot.slane %v1838_v41, 1 }
  0x51   : > { %5630 = vmatpush3.bf16.msra.mxu0 %v6032_v53  ;;  %v1499_v53 = vrot.slane %v6468_v36, 1 }
  0x52   : > { %5631 = vmatprep.subr.bf16.mxu0 %v6034_v56 }
  0x54   : > { %5488 = vmatmul.mubr.bf16.vlgmr.msra.gmra.mxu1 %v6202_v15  ;;  %5544 = vmatmul.mubr.bf16.gmra.mxu0 %v1044_v58  ;;  %v1048_v15 = vsel %vm1035_vm1, %v1045_v57, %v1047_v62  ;;  %v1500_v57 = vrot.slane %v6451_v27, 1  ;;  %v1066_v58 = vsel %vm1035_vm1, %v1063_v38, %v1065_v45  ;;  %v6552_v38 = vld [vmem:[%s6175_s26 + $0x58] sm:$0xff]  }
  0x55   : > { %5576 = vmatpush3.bf16.msra.mxu1 %v6029_v42  ;;  %5491 = vmatprep.mubr.bf16.mxu1 %v6216_v25  ;;  %v6035_v25 = vld [vmem:[%s9115_s1 + $0xe0] sm:$0xff]   ;;  %v1841_v42 = vshll.u32 %v6468_v36, 16  ;;  %v6058_v36 = vld [vmem:[%s9115_s1 + $0x1a8] sm:$0xff]  }
  0x56   : > { %5577 = vmatprep.subr.bf16.mxu1 %v6031_v59  ;;  %5547 = vmatprep.mubr.bf16.mxu0 %v1046_v14  ;;  %v6491_v14 = vld [vmem:[%s6175_s26 + $0x20] sm:$0xff]  }
  0x57   : > { %5632 = vmatpush3.bf16.msra.mxu0 %v6034_v56  ;;  %v1843_v55 = vrot.slane %v1841_v42, 2  ;;  %v1848_v56 = vrot.slane %v1846_v43, 1 }
  0x58   : > { %5633 = vmatprep.subr.bf16.mxu0 %v6036_v61 }
  0x59   : > { %5578 = vmatpush3.bf16.msra.mxu1 %v6031_v59  ;;  %v1851_v59 = vrot.slane %v1849_v48, 2  ;;  %v1844_v31 = vor.u32 %v1843_v55, %v1840_v54  ;;  %v6566_v54 = vld [vmem:[%s6175_s26 + $0x60] sm:$0xff]  }
  0x5a   : > { %5579 = vmatprep.subr.bf16.mxu1 %v6033_v63 }
  0x5b   : > { %5634 = vmatpush3.bf16.msra.mxu0 %v6036_v61  ;;  %v2286_v61 = vld [vmem:[%s6175_s26 + $0x8] sm:$0xc] }
  0x5c   : > { %5492 = vmatmul.mubr.bf16.gmra.mxu1 %v6233_v35  ;;  %5548 = vmatmul.mubr.bf16.gmra.mxu0 %v1048_v15  ;;  %v1052_v35 = vsel %vm1035_vm1, %v1049_v0, %v1051_v6  ;;  %v5081_v0 = vcombine.low %v2286_v61, %v1353_v26  ;;  %v1860_v15 = vrot.slane %v1858_v49, 2  ;;  %v6577_v61 = vld [vmem:[%s6175_s26 + $0x68] sm:$0xff]  }
  0x5d   : > { %5495 = vmatprep.mubr.bf16.mxu1 %v6246_v46  ;;  %5580 = vmatpush3.bf16.msra.mxu1 %v6033_v63  ;;  %v1054_v46 = vsel %vm1035_vm1, %v1051_v6, %v1053_v8  ;;  %v6496_v63 = vld [vmem:[%s6175_s26 + $0x28] sm:$0xff]   ;;  %v2313_v6 = vrot.slane %v6491_v14, 2 }
  0x5e   : > { %5551 = vmatprep.mubr.bf16.mxu0 %v1050_v2  ;;  %5581 = vmatprep.subr.bf16.mxu1 %v6035_v25  ;;  %v1864_v2 = vshrl.u32 %v6491_v14, 16  ;;  %v1873_v13 = vshrl.u32 %v6496_v63, 16 }
  0x5f   : > { %5635 = vmatprep.subr.bf16.mxu0 %v6038_v3 }
  0x60   : > { %5636 = vmatpush3.bf16.msra.mxu0 %v6038_v3  ;;  %v6501_v3 = vld [vmem:[%s6175_s26 + $0x30] sm:$0xff]   ;;  %v1866_v18 = vrot.slane %v1864_v2, 1  ;;  %v1875_v43 = vrot.slane %v1873_v13, 1 }
  0x61   : > { %5582 = vmatpush3.bf16.msra.mxu1 %v6035_v25  ;;  %5637 = vmatprep.subr.bf16.mxu0 %v6040_v7  ;;  %v2308_v25 = vrot.slane %v5081_v0, 2  ;;  %v1885_v48 = vshll.u32 %v6501_v3, 16  ;;  %v2329_v0 = vrot.slane %v6566_v54, 2  ;;  %v6583_v2 = vld [vmem:[%s6175_s26 + $0x70] sm:$0xff]  }
  0x62   : > { %5583 = vmatprep.subr.bf16.mxu1 %v6037_v9 }
  0x64   : > { %5496 = vmatmul.mubr.bf16.gmra.mxu1 %v6264_v60  ;;  %5552 = vmatmul.mubr.bf16.gmra.mxu0 %v1052_v35  ;;  %v6044_v60 = vld [vmem:[%s9115_s1 + $0x100] sm:$0xff]   ;;  %v1867_v35 = vshll.u32 %v6491_v14, 16 }
  0x65   : > { %5499 = vmatprep.mubr.bf16.mxu1 %v6285_v17  ;;  %5555 = vmatprep.mubr.bf16.mxu0 %v1054_v46  ;;  %v1056_v17 = vsel %vm1035_vm1, %v1053_v8, %v1055_v16  ;;  %v6507_v8 = vld [vmem:[%s6175_s26 + $0x38] sm:$0xff]   ;;  %v6515_v46 = vld [vmem:[%s6175_s26 + $0x40] sm:$0xff]  }
  0x66   : > { %5584 = vmatpush3.bf16.msra.mxu1 %v6037_v9  ;;  %5638 = vmatpush3.bf16.msra.mxu0 %v6040_v7  ;;  %v1502_v7 = vrot.slane %v6456_v30, 1  ;;  %v6510_v9 = vsel %vm2307_vm2, %v2308_v25, %v2309_v32  ;;  %v1891_v55 = vshrl.u32 %v6507_v8, 16 }
  0x67   : > { %5585 = vmatprep.subr.bf16.mxu1 %v6039_v10  ;;  %5639 = vmatprep.subr.bf16.mxu0 %v6042_v12 }
  0x6a   : > { %5586 = vmatpush3.bf16.msra.mxu1 %v6039_v10  ;;  %5640 = vmatpush3.bf16.msra.mxu0 %v6042_v12 }
  0x6b   : > { %5587 = vmatprep.subr.bf16.mxu1 %v6041_v19  ;;  %5641 = vmatprep.subr.bf16.mxu0 %v6044_v60 }
  0x6c   : > { %5500 = vmatmul.mubr.bf16.gmra.mxu1 %v6300_v33  ;;  %5556 = vmatmul.mubr.bf16.gmra.mxu0 %v1056_v17  ;;  %v6463_v33 = vld [vmem:[%s9115_s1 + $0x178] sm:$0xff]   ;;  %v2319_v17 = vrot.slane %v6507_v8, 2 }
  0x6d   : > { %5503 = vmatprep.mubr.bf16.mxu1 %v6181_v4  ;;  %5559 = vmatprep.mubr.bf16.mxu0 %v1058_v20  ;;  %v2311_v4 = vrot.slane %v6456_v30, 2  ;;  %v6531_v20 = vld [vmem:[%s6175_s26 + $0x48] sm:$0xff]  }
  0x6e   : > { %5588 = vmatpush3.bf16.msra.mxu1 %v6041_v19  ;;  %5642 = vmatpush3.bf16.msra.mxu0 %v6044_v60  ;;  %v1504_v19 = vrot.slane %v6491_v14, 1  ;;  %v2317_v60 = vrot.slane %v6501_v3, 2 }
  0x6f   : > { %5589 = vmatprep.subr.bf16.mxu1 %v6043_v21  ;;  %5731 = vmatprep.subr.bf16.mxu0 %v6445_v24  ;;  %v6472_v11 = vsel %vm2307_vm2, %v2309_v32, %v2311_v4  ;;  %v6518_v10 = vsel %vm2307_vm2, %v2311_v4, %v2313_v6  ;;  %v6543_v32 = vld [vmem:[%s6175_s26 + $0x50] sm:$0xff]  }
  0x70   : > { %v6540_v28 = vsel %vm2307_vm2, %v2317_v60, %v2319_v17  ;;  %v2325_v42 = vrot.slane %v6543_v32, 2 }
  0x72   : > { %5590 = vmatpush3.bf16.msra.mxu1 %v6043_v21  ;;  %v2321_v21 = vrot.slane %v6515_v46, 2 }
  0x73   : > { %5679 = vmatprep.subr.bf16.mxu1 %v6463_v33 }
  0x74   : > { %5504 = vmatmul.mubr.bf16.gmra.mxu1 %v6184_v5  ;;  %5560 = vmatmul.mubr.bf16.gmra.mxu0 %v1060_v34  ;;  %v1067_v5 = vrot.slane %v6309_v40, 1  ;;  %v6546_v4 = vsel %vm2307_vm2, %v2319_v17, %v2321_v21  ;;  %v1876_v34 = vshll.u32 %v6496_v63, 16 }
  0x75   : > { %5507 = vmatprep.mubr.bf16.mxu1 %v6213_v22  ;;  %5563 = vmatprep.mubr.bf16.mxu0 %v1062_v37  ;;  %v1855_v22 = vshrl.u32 %v6456_v30, 16  ;;  %v1506_v37 = vrot.slane %v6496_v63, 1 }
  0x76   : > { %v1070_v16 = vsel %vm1035_vm1, %v1067_v5, %v1069_v44  ;;  %v1869_v44 = vrot.slane %v1867_v35, 2  ;;  %v1878_v49 = vrot.slane %v1876_v34, 2  ;;  %v6594_v35 = vld [vmem:[%s6175_s26 + $0x78] sm:$0xff]   ;;  %v1909_v34 = vshrl.u32 %v6531_v20, 16 }
  0x77   : > { %v1857_v62 = vrot.slane %v1855_v22, 1  ;;  %v2327_v22 = vrot.slane %v6552_v38, 2 }
  0x78   : > { %v1870_v25 = vor.u32 %v1869_v44, %v1866_v18  ;;  %v2333_v18 = vrot.slane %v6583_v2, 2 }
  0x7c   : > { %5508 = vmatmul.mubr.bf16.gmra.mxu1 %v6223_v29  ;;  %5564 = vmatmul.mubr.bf16.gmra.mxu0 %v1064_v47  ;;  %v2315_v29 = vrot.slane %v6496_v63, 2 }
  0x7d   : > { %5511 = vmatprep.mubr.bf16.mxu1 %v6238_v39  ;;  %5567 = vmatprep.mubr.bf16.mxu0 %v1066_v58  ;;  %v1068_v39 = vsel %vm1035_vm1, %v1065_v45, %v1067_v5  ;;  %v1882_v45 = vshrl.u32 %v6501_v3, 16  ;;  %v6573_v58 = vsel %vm2307_vm2, %v2325_v42, %v2327_v22 }
  0x7e   : > { %v6521_v12 = vsel %vm2307_vm2, %v2313_v6, %v2315_v29  ;;  %v6537_v26 = vsel %vm2307_vm2, %v2315_v29, %v2317_v60  ;;  %v6586_v6 = vsel %vm2307_vm2, %v2327_v22, %v2329_v0  ;;  %v2331_v29 = vrot.slane %v6577_v61, 2  ;;  %v6052_v22 = vld [vmem:[%s9115_s1 + $0x170] sm:$0xff]  }
  0x7f   : > { %v1501_v60 = vsel %vm1035_vm1, %v1499_v53, %v1500_v57  ;;  %v1879_v53 = vor.u32 %v1878_v49, %v1875_v43  ;;  %v1503_v49 = vsel %vm1035_vm1, %v1500_v57, %v1502_v7 }
  0x84   : > { %5512 = vmatmul.mubr.bf16.gmra.mxu1 %v6252_v50  ;;  %5568 = vmatmul.mubr.bf16.gmra.mxu0 %v1068_v39  ;;  %v1852_v50 = vor.u32 %v1851_v59, %v1848_v56  ;;  %v1894_v56 = vshll.u32 %v6507_v8, 16  ;;  %v1861_v59 = vor.u32 %v1860_v15, %v1857_v62  ;;  %v1884_v62 = vrot.slane %v1882_v45, 1 }
  0x85   : > { %5515 = vmatprep.mubr.bf16.mxu1 %v6273_v1  ;;  %5571 = vmatprep.mubr.bf16.mxu0 %v1070_v16  ;;  %v2323_v1 = vrot.slane %v6531_v20, 2  ;;  %v1887_v15 = vrot.slane %v1885_v48, 2  ;;  %v6597_v16 = vsel %vm2307_vm2, %v2329_v0, %v2331_v29  ;;  %v6624_v48 = vld [vmem:[%s6175_s26 + $0x88] sm:$0xff]   ;;  %v1505_v0 = vsel %vm1035_vm1, %v1502_v7, %v1504_v19 }
  0x86   : > { %v1853_v47 = vsel %vm1836_vm3, %v1844_v31, %v1852_v50  ;;  %v1862_v39 = vsel %vm1836_vm3, %v1852_v50, %v1861_v59  ;;  %v1871_v17 = vsel %vm1836_vm3, %v1861_v59, %v1870_v25  ;;  %v1896_v44 = vrot.slane %v1894_v56, 2 }
  0x87   : > { %v6555_v41 = vsel %vm2307_vm2, %v2321_v21, %v2323_v1  ;;  %v6562_v5 = vsel %vm2307_vm2, %v2323_v1, %v2325_v42  ;;  %v1893_v21 = vrot.slane %v1891_v55, 1  ;;  %v6607_v50 = vsel %vm2307_vm2, %v2331_v29, %v2333_v18  ;;  %v6617_v42 = vld [vmem:[%s6175_s26 + $0x80] sm:$0xff]  }
  0x88   : > { %v2335_v1 = vrot.slane %v6594_v35, 2  ;;  %v2337_v43 = vrot.slane %v6617_v42, 2  ;;  %v1880_v55 = vsel %vm1836_vm3, %v1870_v25, %v1879_v53  ;;  %v1921_v56 = vshll.u32 %v6543_v32, 16 }
  0x89   : > { %v2339_v59 = vrot.slane %v6624_v48, 2  ;;  %v1897_v25 = vor.u32 %v1896_v44, %v1893_v21  ;;  %v9119_v29 = vrot.slane %v6515_v46, 1  ;;  %v6674_v21 = vld [vmem:[%s6175_s26 + $0x98] ss:$0 sps:$4 sm:$0x33]  }
  0x8a   : > { %v6620_v45 = vsel %vm2307_vm2, %v2333_v18, %v2335_v1  ;;  %v6647_v27 = vsel %vm2307_vm2, %v2335_v1, %v2337_v43  ;;  %v1930_v18 = vshll.u32 %v6552_v38, 16  ;;  %v2625_v1 = vld [vmem:[%s6175_s26 + $0x14] sm:$0xf] }
  0x8c   : > { %5516 = vmatmul.mubr.bf16.gmra.mxu1 %v6290_v23  ;;  %5572 = vmatmul.mubr.bf16.gmra.mxu0 %v6374_v51  ;;  %v1900_v23 = vshrl.u32 %v6515_v46, 16  ;;  %v1903_v51 = vshll.u32 %v6515_v46, 16 }
  0x8d   : > { %5519 = vmatprep.mubr.bf16.mxu1 %v6309_v40  ;;  %5643 = vmatprep.mubr.bf16.mxu0 %v1853_v47  ;;  %v6053_v40 = vld [vmem:[%s9115_s1 + $0x1b0] sm:$0xff]   ;;  %v1888_v47 = vor.u32 %v1887_v15, %v1884_v62  ;;  %v1923_v15 = vrot.slane %v1921_v56, 2 }
  0x8e   : > { %v1902_v13 = vrot.slane %v1900_v23, 1  ;;  %v1905_v31 = vrot.slane %v1903_v51, 2  ;;  %v1508_v23 = vrot.slane %v6501_v3, 1  ;;  %v1510_v51 = vrot.slane %v6507_v8, 1  ;;  %v6063_v8 = vld [vmem:[%s9115_s1 + $0x1a0] sm:$0xff]  }
  0x8f   : > { %v1889_v57 = vsel %vm1836_vm3, %v1879_v53, %v1888_v47  ;;  %v1911_v3 = vrot.slane %v1909_v34, 1  ;;  %v1898_v44 = vsel %vm1836_vm3, %v1888_v47, %v1897_v25 }
  0x90   : > { %v6654_v30 = vor.u32 %v1905_v31, %v1902_v13  ;;  %v1509_v13 = vsel %vm1035_vm1, %v1506_v37, %v1508_v23  ;;  %v6681_v14 = vsel %vm1035_vm1, %v1508_v23, %v1510_v51  ;;  %v2624_v31 = vld [vmem:[%s6175_s26 + $0x10] sm:$0xc] }
  0x91   : > { %v6702_v56 = vcombine.low %v2624_v31, %v2625_v1 }
  0x92   : > { %v1907_v53 = vsel %vm1836_vm3, %v1897_v25, %v6654_v30  ;;  %v1948_v25 = vshll.u32 %v6577_v61, 16 }
  0x94   : > { %5520 = vmatmul.mubr.bf16.gmra.mxu1 %v6321_v52  ;;  %5644 = vmatmul.mubr.bf16.vlgmr.msra.gmra.mxu0 %v1862_v39  ;;  %v1912_v52 = vshll.u32 %v6531_v20, 16  ;;  %v1927_v39 = vshrl.u32 %v6552_v38, 16 }
  0x95   : > { %5591 = vmatprep.mubr.bf16.mxu1 %v1501_v60  ;;  %5732 = vmatpush3.bf16.msra.mxu0 %v6445_v24  ;;  %v1918_v24 = vshrl.u32 %v6543_v32, 16  ;;  %v1507_v60 = vsel %vm1035_vm1, %v1504_v19, %v1506_v37  ;;  %v6686_v19 = vsel %vm1035_vm1, %v1510_v51, %v9119_v29  ;;  %v1939_v51 = vshll.u32 %v6566_v54, 16 }
  0x96   : > { %5647 = vmatprep.mubr.bf16.mxu0 %v1871_v17  ;;  %5733 = vmatprep.subr.bf16.mxu0 %v6053_v40  ;;  %v1914_v7 = vrot.slane %v1912_v52, 2  ;;  %v6671_v17 = vld [vmem:[%s6175_s26 + $0x90] sm:$0xff]   ;;  %v1932_v52 = vrot.slane %v1930_v18, 2 }
  0x97   : > { %v1920_v62 = vrot.slane %v1918_v24, 1  ;;  %v2341_v37 = vrot.slane %v6671_v17, 2  ;;  %v2343_v24 = vrot.slane %v6674_v21, 2  ;;  %v6071_v18 = vld [vmem:[%s9115_s1 + $0x190] sm:$0xff]  }
  0x98   : > { %v1915_v34 = vor.u32 %v1914_v7, %v1911_v3  ;;  %v6067_v3 = vld [vmem:[%s9115_s1 + $0x198] sm:$0xff]   ;;  %v6717_v7 = vld [vmem:[%s6175_s26 + $0x20] sm:$0xff]  }
  0x99   : > { %5734 = vmatpush3.bf16.msra.mxu0 %v6053_v40  ;;  %v6652_v40 = vsel %vm2307_vm2, %v2337_v43, %v2339_v59  ;;  %v6694_v47 = vor.u32 %v1923_v15, %v1920_v62  ;;  %v3558_v43 = vld [vmem:[%s6175_s26 + $0x10] sm:$0x8]  ;;  %v6720_v62 = vsel %vm2307_vm2, %v2341_v37, %v2343_v24  ;;  %v3110_v15 = vshrl.u32 %v6702_v56, 16 }
  0x9a   : > { %5735 = vmatprep.subr.bf16.mxu0 %v6058_v36  ;;  %v5174_v23 = vcombine.low %v3558_v43, %v2625_v1  ;;  %9202 = vst [vmem:[#allocation3_spill] sm:$0xff] %v6720_v62  ;;  %v3583_v31 = vrot.slane %v6717_v7, 3  ;;  %v3127_v24 = vshrl.u32 %v6717_v7, 16  ;;  %v1916_v63 = vsel %vm1836_vm3, %v6654_v30, %v1915_v34 }
  0x9b   : > { %v1950_v62 = vrot.slane %v1948_v25, 2 }
  0x9c   : > { %5592 = vmatmul.mubr.bf16.vlgmr.msra.gmra.mxu1 %v1503_v49  ;;  %5648 = vmatmul.mubr.bf16.gmra.mxu0 %v1880_v55  ;;  %v6060_v49 = vld [vmem:[%s9115_s1 + $0x160] sm:$0xff]   ;;  %v1936_v55 = vshrl.u32 %v6566_v54, 16 }
  0x9d   : > { %5680 = vmatpush3.bf16.msra.mxu1 %v6463_v33  ;;  %5595 = vmatprep.mubr.bf16.mxu1 %v1505_v0  ;;  %v6056_v33 = vld [vmem:[%s9115_s1 + $0x168] sm:$0xff]   ;;  %v6705_v0 = vld [vmem:[%s6175_s26 + $0x18] sm:$0xff]  }
  0x9e   : > { %5681 = vmatprep.subr.bf16.mxu1 %v6052_v22  ;;  %5651 = vmatprep.mubr.bf16.mxu0 %v1889_v57  ;;  %v1945_v57 = vshrl.u32 %v6577_v61, 16  ;;  %v3118_v1 = vshrl.u32 %v6705_v0, 16 }
  0x9f   : > { %5736 = vmatpush3.bf16.msra.mxu0 %v6058_v36  ;;  %v1929_v36 = vrot.slane %v1927_v39, 1  ;;  %v3113_v39 = vshll.u32 %v6702_v56, 16 }
  0xa0   : > { %5737 = vmatprep.subr.bf16.mxu0 %v6063_v8  ;;  %v1947_v30 = vrot.slane %v1945_v57, 1 }
  0xa1   : > { %5682 = vmatpush3.bf16.msra.mxu1 %v6052_v22  ;;  %v6708_v22 = vsel %vm2307_vm2, %v2339_v59, %v2341_v37  ;;  %v3580_v59 = vrot.slane %v5174_v23, 3  ;;  %v3115_v37 = vrot.slane %v3113_v39, 3  ;;  %v3120_v23 = vrot.slane %v3118_v1, 2 }
  0xa2   : > { %5683 = vmatprep.subr.bf16.mxu1 %v6056_v33  ;;  %9201 = vst [vmem:[#allocation2_spill] sm:$0xff] %v6708_v22  ;;  %v1933_v39 = vor.u32 %v1932_v52, %v1929_v36  ;;  %v1925_v1 = vsel %vm1836_vm3, %v1915_v34, %v6694_v47  ;;  %v6748_v22 = vld [vmem:[%s6175_s26 + $0x28] sm:$0xff]   ;;  %v6070_v36 = vld [vmem:[%s9115_s1 + $0x150] sm:$0xff]  }
  0xa3   : > { %5738 = vmatpush3.bf16.msra.mxu0 %v6063_v8  ;;  %v3581_v8 = vrot.slane %v6705_v0, 3  ;;  %v6758_v52 = vld [vmem:[%s6175_s26 + $0x30] sm:$0xff]   ;;  %v3136_v57 = vshrl.u32 %v6748_v22, 16  ;;  %v3139_v25 = vshll.u32 %v6748_v22, 16 }
  0xa4   : > { %5596 = vmatmul.mubr.bf16.gmra.mxu1 %v1507_v60  ;;  %5652 = vmatmul.mubr.bf16.gmra.mxu0 %v1898_v44  ;;  %v3121_v60 = vshll.u32 %v6705_v0, 16  ;;  %v6065_v44 = vld [vmem:[%s9115_s1 + $0x158] sm:$0xff]  }
  0xa5   : > { %5599 = vmatprep.mubr.bf16.mxu1 %v1509_v13  ;;  %5684 = vmatpush3.bf16.msra.mxu1 %v6056_v33  ;;  %v6735_v13 = vsel %vm3579_vm4, %v3580_v59, %v3581_v8  ;;  %v3112_v33 = vrot.slane %v3110_v15, 2  ;;  %v6739_v43 = vsel %vm3579_vm4, %v3581_v8, %v3583_v31  ;;  %v3129_v15 = vrot.slane %v3127_v24, 2 }
  0xa6   : > { %5655 = vmatprep.mubr.bf16.mxu0 %v1907_v53  ;;  %5685 = vmatprep.subr.bf16.mxu1 %v6060_v49  ;;  %9203 = vst [vmem:[#allocation4_spill] sm:$0xff] %v6735_v13  ;;  %9204 = vst [vmem:[#allocation5_spill] sm:$0xff] %v6739_v43  ;;  %v3123_v29 = vrot.slane %v3121_v60, 3  ;;  %v3130_v53 = vshll.u32 %v6717_v7, 16  ;;  %v1938_v60 = vrot.slane %v1936_v55, 1  ;;  %v1941_v13 = vrot.slane %v1939_v51, 2 }
  0xa7   : > { %5739 = vmatprep.subr.bf16.mxu0 %v6067_v3  ;;  %v3116_v59 = vor.u32 %v3115_v37, %v3112_v33  ;;  %v1957_v55 = vshll.u32 %v6583_v2, 16  ;;  %v3585_v51 = vrot.slane %v6748_v22, 3  ;;  %v3587_v37 = vrot.slane %v6758_v52, 3 }
  0xa8   : > { %5740 = vmatpush3.bf16.msra.mxu0 %v6067_v3  ;;  %v3124_v8 = vor.u32 %v3123_v29, %v3120_v23  ;;  %v3132_v43 = vrot.slane %v3130_v53, 3  ;;  %v1954_v3 = vshrl.u32 %v6583_v2, 16  ;;  %v6075_v29 = vld [vmem:[%s9115_s1 + $0x188] sm:$0xff]   ;;  %v3145_v24 = vshrl.u32 %v6758_v52, 16 }
  0xa9   : > { %5686 = vmatpush3.bf16.msra.mxu1 %v6060_v49  ;;  %5741 = vmatprep.subr.bf16.mxu0 %v6071_v18  ;;  %v3138_v23 = vrot.slane %v3136_v57, 2  ;;  %v3141_v53 = vrot.slane %v3139_v25, 3 }
  0xaa   : > { %5687 = vmatprep.subr.bf16.mxu1 %v6065_v44  ;;  %v6761_v34 = vsel %vm3108_vm5, %v3116_v59, %v3124_v8  ;;  %v3133_v49 = vor.u32 %v3132_v43, %v3129_v15  ;;  %v6778_v43 = vsel %vm3579_vm4, %v3583_v31, %v3585_v51  ;;  %v6074_v59 = vld [vmem:[%s9115_s1 + $0x148] sm:$0xff]   ;;  %v9208_v15 = vrot.slane %v6531_v20, 1  ;;  %v6808_v20 = vld [vmem:[%s6175_s26 + $0x38] sm:$0xff]  }
  0xab   : > { %9206 = vst [vmem:[#allocation7_spill] sm:$0xff] %v6778_v43  ;;  %v3142_v43 = vor.u32 %v3141_v53, %v3138_v23  ;;  %v1951_v23 = vor.u32 %v1950_v62, %v1947_v30  ;;  %v1975_v62 = vshll.u32 %v6617_v42, 16  ;;  %v3589_v30 = vrot.slane %v6808_v20, 3 }
  0xac   : > { %5600 = vmatmul.mubr.bf16.gmra.mxu1 %v6681_v14  ;;  %5656 = vmatmul.mubr.bf16.gmra.mxu0 %v1916_v63  ;;  %v6770_v33 = vsel %vm3108_vm5, %v3124_v8, %v3133_v49  ;;  %v3148_v14 = vshll.u32 %v6758_v52, 16  ;;  %v6775_v63 = vor.u32 %v1941_v13, %v1938_v60  ;;  %v6080_v13 = vld [vmem:[%s9115_s1 + $0x180] sm:$0xff]   ;;  %v9209_v8 = vrot.slane %v6515_v46, 1 }
  0xad   : > { %5603 = vmatprep.mubr.bf16.mxu1 %v6686_v19  ;;  %5659 = vmatprep.mubr.bf16.mxu0 %v1925_v1  ;;  %9205 = vst [vmem:[#allocation6_spill] sm:$0xff] %v6770_v33  ;;  %v1963_v19 = vshrl.u32 %v6594_v35, 16  ;;  %v9210_v60 = vrot.slane %v6543_v32, 1  ;;  %v9211_v57 = vmov %v9208_v15  ;;  %v1518_v33 = vrot.slane %v6552_v38, 1 }
  0xae   : > { %5688 = vmatpush3.bf16.msra.mxu1 %v6065_v44  ;;  %5742 = vmatpush3.bf16.msra.mxu0 %v6071_v18  ;;  %v6788_v44 = vsel %vm3579_vm4, %v3585_v51, %v3587_v37  ;;  %v3147_v18 = vrot.slane %v3145_v24, 2  ;;  %v3150_v31 = vrot.slane %v3148_v14, 3  ;;  %v1515_v1 = vsel %vm1035_vm1, %v9209_v8, %v9208_v15 }
  0xaf   : > { %5689 = vmatprep.subr.bf16.mxu1 %v6070_v36  ;;  %5743 = vmatprep.subr.bf16.mxu0 %v6075_v29  ;;  %9207 = vst [vmem:[#allocation8_spill] sm:$0xff] %v6788_v44  ;;  %v1517_v25 = vsel %vm1035_vm1, %v9211_v57, %v9210_v60  ;;  %v1934_v51 = vsel %vm1836_vm3, %v6694_v47, %v1933_v39  ;;  %v1956_v24 = vrot.slane %v1954_v3, 1  ;;  %v1959_v14 = vrot.slane %v1957_v55, 2 }
  0xb0   : > { %v3151_v44 = vor.u32 %v3150_v31, %v3147_v18  ;;  %v1943_v46 = vsel %vm1836_vm3, %v1933_v39, %v6775_v63  ;;  %v1966_v8 = vshll.u32 %v6594_v35, 16  ;;  %v6811_v38 = vsel %vm3108_vm5, %v3133_v49, %v3142_v43  ;;  %v6078_v39 = vld [vmem:[%s9115_s1 + $0x140] sm:$0xff]  }
  0xb1   : > { %9212 = vst [vmem:[#allocation9_spill] sm:$0xff] %v6811_v38  ;;  %v1965_v47 = vrot.slane %v1963_v19, 1  ;;  %v1972_v3 = vshrl.u32 %v6617_v42, 16  ;;  %v3154_v55 = vshrl.u32 %v6808_v20, 16  ;;  %v3157_v53 = vshll.u32 %v6808_v20, 16 }
  0xb2   : > { %5690 = vmatpush3.bf16.msra.mxu1 %v6070_v36  ;;  %5744 = vmatpush3.bf16.msra.mxu0 %v6075_v29  ;;  %v6820_v36 = vld [vmem:[%s9115_s1 + $0x238] sm:$0xff]   ;;  %v6823_v29 = vld [vmem:[%s6175_s26 + $0x40] sm:$0xff]   ;;  %v6826_v49 = vsel %vm3108_vm5, %v3142_v43, %v3151_v44  ;;  %v1960_v19 = vor.u32 %v1959_v14, %v1956_v24  ;;  %v1968_v60 = vrot.slane %v1966_v8, 2  ;;  %v1981_v15 = vshrl.u32 %v6624_v48, 16 }
  0xb3   : > { %5691 = vmatprep.subr.bf16.mxu1 %v6074_v59  ;;  %5745 = vmatprep.subr.bf16.mxu0 %v6080_v13  ;;  %9213 = vst [vmem:[#allocation10_spill] sm:$0xff] %v6826_v49  ;;  %v3591_v18 = vrot.slane %v6823_v29, 3  ;;  %v3163_v31 = vshrl.u32 %v6823_v29, 16  ;;  %v3166_v43 = vshll.u32 %v6823_v29, 16  ;;  %v3156_v57 = vrot.slane %v3154_v55, 2 }
  0xb4   : > { %5604 = vmatmul.mubr.bf16.gmra.mxu1 %v1515_v1  ;;  %5660 = vmatmul.mubr.bf16.gmra.mxu0 %v1934_v51  ;;  %v6836_v1 = vsel %vm3579_vm4, %v3587_v37, %v3589_v30  ;;  %v3159_v51 = vrot.slane %v3157_v53, 3  ;;  %v1974_v37 = vrot.slane %v1972_v3, 1  ;;  %v1977_v14 = vrot.slane %v1975_v62, 2  ;;  %v6860_v62 = vld [vmem:[%s6175_s26 + $0x48] sm:$0xff]  }
  0xb5   : > { %5607 = vmatprep.mubr.bf16.mxu1 %v1517_v25  ;;  %5663 = vmatprep.mubr.bf16.mxu0 %v1943_v46  ;;  %9214 = vst [vmem:[#allocation11_spill] sm:$0xff] %v6836_v1  ;;  %v6842_v25 = vld [vmem:[%s9115_s1 + $0x1f8] sm:$0xff]   ;;  %v6846_v24 = vsel %vm3579_vm4, %v3589_v30, %v3591_v18  ;;  %v9215_v8 = vrot.slane %v6543_v32, 1  ;;  %v1952_v53 = vsel %vm1836_vm3, %v6775_v63, %v1951_v23  ;;  %v1522_v49 = vrot.slane %v6577_v61, 1  ;;  %v6868_v61 = vld [vmem:[%s6175_s26 + $0x50] sm:$0xff]  }
  0xb6   : > { %5692 = vmatpush3.bf16.msra.mxu1 %v6074_v59  ;;  %5746 = vmatpush3.bf16.msra.mxu0 %v6080_v13  ;;  %v3165_v59 = vrot.slane %v3163_v31, 2  ;;  %v3168_v13 = vrot.slane %v3166_v43, 3  ;;  %v3160_v46 = vor.u32 %v3159_v51, %v3156_v57  ;;  %v9216_v38 = vrot.slane %v6566_v54, 1 }
  0xb7   : > { %5693 = vmatprep.subr.bf16.mxu1 %v6078_v39  ;;  %5835 = vmatprep.subr.bf16.mxu0 %v6820_v36  ;;  %v1519_v55 = vsel %vm1035_vm1, %v9215_v8, %v1518_v33  ;;  %v1961_v31 = vsel %vm1836_vm3, %v1951_v23, %v1960_v19  ;;  %v1969_v43 = vor.u32 %v1968_v60, %v1965_v47  ;;  %v1983_v57 = vrot.slane %v1981_v15, 1 }
  0xb8   : > { %v3169_v1 = vor.u32 %v3168_v13, %v3165_v59  ;;  %v1521_v30 = vsel %vm1035_vm1, %v1518_v33, %v9216_v38  ;;  %v6863_v32 = vsel %vm3108_vm5, %v3151_v44, %v3160_v46  ;;  %v1984_v63 = vshll.u32 %v6624_v48, 16 }
  0xb9   : > { %9217 = vst [vmem:[#allocation12_spill] sm:$0xff] %v6863_v32  ;;  %v1978_v38 = vor.u32 %v1977_v14, %v1974_v37  ;;  %v3593_v23 = vrot.slane %v6860_v62, 3  ;;  %v3175_v44 = vshll.u32 %v6860_v62, 16  ;;  %v1990_v15 = vshrl.u32 %v6671_v17, 16 }
  0xba   : > { %5694 = vmatpush3.bf16.msra.mxu1 %v6078_v39  ;;  %v6871_v33 = vsel %vm3108_vm5, %v3160_v46, %v3169_v1  ;;  %v3172_v39 = vshrl.u32 %v6860_v62, 16  ;;  %v3595_v47 = vrot.slane %v6868_v61, 3  ;;  %v3181_v60 = vshrl.u32 %v6868_v61, 16 }
  0xbb   : > { %5783 = vmatprep.subr.bf16.mxu1 %v6842_v25  ;;  %9218 = vst [vmem:[#allocation13_spill] sm:$0xff] %v6871_v33  ;;  %v3184_v51 = vshll.u32 %v6868_v61, 16  ;;  %v1993_v59 = vshll.u32 %v6671_v17, 16  ;;  %v6882_v13 = vsel %vm3579_vm4, %v3591_v18, %v3593_v23  ;;  %v3177_v14 = vrot.slane %v3175_v44, 3 }
  0xbc   : > { %5608 = vmatmul.mubr.bf16.gmra.mxu1 %v1519_v55  ;;  %5664 = vmatmul.mubr.bf16.gmra.mxu0 %v1952_v53  ;;  %v3174_v37 = vrot.slane %v3172_v39, 2  ;;  %v1986_v46 = vrot.slane %v1984_v63, 2  ;;  %v6885_v8 = vsel %vm3579_vm4, %v3593_v23, %v3595_v47  ;;  %v3183_v55 = vrot.slane %v3181_v60, 2 }
  0xbd   : > { %5611 = vmatprep.mubr.bf16.mxu1 %v1521_v30  ;;  %5667 = vmatprep.mubr.bf16.mxu0 %v1961_v31  ;;  %9219 = vst [vmem:[#allocation14_spill] sm:$0xff] %v6885_v8  ;;  %v3186_v53 = vrot.slane %v3184_v51, 3  ;;  %v9220_v31 = vrot.slane %v6566_v54, 1  ;;  %v1970_v33 = vsel %vm1836_vm3, %v1960_v19, %v1969_v43  ;;  %v9221_v32 = vrot.slane %v6583_v2, 1  ;;  %v6896_v8 = vld [vmem:[%s6175_s26 + $0x58] sm:$0xff]   ;;  %v6904_v19 = vld [vmem:[%s6175_s26 + $0x60] sm:$0xff]  }
  0xbe   : > { %v3178_v30 = vor.u32 %v3177_v14, %v3174_v37  ;;  %v1979_v63 = vsel %vm1836_vm3, %v1969_v43, %v1978_v38  ;;  %v1992_v44 = vrot.slane %v1990_v15, 1  ;;  %v1995_v23 = vrot.slane %v1993_v59, 2 }
  0xbf   : > { %v1523_v3 = vsel %vm1035_vm1, %v9220_v31, %v1522_v49  ;;  %v1525_v18 = vsel %vm1035_vm1, %v1522_v49, %v9221_v32  ;;  %v3187_v39 = vor.u32 %v3186_v53, %v3183_v55  ;;  %v1526_v54 = vrot.slane %v6594_v35, 1 }
  0xc0   : > { %v6899_v60 = vsel %vm3108_vm5, %v3169_v1, %v3178_v30  ;;  %v1987_v51 = vor.u32 %v1986_v46, %v1983_v57  ;;  %v1528_v37 = vrot.slane %v6617_v42, 1  ;;  %v1999_v49 = vshrl.u32 %v6674_v21, 16 }
  0xc1   : > { %v6907_v14 = vsel %vm3108_vm5, %v3178_v30, %v3187_v39  ;;  %v3597_v32 = vrot.slane %v6896_v8, 3  ;;  %v3190_v43 = vshrl.u32 %v6896_v8, 16  ;;  %v3193_v1 = vshll.u32 %v6896_v8, 16 }
  0xc2   : > { %9222 = vst [vmem:[#allocation15_spill] sm:$0xff] %v6907_v14  ;;  %v2002_v35 = vshll.u32 %v6674_v21, 16  ;;  %v3599_v42 = vrot.slane %v6904_v19, 3  ;;  %v3199_v57 = vshrl.u32 %v6904_v19, 16  ;;  %v3202_v15 = vshll.u32 %v6904_v19, 16 }
  0xc3   : > { %v3192_v59 = vrot.slane %v3190_v43, 2  ;;  %v3195_v46 = vrot.slane %v3193_v1, 3  ;;  %v9223_v21 = vrot.slane %v6583_v2, 1  ;;  %v2001_v14 = vrot.slane %v1999_v49, 1  ;;  %v6930_v1 = vld [vmem:[%s6175_s26 + $0x68] sm:$0xff]  }
  0xc4   : > { %5612 = vmatmul.mubr.bf16.gmra.mxu1 %v1523_v3  ;;  %5668 = vmatmul.mubr.bf16.gmra.mxu0 %v1970_v33  ;;  %v1996_v3 = vor.u32 %v1995_v23, %v1992_v44  ;;  %v6918_v33 = vsel %vm3579_vm4, %v3595_v47, %v3597_v32  ;;  %v6921_v55 = vsel %vm3579_vm4, %v3597_v32, %v3599_v42  ;;  %v3201_v53 = vrot.slane %v3199_v57, 2 }
  0xc5   : > { %5615 = vmatprep.mubr.bf16.mxu1 %v1525_v18  ;;  %5671 = vmatprep.mubr.bf16.mxu0 %v1979_v63  ;;  %v3204_v30 = vrot.slane %v3202_v15, 3  ;;  %v1527_v31 = vsel %vm1035_vm1, %v9223_v21, %v1526_v54  ;;  %v3196_v18 = vor.u32 %v3195_v46, %v3192_v59  ;;  %v1988_v63 = vsel %vm1836_vm3, %v1978_v38, %v1987_v51  ;;  %v6938_v15 = vld [vmem:[%s6175_s26 + $0x70] sm:$0xff]  }
  0xc6   : > { %v2004_v44 = vrot.slane %v2002_v35, 2  ;;  %v1529_v47 = vsel %vm1035_vm1, %v1526_v54, %v1528_v37  ;;  %v1997_v43 = vsel %vm1836_vm3, %v1987_v51, %v1996_v3  ;;  %v1530_v57 = vrot.slane %v6624_v48, 1 }
  0xc7   : > { %v3205_v23 = vor.u32 %v3204_v30, %v3201_v53  ;;  %v6933_v32 = vsel %vm3108_vm5, %v3187_v39, %v3196_v18  ;;  %v1532_v2 = vrot.slane %v6671_v17, 1  ;;  %v2772_v54 = vrot.slane %v6705_v0, 2 }
  0xc8   : > { %v3601_v51 = vrot.slane %v6930_v1, 3  ;;  %v3208_v49 = vshrl.u32 %v6930_v1, 16  ;;  %v3211_v39 = vshll.u32 %v6930_v1, 16  ;;  %v2005_v48 = vor.u32 %v2004_v44, %v2001_v14 }
  0xc9   : > { %v6941_v38 = vsel %vm3108_vm5, %v3196_v18, %v3205_v23  ;;  %v9120_v17 = vrot.slane %v6938_v15, 3  ;;  %v3217_v35 = vshrl.u32 %v6938_v15, 16  ;;  %v3220_v59 = vshll.u32 %v6938_v15, 16 }
  0xca   : > { %v2771_v46 = vrot.slane %v6702_v56, 2  ;;  %v6952_v0 = vsel %vm3579_vm4, %v3599_v42, %v3601_v51  ;;  %v3210_v53 = vrot.slane %v3208_v49, 2  ;;  %v3213_v30 = vrot.slane %v3211_v39, 3 }
  0xcb   : > { %v6957_v21 = vsel %vm3579_vm4, %v3601_v51, %v9120_v17  ;;  %v3222_v14 = vrot.slane %v3220_v59, 3  ;;  %v2006_v44 = vsel %vm1836_vm3, %v1996_v3, %v2005_v48  ;;  %v1533_v56 = vsel %vm1035_vm1, %v1530_v57, %v1532_v2  ;;  %v6089_v59 = vld [vmem:[%s9115_s1 + $0x1f0] sm:$0xff]  }
  0xcc   : > { %5616 = vmatmul.mubr.bf16.gmra.mxu1 %v1527_v31  ;;  %5672 = vmatmul.mubr.bf16.gmra.mxu0 %v1988_v63  ;;  %v3219_v31 = vrot.slane %v3217_v35, 2  ;;  %v3214_v18 = vor.u32 %v3213_v30, %v3210_v53  ;;  %v1531_v63 = vsel %vm1035_vm1, %v1528_v37, %v1530_v57  ;;  %v2773_v42 = vsel %vm2307_vm2, %v2771_v46, %v2772_v54 }
  0xcd   : > { %5619 = vmatprep.mubr.bf16.mxu1 %v1529_v47  ;;  %5675 = vmatprep.mubr.bf16.mxu0 %v1997_v43  ;;  %v6079_v47 = vld [vmem:[%s6175_s26 + $0x98] ss:$0 sps:$4 sm:$0x11]   ;;  %v2774_v3 = vrot.slane %v6717_v7, 2  ;;  %v2776_v39 = vrot.slane %v6748_v22, 2  ;;  %v2778_v7 = vrot.slane %v6758_v52, 2 }
  0xce   : > { %v6962_v43 = vor.u32 %v3222_v14, %v3219_v31  ;;  %v6967_v49 = vsel %vm3108_vm5, %v3205_v23, %v3214_v18  ;;  %v1534_v37 = vrot.slane %v6079_v47, 1  ;;  %v6090_v23 = vld [vmem:[%s9115_s1 + $0x230] sm:$0xff]   ;;  %v6095_v22 = vld [vmem:[%s9115_s1 + $0x228] sm:$0xff]   ;;  %v6100_v52 = vld [vmem:[%s9115_s1 + $0x220] sm:$0xff]   ;;  %v2784_v46 = vrot.slane %v6860_v62, 2 }
  0xcf   : > { %9225 = vst [vmem:[#allocation17_spill] sm:$0xff] %v6967_v49  ;;  %v2775_v48 = vsel %vm2307_vm2, %v2772_v54, %v2774_v3  ;;  %v2777_v35 = vsel %vm2307_vm2, %v2774_v3, %v2776_v39  ;;  %v2779_v54 = vsel %vm2307_vm2, %v2776_v39, %v2778_v7  ;;  %v2786_v30 = vrot.slane %v6868_v61, 2  ;;  %v6108_v31 = vld [vmem:[%s9115_s1 + $0x210] sm:$0xff]  }
  0xd0   : > { %9224 = vst [vmem:[#allocation16_spill] sm:$0xff] %v6962_v43  ;;  %v6971_v51 = vsel %vm3108_vm5, %v3214_v18, %v6962_v43  ;;  %v1535_v57 = vsel %vm1035_vm1, %v1532_v2, %v1534_v37  ;;  %v2780_v2 = vrot.slane %v6808_v20, 2  ;;  %v2782_v20 = vrot.slane %v6823_v29, 2  ;;  %v6112_v37 = vld [vmem:[%s9115_s1 + $0x208] sm:$0xff]  }
  0xd1   : > { %9226 = vst [vmem:[#allocation18_spill] sm:$0xff] %v6971_v51 }
  0xd2   : > { %v2785_v29 = vsel %vm2307_vm2, %v2782_v20, %v2784_v46 }
  0xd4   : > { %5620 = vmatmul.mubr.bf16.gmra.mxu1 %v1531_v63  ;;  %5676 = vmatmul.mubr.bf16.gmra.mxu0 %v2006_v44  ;;  %v6102_v63 = vld [vmem:[%s9115_s1 + $0x1d8] sm:$0xff]   ;;  %v2787_v44 = vsel %vm2307_vm2, %v2784_v46, %v2786_v30 }
  0xd5   : > { %5623 = vmatprep.mubr.bf16.mxu1 %v1533_v56  ;;  %5747 = vmatprep.mubr.bf16.mxu0 %v2773_v42  ;;  %v6107_v42 = vld [vmem:[%s9115_s1 + $0x1d0] sm:$0xff]  }
  0xdc   : > { %5624 = vmatmul.mubr.bf16.gmra.mxu1 %v1535_v57  ;;  %5748 = vmatmul.mubr.bf16.vlgmr.msra.gmra.mxu0 %v2775_v48  ;;  %v2790_v57 = vrot.slane %v6904_v19, 2 }
  0xdd   : > { %5695 = vmatprep.mubr.bf16.mxu1 %v6510_v9  ;;  %5836 = vmatpush3.bf16.msra.mxu0 %v6820_v36  ;;  %v2781_v9 = vsel %vm2307_vm2, %v2778_v7, %v2780_v2  ;;  %v6093_v36 = vld [vmem:[%s9115_s1 + $0x1e8] sm:$0xff]  }
  0xde   : > { %5751 = vmatprep.mubr.bf16.mxu0 %v2777_v35  ;;  %5837 = vmatprep.subr.bf16.mxu0 %v6090_v23  ;;  %v2792_v35 = vrot.slane %v6930_v1, 2 }
  0xe1   : > { %5838 = vmatpush3.bf16.msra.mxu0 %v6090_v23 }
  0xe2   : > { %5839 = vmatprep.subr.bf16.mxu0 %v6095_v22 }
  0xe4   : > { %5696 = vmatmul.mubr.bf16.vlgmr.msra.gmra.mxu1 %v6472_v11  ;;  %5752 = vmatmul.mubr.bf16.gmra.mxu0 %v2779_v54  ;;  %v2783_v11 = vsel %vm2307_vm2, %v2780_v2, %v2782_v20  ;;  %v2793_v54 = vsel %vm2307_vm2, %v2790_v57, %v2792_v35 }
  0xe5   : > { %5784 = vmatpush3.bf16.msra.mxu1 %v6842_v25  ;;  %5699 = vmatprep.mubr.bf16.mxu1 %v6518_v10  ;;  %v6097_v10 = vld [vmem:[%s9115_s1 + $0x1e0] sm:$0xff]   ;;  %v6104_v25 = vld [vmem:[%s9115_s1 + $0x218] sm:$0xff]  }
  0xe6   : > { %5785 = vmatprep.subr.bf16.mxu1 %v6089_v59  ;;  %5755 = vmatprep.mubr.bf16.mxu0 %v2781_v9  ;;  %v6115_v9 = vld [vmem:[%s9115_s1 + $0x1c0] sm:$0xff]  }
  0xe7   : > { %5840 = vmatpush3.bf16.msra.mxu0 %v6095_v22 }
  0xe8   : > { %5841 = vmatprep.subr.bf16.mxu0 %v6100_v52 }
  0xe9   : > { %5786 = vmatpush3.bf16.msra.mxu1 %v6089_v59  ;;  %v7075_v59 = vld [vmem:[%s6175_s26 + $0x78] sm:$0xff]  }
  0xea   : > { %5787 = vmatprep.subr.bf16.mxu1 %v6093_v36 }
  0xeb   : > { %5842 = vmatpush3.bf16.msra.mxu0 %v6100_v52 }
  0xec   : > { %v7012_v53 = vpop.f32.mrf.mxu1  ;;  %5700 = vmatmul.mubr.bf16.gmra.mxu1 %v6521_v12  ;;  %v7015_v62 = vpop.f32.mrf.mxu0  ;;  %5756 = vmatmul.mubr.bf16.gmra.mxu0 %v2783_v11  ;;  %v2788_v12 = vrot.slane %v6896_v8, 2 }
  0xed   : > { %5703 = vmatprep.mubr.bf16.mxu1 %v6537_v26  ;;  %5788 = vmatpush3.bf16.msra.mxu1 %v6093_v36  ;;  %v2794_v36 = vrot.slane %v6938_v15, 2 }
  0xee   : > { %v7022_v14 = vpop.f32.mrf.mxu1  ;;  %v7024_v18 = vpop.f32.mrf.mxu0  ;;  %5759 = vmatprep.mubr.bf16.mxu0 %v2785_v29  ;;  %5789 = vmatprep.subr.bf16.mxu1 %v6097_v10  ;;  %v2789_v8 = vsel %vm2307_vm2, %v2786_v30, %v2788_v12  ;;  %v2791_v22 = vsel %vm2307_vm2, %v2788_v12, %v2790_v57 }
  0xef   : > { %5843 = vmatprep.subr.bf16.mxu0 %v6104_v25 }
  0xf0   : > { %v7030_v26 = vpop.f32.mrf.mxu1  ;;  %v7032_v61 = vpop.f32.mrf.mxu0  ;;  %5844 = vmatpush3.bf16.msra.mxu0 %v6104_v25  ;;  %v2795_v25 = vsel %vm2307_vm2, %v2792_v35, %v2794_v36 }
  0xf1   : > { %5790 = vmatpush3.bf16.msra.mxu1 %v6097_v10  ;;  %5845 = vmatprep.subr.bf16.mxu0 %v6108_v31  ;;  %v2796_v10 = vrot.slane %v7075_v59, 2 }
  0xf2   : > { %v7035_v47 = vpop.f32.mrf.mxu1  ;;  %v7037_v56 = vpop.f32.mrf.mxu0  ;;  %5791 = vmatprep.subr.bf16.mxu1 %v6102_v63 }
  0xf3   : > { %v2797_v12 = vsel %vm2307_vm2, %v2794_v36, %v2796_v10  ;;  %v7134_v36 = vld [vmem:[%s6175_s26 + $0x98] sm:$0xff]  }
  0xf4   : > { %v7046_v3 = vpop.f32.mrf.mxu1  ;;  %5704 = vmatmul.mubr.bf16.gmra.mxu1 %v6540_v28  ;;  %v7049_v39 = vpop.f32.mrf.mxu0  ;;  %5760 = vmatmul.mubr.bf16.gmra.mxu0 %v2787_v44  ;;  %v6111_v28 = vld [vmem:[%s9115_s1 + $0x1c8] sm:$0xff]   ;;  %9233 = vst [vmem:[#allocation25_spill] sm:$0xff] %v7134_v36 }
  0xf5   : > { %5707 = vmatprep.mubr.bf16.mxu1 %v6546_v4  ;;  %5763 = vmatprep.mubr.bf16.mxu0 %v2789_v8  ;;  %v6116_v4 = vld [vmem:[%s9115_s1 + $0x200] sm:$0xff]  }
  0xf6   : > { %v7053_v48 = vpop.f32.mrf.mxu1  ;;  %v7055_v23 = vpop.f32.mrf.mxu0  ;;  %5792 = vmatpush3.bf16.msra.mxu1 %v6102_v63  ;;  %5846 = vmatpush3.bf16.msra.mxu0 %v6108_v31  ;;  %v7106_v63 = vld [vmem:[%s6175_s26 + $0x88] sm:$0xff]  }
  0xf7   : > { %5793 = vmatprep.subr.bf16.mxu1 %v6107_v42  ;;  %5847 = vmatprep.subr.bf16.mxu0 %v6112_v37  ;;  %9227 = vst [vmem:[#allocation19_spill] sm:$0xff] %v7106_v63  ;;  %v2800_v35 = vrot.slane %v7106_v63, 2 }
  0xf8   : > { %v7064_v19 = vpop.f32.mrf.mxu1  ;;  %v7066_v7 = vpop.f32.mrf.mxu0 }
  0xfa   : > { %v7069_v2 = vpop.f32.mrf.mxu1  ;;  %v7071_v1 = vpop.f32.mrf.mxu0  ;;  %5794 = vmatpush3.bf16.msra.mxu1 %v6107_v42  ;;  %5848 = vmatpush3.bf16.msra.mxu0 %v6112_v37 }
  0xfb   : > { %5795 = vmatprep.subr.bf16.mxu1 %v6111_v28  ;;  %5849 = vmatprep.subr.bf16.mxu0 %v6116_v4 }
  0xfc   : > { %v7080_v52 = vpop.f32.mrf.mxu1  ;;  %5708 = vmatmul.mubr.bf16.gmra.mxu1 %v6555_v41  ;;  %v7083_v20 = vpop.f32.mrf.mxu0  ;;  %5764 = vmatmul.mubr.bf16.gmra.mxu0 %v2791_v22  ;;  %v7126_v22 = vld [vmem:[%s6175_s26 + $0x90] sm:$0xff]  }
  0xfd   : > { %5711 = vmatprep.mubr.bf16.mxu1 %v6562_v5  ;;  %5767 = vmatprep.mubr.bf16.mxu0 %v2793_v54  ;;  %v7098_v5 = vld [vmem:[%s6175_s26 + $0x80] sm:$0xff]   ;;  %9231 = vst [vmem:[#allocation23_spill] sm:$0xff] %v7126_v22 }
  0xfe   : > { %v7087_v46 = vpop.f32.mrf.mxu1  ;;  %v7089_v11 = vpop.f32.mrf.mxu0  ;;  %5796 = vmatpush3.bf16.msra.mxu1 %v6111_v28  ;;  %5850 = vmatpush3.bf16.msra.mxu0 %v6116_v4  ;;  %v2798_v42 = vrot.slane %v7098_v5, 2 }
  0xff   : > { %5797 = vmatprep.subr.bf16.mxu1 %v6115_v9 }
 0x100   : > { %v7092_v29 = vpop.f32.mrf.mxu1  ;;  %v7094_v41 = vpop.f32.mrf.mxu0 }
 0x102   : > { %v7100_v30 = vpop.f32.mrf.mxu1  ;;  %v7102_v31 = vpop.f32.mrf.mxu0  ;;  %5798 = vmatpush3.bf16.msra.mxu1 %v6115_v9  ;;  %v2801_v9 = vsel %vm2307_vm2, %v2798_v42, %v2800_v35 }
 0x104   : > { %v7108_v44 = vpop.f32.mrf.mxu1  ;;  %5712 = vmatmul.mubr.bf16.gmra.mxu1 %v6573_v58  ;;  %v7111_v8 = vpop.f32.mrf.mxu0  ;;  %5768 = vmatmul.mubr.bf16.gmra.mxu0 %v2795_v25  ;;  %v2799_v58 = vsel %vm2307_vm2, %v2796_v10, %v2798_v42  ;;  %v2802_v10 = vrot.slane %v7126_v22, 2 }
 0x105   : > { %9228 = vst [vmem:[#allocation20_spill] sm:$0xff] %v7108_v44  ;;  %5715 = vmatprep.mubr.bf16.mxu1 %v6586_v6  ;;  %5771 = vmatprep.mubr.bf16.mxu0 %v2797_v12 }
 0x106   : > { %v7115_v37 = vpop.f32.mrf.mxu1  ;;  %v7117_v57 = vpop.f32.mrf.mxu0 }
 0x107   : > { %9229 = vst [vmem:[#allocation21_spill] sm:$0xff] %v7115_v37 }
 0x108   : > { %v7120_v28 = vpop.f32.mrf.mxu1  ;;  %v7122_v4 = vpop.f32.mrf.mxu0 }
 0x109   : > { %9230 = vst [vmem:[#allocation22_spill] sm:$0xff] %v7120_v28  ;;  %v2803_v28 = vsel %vm2307_vm2, %v2800_v35, %v2802_v10 }
 0x10a   : > { %v7128_v54 = vpop.f32.mrf.mxu1  ;;  %v7130_v6 = vpop.f32.mrf.mxu0 }
 0x10b   : > { %9232 = vst [vmem:[#allocation24_spill] sm:$0xff] %v7128_v54  ;;  %v2804_v54 = vrot.slane %v7134_v36, 2 }
 0x10c   : > { %v7136_v25 = vpop.f32.mrf.mxu1  ;;  %5716 = vmatmul.mubr.bf16.gmra.mxu1 %v6597_v16  ;;  %v5541_v12 = vpop.f32.mrf.mxu0  ;;  %5772 = vmatmul.mubr.bf16.gmra.mxu0 %v2799_v58 }
 0x10d   : > { %9234 = vst [vmem:[#allocation26_spill] sm:$0xff] %v7136_v25  ;;  %5719 = vmatprep.mubr.bf16.mxu1 %v6607_v50  ;;  %5775 = vmatprep.mubr.bf16.mxu0 %v2801_v9  ;;  %v6114_v25 = vld [vmem:[%s6175_s26 + $0xa0] ss:$0 sps:$4 sm:$0x33]   ;;  %v2805_v58 = vsel %vm2307_vm2, %v2802_v10, %v2804_v54 }
 0x10e   : > { %v7141_v17 = vpop.f32.mrf.mxu1  ;;  %v1173_v51 = vpop.f32.mrf.mxu0 }
 0x10f   : > { %9235 = vst [vmem:[#allocation27_spill] sm:$0xff] %v7141_v17 }
 0x110   : > { %v7144_v43 = vpop.f32.mrf.mxu1  ;;  %v5542_v42 = vpop.f32.mrf.mxu0 }
 0x111   : > { %9236 = vst [vmem:[#allocation28_spill] sm:$0xff] %v7144_v43  ;;  %v2806_v43 = vrot.slane %v6114_v25, 2 }
 0x112   : > { %v7148_v37 = vpop.f32.mrf.mxu1  ;;  %v1176_v16 = vpop.f32.mrf.mxu0 }
 0x113   : > { %9237 = vst [vmem:[#allocation29_spill] sm:$0xff] %v7148_v37 }
 0x114   : > { %v5489_v50 = vpop.f32.mrf.mxu1  ;;  %5720 = vmatmul.mubr.bf16.gmra.mxu1 %v6620_v45  ;;  %v5545_v9 = vpop.f32.mrf.mxu0  ;;  %5776 = vmatmul.mubr.bf16.gmra.mxu0 %v2803_v28  ;;  %v2807_v45 = vsel %vm2307_vm2, %v2804_v54, %v2806_v43 }
 0x115   : > { %v880_v17 = vadd.f32 %v5489_v50, %v7015_v62  ;;  %5723 = vmatprep.mubr.bf16.mxu1 %v6647_v27  ;;  %5779 = vmatprep.mubr.bf16.mxu0 %v2805_v58 }
 0x116   : > { %v871_v36 = vpop.f32.mrf.mxu1  ;;  %v1189_v22 = vpop.f32.mrf.mxu0 }
 0x117   : > { %v872_v35 = vadd.f32 %v871_v36, %v7024_v18  ;;  %v7155_v63 = vadd.f32 %v5541_v12, %v880_v17  ;;  %v9238_v36 = vld [vmem:[#allocation2_spill] sm:$0xff] }
 0x118   : > { %v5490_v37 = vpop.f32.mrf.mxu1  ;;  %v5546_v49 = vpop.f32.mrf.mxu0 }
 0x119   : > { %v883_v10 = vadd.f32 %v5490_v37, %v7032_v61  ;;  %v7159_v44 = vadd.f32 %v1173_v51, %v872_v35  ;;  %v9239_v61 = vld [vmem:[#allocation4_spill] sm:$0xff] }
 0x11a   : > { %v874_v28 = vpop.f32.mrf.mxu1  ;;  %v1192_v62 = vpop.f32.mrf.mxu0 }
 0x11b   : > { %v875_v27 = vadd.f32 %v874_v28, %v7037_v56  ;;  %v7162_v58 = vadd.f32 %v5542_v42, %v883_v10  ;;  %v9240_v28 = vld [vmem:[#allocation3_spill] sm:$0xff] }
 0x11c   : > { %v5493_v25 = vpop.f32.mrf.mxu1  ;;  %5724 = vmatmul.mubr.bf16.gmra.mxu1 %v6652_v40  ;;  %v5549_v18 = vpop.f32.mrf.mxu0  ;;  %5780 = vmatmul.mubr.bf16.gmra.mxu0 %v2807_v45 }
 0x11d   : > { %v896_v17 = vadd.f32 %v5493_v25, %v7049_v39  ;;  %5727 = vmatprep.mubr.bf16.mxu1 %v9238_v36  ;;  %5851 = vmatprep.mubr.bf16.mxu0 %v9239_v61  ;;  %v7168_v43 = vadd.f32 %v1176_v16, %v875_v27  ;;  %v9241_v25 = vld [vmem:[#allocation5_spill] sm:$0xff] }
 0x11e   : > { %v887_v51 = vpop.f32.mrf.mxu1  ;;  %v1205_v37 = vpop.f32.mrf.mxu0 }
 0x11f   : > { %v888_v54 = vadd.f32 %v887_v51, %v7055_v23  ;;  %v7171_v56 = vadd.f32 %v5545_v9, %v896_v17  ;;  %v9242_v9 = vld [vmem:[#allocation7_spill] sm:$0xff] }
 0x120   : > { %v5494_v12 = vpop.f32.mrf.mxu1  ;;  %v5550_v42 = vpop.f32.mrf.mxu0 }
 0x121   : > { %v899_v40 = vadd.f32 %v5494_v12, %v7066_v7  ;;  %v7174_v50 = vadd.f32 %v1189_v22, %v888_v54 }
 0x122   : > { %v890_v35 = vpop.f32.mrf.mxu1  ;;  %v1208_v39 = vpop.f32.mrf.mxu0 }
 0x123   : > { %v891_v10 = vadd.f32 %v890_v35, %v7071_v1  ;;  %v7177_v45 = vadd.f32 %v5546_v49, %v899_v40  ;;  %v9243_v35 = vld [vmem:[#allocation6_spill] sm:$0xff] }
 0x124   : > { %v5497_v16 = vpop.f32.mrf.mxu1  ;;  %5728 = vmatmul.mubr.bf16.gmra.mxu1 %v9240_v28  ;;  %v5553_v27 = vpop.f32.mrf.mxu0  ;;  %5852 = vmatmul.mubr.bf16.vlgmr.msra.gmra.mxu0 %v9241_v25  ;;  %v9246_v28 = vld [vmem:[#allocation11_spill] sm:$0xff] }
 0x125   : > { %v912_v23 = vadd.f32 %v5497_v16, %v7083_v20  ;;  %5799 = vmatprep.mubr.bf16.mxu1 %v6761_v34  ;;  %5855 = vmatprep.mubr.bf16.mxu0 %v9242_v9  ;;  %v7184_v7 = vadd.f32 %v1192_v62, %v891_v10  ;;  %v9244_v16 = vld [vmem:[#allocation8_spill] sm:$0xff] }
 0x126   : > { %v903_v22 = vpop.f32.mrf.mxu1  ;;  %v1221_v17 = vpop.f32.mrf.mxu0 }
 0x127   : > { %v904_v1 = vadd.f32 %v903_v22, %v7089_v11  ;;  %v7187_v49 = vadd.f32 %v5549_v18, %v912_v23  ;;  %v9245_v18 = vld [vmem:[#allocation9_spill] sm:$0xff] }
 0x128   : > { %v5498_v36 = vpop.f32.mrf.mxu1  ;;  %v5554_v61 = vpop.f32.mrf.mxu0 }
 0x129   : > { %v915_v51 = vadd.f32 %v5498_v36, %v7094_v41  ;;  %v7190_v54 = vadd.f32 %v1205_v37, %v904_v1 }
 0x12a   : > { %v906_v12 = vpop.f32.mrf.mxu1  ;;  %v1224_v20 = vpop.f32.mrf.mxu0 }
 0x12b   : > { %v907_v34 = vadd.f32 %v906_v12, %v7102_v31  ;;  %v7193_v40 = vadd.f32 %v5550_v42, %v915_v51 }
 0x12c   : > { %v5501_v62 = vpop.f32.mrf.mxu1  ;;  %5800 = vmatmul.mubr.bf16.vlgmr.msra.gmra.mxu1 %v9243_v35  ;;  %v5557_v10 = vpop.f32.mrf.mxu0  ;;  %5856 = vmatmul.mubr.bf16.gmra.mxu0 %v9244_v16 }
 0x12d   : > { %v928_v11 = vadd.f32 %v5501_v62, %v7111_v8  ;;  %5803 = vmatprep.mubr.bf16.mxu1 %v9245_v18  ;;  %5859 = vmatprep.mubr.bf16.mxu0 %v9246_v28  ;;  %v7200_v41 = vadd.f32 %v1208_v39, %v907_v34  ;;  %v9247_v34 = vld [vmem:[#allocation10_spill] sm:$0xff] }
 0x12e   : > { %v919_v37 = vpop.f32.mrf.mxu1  ;;  %v1237_v25 = vpop.f32.mrf.mxu0 }
 0x12f   : > { %v920_v31 = vadd.f32 %v919_v37, %v7117_v57  ;;  %v7203_v42 = vadd.f32 %v5553_v27, %v928_v11  ;;  %v9248_v27 = vld [vmem:[#allocation12_spill] sm:$0xff] }
 0x130   : > { %v5502_v23 = vpop.f32.mrf.mxu1  ;;  %v5558_v9 = vpop.f32.mrf.mxu0 }
 0x131   : > { %v931_v22 = vadd.f32 %v5502_v23, %v7122_v4  ;;  %v7206_v1 = vadd.f32 %v1221_v17, %v920_v31 }
 0x132   : > { %v922_v36 = vpop.f32.mrf.mxu1  ;;  %v1240_v8 = vpop.f32.mrf.mxu0 }
 0x133   : > { %v923_v51 = vadd.f32 %v922_v36, %v7130_v6  ;;  %v7209_v12 = vadd.f32 %v5554_v61, %v931_v22  ;;  %v9250_v22 = vld [vmem:[#allocation14_spill] sm:$0xff] }
 0x134   : > { %v5505_v39 = vpop.f32.mrf.mxu1  ;;  %5804 = vmatmul.mubr.bf16.gmra.mxu1 %v9247_v34  ;;  %v5561_v62 = vpop.f32.mrf.mxu0  ;;  %5860 = vmatmul.mubr.bf16.gmra.mxu0 %v6846_v24 }
 0x135   : > { %v944_v57 = vadd.f32 %v5505_v39, %v7012_v53  ;;  %5807 = vmatprep.mubr.bf16.mxu1 %v9248_v27  ;;  %5863 = vmatprep.mubr.bf16.mxu0 %v6882_v13  ;;  %v7216_v4 = vadd.f32 %v1224_v20, %v923_v51  ;;  %v9249_v20 = vld [vmem:[#allocation13_spill] sm:$0xff] }
 0x136   : > { %v935_v17 = vpop.f32.mrf.mxu1  ;;  %v1253_v35 = vpop.f32.mrf.mxu0 }
 0x137   : > { %v936_v6 = vadd.f32 %v935_v17, %v7022_v14  ;;  %v7219_v61 = vadd.f32 %v5557_v10, %v944_v57 }
 0x138   : > { %v5506_v16 = vpop.f32.mrf.mxu1  ;;  %v5562_v11 = vpop.f32.mrf.mxu0 }
 0x139   : > { %v947_v18 = vadd.f32 %v5506_v16, %v7030_v26  ;;  %v7222_v28 = vadd.f32 %v1237_v25, %v936_v6  ;;  %v3226_v6 = vshrl.u32 %v7075_v59, 16  ;;  %v3229_v16 = vshll.u32 %v7075_v59, 16 }
 0x13a   : > { %v938_v24 = vpop.f32.mrf.mxu1  ;;  %v1256_v53 = vpop.f32.mrf.mxu0 }
 0x13b   : > { %v939_v37 = vadd.f32 %v938_v24, %v7035_v47  ;;  %v7225_v31 = vadd.f32 %v5558_v9, %v947_v18 }
 0x13c   : > { %v5509_v13 = vpop.f32.mrf.mxu1  ;;  %5808 = vmatmul.mubr.bf16.gmra.mxu1 %v9249_v20  ;;  %v5565_v23 = vpop.f32.mrf.mxu0  ;;  %5864 = vmatmul.mubr.bf16.gmra.mxu0 %v9250_v22  ;;  %v3228_v20 = vrot.slane %v3226_v6, 2  ;;  %v3231_v22 = vrot.slane %v3229_v16, 3 }
 0x13d   : > { %v960_v14 = vadd.f32 %v5509_v13, %v7046_v3  ;;  %5811 = vmatprep.mubr.bf16.mxu1 %v6899_v60  ;;  %5867 = vmatprep.mubr.bf16.mxu0 %v6918_v33  ;;  %v7232_v26 = vadd.f32 %v1240_v8, %v939_v37  ;;  %v9251_v8 = vld [vmem:[#allocation15_spill] sm:$0xff]  ;;  %v9252_v37 = vrot.slane %v6938_v15, 3  ;;  %v3235_v15 = vshrl.u32 %v7098_v5, 16 }
 0x13e   : > { %v951_v10 = vpop.f32.mrf.mxu1  ;;  %v1269_v25 = vpop.f32.mrf.mxu0 }
 0x13f   : > { %v952_v47 = vadd.f32 %v951_v10, %v7053_v48  ;;  %v7235_v9 = vadd.f32 %v5561_v62, %v960_v14  ;;  %v9253_v10 = vld [vmem:[#allocation20_spill] sm:$0xff] }
 0x140   : > { %v5510_v36 = vpop.f32.mrf.mxu1  ;;  %v5566_v51 = vpop.f32.mrf.mxu0 }
 0x141   : > { %v963_v39 = vadd.f32 %v5510_v36, %v7064_v19  ;;  %v7238_v34 = vadd.f32 %v1253_v35, %v952_v47  ;;  %v9254_v47 = vld [vmem:[#allocation17_spill] sm:$0xff]  ;;  %v3238_v36 = vshll.u32 %v7098_v5, 16 }
 0x142   : > { %v954_v57 = vpop.f32.mrf.mxu1  ;;  %v1272_v3 = vpop.f32.mrf.mxu0 }
 0x143   : > { %v955_v60 = vadd.f32 %v954_v57, %v7069_v2  ;;  %v7241_v27 = vadd.f32 %v5562_v11, %v963_v39  ;;  %v3605_v2 = vrot.slane %v7075_v59, 3  ;;  %v3232_v57 = vor.u32 %v3231_v22, %v3228_v20  ;;  %v9258_v20 = vld [vmem:[#allocation16_spill] sm:$0xff] }
 0x144   : > { %v5513_v33 = vpop.f32.mrf.mxu1  ;;  %5812 = vmatmul.mubr.bf16.gmra.mxu1 %v9251_v8  ;;  %v5569_v17 = vpop.f32.mrf.mxu0  ;;  %5868 = vmatmul.mubr.bf16.gmra.mxu0 %v6921_v55  ;;  %v9256_v8 = vld [vmem:[#allocation21_spill] sm:$0xff] }
 0x145   : > { %v976_v48 = vadd.f32 %v5513_v33, %v7080_v52  ;;  %5815 = vmatprep.mubr.bf16.mxu1 %v6933_v32  ;;  %5871 = vmatprep.mubr.bf16.mxu0 %v6952_v0  ;;  %v7248_v19 = vadd.f32 %v1256_v53, %v955_v60  ;;  %v3606_v13 = vsel %vm3579_vm4, %v9252_v37, %v3605_v2 }
 0x146   : > { %v967_v62 = vpop.f32.mrf.mxu1  ;;  %v1285_v35 = vpop.f32.mrf.mxu0  ;;  %v3233_v22 = vsel %vm3108_vm5, %v9258_v20, %v3232_v57 }
 0x147   : > { %v968_v11 = vadd.f32 %v967_v62, %v7087_v46  ;;  %v7254_v18 = vadd.f32 %v5565_v23, %v976_v48 }
 0x148   : > { %v5514_v55 = vpop.f32.mrf.mxu1  ;;  %v5570_v52 = vpop.f32.mrf.mxu0 }
 0x149   : > { %v979_v32 = vadd.f32 %v5514_v55, %v7092_v29  ;;  %v7257_v24 = vadd.f32 %v1269_v25, %v968_v11  ;;  %v3607_v29 = vrot.slane %v7098_v5, 3  ;;  %v9257_v5 = vld [vmem:[#allocation22_spill] sm:$0xff]  ;;  %v3237_v55 = vrot.slane %v3235_v15, 2 }
 0x14a   : > { %v970_v0 = vpop.f32.mrf.mxu1  ;;  %v1288_v53 = vpop.f32.mrf.mxu0 }
 0x14b   : > { %v971_v59 = vadd.f32 %v970_v0, %v7100_v30  ;;  %v7263_v14 = vadd.f32 %v5566_v51, %v979_v32  ;;  %v3608_v11 = vsel %vm3579_vm4, %v3605_v2, %v3607_v29  ;;  %v3240_v32 = vrot.slane %v3238_v36, 3 }
 0x14c   : > { %v5517_v46 = vpop.f32.mrf.mxu1  ;;  %5816 = vmatmul.mubr.bf16.gmra.mxu1 %v6941_v38  ;;  %v5573_v23 = vpop.f32.mrf.mxu0  ;;  %5872 = vmatmul.mubr.bf16.gmra.mxu0 %v6957_v21  ;;  %v9255_v38 = vld [vmem:[#allocation19_spill] sm:$0xff] }
 0x14d   : > { %v992_v25 = vadd.f32 %v5517_v46, %v9253_v10  ;;  %5819 = vmatprep.mubr.bf16.mxu1 %v9254_v47  ;;  %5875 = vmatprep.mubr.bf16.mxu0 %v3606_v13  ;;  %v7272_v30 = vadd.f32 %v1272_v3, %v971_v59  ;;  %v3609_v60 = vrot.slane %v9255_v38, 3  ;;  %v3244_v21 = vshrl.u32 %v9255_v38, 16  ;;  %v9259_v10 = vld [vmem:[#allocation24_spill] sm:$0xff] }
 0x14e   : > { %v983_v51 = vpop.f32.mrf.mxu1  ;;  %v1301_v39 = vpop.f32.mrf.mxu0  ;;  %v3247_v33 = vshll.u32 %v9255_v38, 16 }
 0x14f   : > { %v984_v48 = vadd.f32 %v983_v51, %v9256_v8  ;;  %v7278_v62 = vadd.f32 %v5569_v17, %v992_v25  ;;  %v3610_v59 = vsel %vm3579_vm4, %v3607_v29, %v3609_v60  ;;  %v3246_v46 = vrot.slane %v3244_v21, 2  ;;  %v9261_v51 = vld [vmem:[#allocation18_spill] sm:$0xff] }
 0x150   : > { %v5518_v6 = vpop.f32.mrf.mxu1  ;;  %v5574_v16 = vpop.f32.mrf.mxu0  ;;  %v3249_v17 = vrot.slane %v3247_v33, 3  ;;  %v9263_v8 = vld [vmem:[#allocation26_spill] sm:$0xff] }
 0x151   : > { %v995_v3 = vadd.f32 %v5518_v6, %v9257_v5  ;;  %v7282_v0 = vadd.f32 %v1285_v35, %v984_v48  ;;  %v9262_v35 = vld [vmem:[#allocation23_spill] sm:$0xff]  ;;  %v3241_v6 = vor.u32 %v3240_v32, %v3237_v55 }
 0x152   : > { %v986_v37 = vpop.f32.mrf.mxu1  ;;  %v1304_v13 = vpop.f32.mrf.mxu0  ;;  %v3253_v36 = vshrl.u32 %v9262_v35, 16  ;;  %v3256_v38 = vshll.u32 %v9262_v35, 16  ;;  %v3611_v29 = vrot.slane %v9262_v35, 3  ;;  %v3250_v5 = vor.u32 %v3249_v17, %v3246_v46  ;;  %v6118_v35 = vld [vmem:[%s6175_s26 + $0xa0] ss:$0 sps:$4 sm:$0x77]  }
 0x153   : > { %v987_v25 = vadd.f32 %v986_v37, %v9259_v10  ;;  %v7288_v47 = vadd.f32 %v5570_v52, %v995_v3  ;;  %v9265_v3 = vld [vmem:[#allocation25_spill] sm:$0xff]  ;;  %v9266_v10 = vld [vmem:[#allocation27_spill] sm:$0xff]  ;;  %s5904_s26 = smul.u32 288, %s9694_s16 }
 0x154   : > { %v5521_v2 = vpop.f32.mrf.mxu1  ;;  %5820 = vmatmul.mubr.bf16.gmra.mxu1 %v9261_v51  ;;  %v5645_v15 = vpop.f32.mrf.mxu0  ;;  %5876 = vmatmul.mubr.bf16.gmra.mxu0 %v3608_v11  ;;  %v3613_v37 = vrot.slane %v9265_v3, 3  ;;  %v3262_v11 = vshrl.u32 %v9265_v3, 16  ;;  %v3265_v20 = vshll.u32 %v9265_v3, 16  ;;  %v3612_v46 = vsel %vm3579_vm4, %v3609_v60, %v3611_v29 }
 0x155   : > { %9260 = vst [vmem:[#allocation2_spill] sm:$0xff] %v7288_v47  ;;  %v1008_v48 = vadd.f32 %v5521_v2, %v9263_v8  ;;  %5823 = vmatprep.mubr.bf16.mxu1 %v3233_v22  ;;  %5879 = vmatprep.mubr.bf16.mxu0 %v3610_v59  ;;  %v7295_v21 = vadd.f32 %v1288_v53, %v987_v25  ;;  %v3255_v22 = vrot.slane %v3253_v36, 2  ;;  %v3258_v59 = vrot.slane %v3256_v38, 3  ;;  %v9268_v53 = vld [vmem:[#allocation28_spill] sm:$0xff]  ;;  %s8337_s29 = scalar_lea.vmem %s9116_s2, %s5904_s26 }
 0x156   : > { %v999_v52 = vpop.f32.mrf.mxu1  ;;  %v2107_v33 = vpop.f32.mrf.mxu0  ;;  %v3242_v8 = vsel %vm3108_vm5, %v3232_v57, %v3241_v6  ;;  %v3251_v3 = vsel %vm3108_vm5, %v3241_v6, %v3250_v5  ;;  %v3615_v60 = vrot.slane %v6118_v35, 3  ;;  %v3274_v6 = vshll.u32 %v6118_v35, 16 }
 0x157   : > { %9264 = vst [vmem:[#allocation4_spill] sm:$0xff] %v7295_v21  ;;  %v1000_v51 = vadd.f32 %v999_v52, %v9266_v10  ;;  %v7301_v2 = vadd.f32 %v5573_v23, %v1008_v48  ;;  %v3614_v23 = vsel %vm3579_vm4, %v3611_v29, %v3613_v37  ;;  %v3264_v48 = vrot.slane %v3262_v11, 2  ;;  %v9269_v10 = vld [vmem:[#allocation29_spill] sm:$0xff] }
 0x158   : > { %v5522_v55 = vpop.f32.mrf.mxu1  ;;  %v5646_v32 = vpop.f32.mrf.mxu0  ;;  %v3267_v52 = vrot.slane %v3265_v20, 3  ;;  %v3259_v57 = vor.u32 %v3258_v59, %v3255_v22  ;;  %v3616_v59 = vsel %vm3579_vm4, %v3613_v37, %v3615_v60 }
 0x159   : > { %9267 = vst [vmem:[#allocation3_spill] sm:$0xff] %v7301_v2  ;;  %v1011_v25 = vadd.f32 %v5522_v55, %v9268_v53  ;;  %v7307_v17 = vadd.f32 %v1301_v39, %v1000_v51  ;;  %v3271_v51 = vshrl.u32 %v6118_v35, 16 }
 0x15a   : > { %v1002_v21 = vpop.f32.mrf.mxu1  ;;  %v2110_v47 = vpop.f32.mrf.mxu0  ;;  %v3268_v20 = vor.u32 %v3267_v52, %v3264_v48 }
 0x15b   : > { %v1003_v36 = vadd.f32 %v1002_v21, %v9269_v10  ;;  %v7312_v38 = vadd.f32 %v5574_v16, %v1011_v25 }
 0x15c   : > { %v5593_v2 = vpop.f32.mrf.mxu1  ;;  %5824 = vmatmul.mubr.bf16.gmra.mxu1 %v3242_v8  ;;  %v5649_v55 = vpop.f32.mrf.mxu0  ;;  %5880 = vmatmul.mubr.bf16.gmra.mxu0 %v3612_v46  ;;  %v3260_v8 = vsel %vm3108_vm5, %v3250_v5, %v3259_v57  ;;  %v3276_v46 = vrot.slane %v3274_v6, 3 }
 0x15d   : > { %v1781_v39 = vadd.f32 %v5593_v2, %v7155_v63  ;;  %5827 = vmatprep.mubr.bf16.mxu1 %v3251_v3  ;;  %5883 = vmatprep.mubr.bf16.mxu0 %v3614_v23  ;;  %v7315_v53 = vadd.f32 %v1304_v13, %v1003_v36  ;;  %v3273_v2 = vrot.slane %v3271_v51, 2  ;;  %v3269_v23 = vsel %vm3108_vm5, %v3259_v57, %v3268_v20 }
 0x15e   : > { %v1636_v29 = vpop.f32.mrf.mxu1  ;;  %v2123_v11 = vpop.f32.mrf.mxu0 }
 0x15f   : > { %v1779_v16 = vadd.f32 %v1636_v29, %v7159_v44  ;;  %v7318_v21 = vadd.f32 %v5645_v15, %v1781_v39 }
 0x160   : > { %v5594_v25 = vpop.f32.mrf.mxu1  ;;  %v5650_v22 = vpop.f32.mrf.mxu0 }
 0x161   : > { %v1782_v63 = vadd.f32 %v5594_v25, %v7162_v58  ;;  %v7323_v35 = vadd.f32 %v2107_v33, %v1779_v16  ;;  %v3277_v58 = vor.u32 %v3276_v46, %v3273_v2 }
 0x162   : > { %v1639_v13 = vpop.f32.mrf.mxu1  ;;  %v2126_v3 = vpop.f32.mrf.mxu0 }
 0x163   : > { %v1780_v44 = vadd.f32 %v1639_v13, %v7168_v43  ;;  %v7327_v15 = vadd.f32 %v5646_v32, %v1782_v63  ;;  %v3278_v39 = vsel %vm3108_vm5, %v3268_v20, %v3277_v58 }
 0x164   : > { %v5597_v48 = vpop.f32.mrf.mxu1  ;;  %5828 = vmatmul.mubr.bf16.gmra.mxu1 %v3260_v8  ;;  %v5653_v5 = vpop.f32.mrf.mxu0  ;;  %5884 = vmatmul.mubr.bf16.gmra.mxu0 %v3616_v59 }
 0x165   : > { %v1785_v37 = vadd.f32 %v5597_v48, %v7171_v56  ;;  %5831 = vmatprep.mubr.bf16.mxu1 %v3269_v23  ;;  %v7330_v52 = vadd.f32 %v2110_v47, %v1780_v44 }
 0x166   : > { %v1652_v33 = vpop.f32.mrf.mxu1  ;;  %v2139_v10 = vpop.f32.mrf.mxu0 }
 0x167   : > { %v1783_v36 = vadd.f32 %v1652_v33, %v7174_v50  ;;  %v7333_v60 = vadd.f32 %v5649_v55, %v1785_v37 }
 0x168   : > { %v5598_v57 = vpop.f32.mrf.mxu1  ;;  %v5654_v43 = vpop.f32.mrf.mxu0 }
 0x169   : > { %v1786_v32 = vadd.f32 %v5598_v57, %v7177_v45  ;;  %v7337_v51 = vadd.f32 %v2123_v11, %v1783_v36 }
 0x16a   : > { %v1655_v6 = vpop.f32.mrf.mxu1  ;;  %v2142_v56 = vpop.f32.mrf.mxu0 }
 0x16b   : > { %v1784_v29 = vadd.f32 %v1655_v6, %v7184_v7  ;;  %v7340_v47 = vadd.f32 %v5650_v22, %v1786_v32 }
 0x16c   : > { %v5601_v16 = vpop.f32.mrf.mxu1  ;;  %5832 = vmatmul.mubr.bf16.gmra.mxu1 %v3278_v39  ;;  %v5657_v25 = vpop.f32.mrf.mxu0 }
 0x16d   : > { %v1789_v50 = vadd.f32 %v5601_v16, %v7187_v49  ;;  %v7343_v55 = vadd.f32 %v2126_v3, %v1784_v29 }
 0x16e   : > { %v1668_v8 = vpop.f32.mrf.mxu1  ;;  %v2155_v59 = vpop.f32.mrf.mxu0 }
 0x16f   : > { %v1787_v45 = vadd.f32 %v1668_v8, %v7190_v54  ;;  %v7346_v20 = vadd.f32 %v5653_v5, %v1789_v50 }
 0x170   : > { %v5602_v11 = vpop.f32.mrf.mxu1  ;;  %v5658_v63 = vpop.f32.mrf.mxu0 }
 0x171   : > { %v1790_v2 = vadd.f32 %v5602_v11, %v7193_v40  ;;  %v7349_v7 = vadd.f32 %v2139_v10, %v1787_v45  ;;  %v3932_v10 = vlaneseq }
 0x172   : > { %v1671_v22 = vpop.f32.mrf.mxu1  ;;  %v2158_v46 = vpop.f32.mrf.mxu0 }
 0x173   : > { %v1788_v13 = vadd.f32 %v1671_v22, %v7200_v41  ;;  %v7352_v23 = vadd.f32 %v5654_v43, %v1790_v2 }
 0x174   : > { %v5605_v49 = vpop.f32.mrf.mxu1  ;;  %v5661_v3 = vpop.f32.mrf.mxu0 }
 0x175   : > { %v1793_v44 = vadd.f32 %v5605_v49, %v7203_v42  ;;  %v7355_v48 = vadd.f32 %v2142_v56, %v1788_v13  ;;  %v7366_v56 = vshrl.u32 %v3932_v10, 7 }
 0x176   : > { %v1684_v54 = vpop.f32.mrf.mxu1  ;;  %v2171_v5 = vpop.f32.mrf.mxu0 }
 0x177   : > { %v1791_v37 = vadd.f32 %v1684_v54, %v7206_v1  ;;  %v7358_v58 = vadd.f32 %v5657_v25, %v1793_v44 }
 0x178   : > { %v5606_v40 = vpop.f32.mrf.mxu1  ;;  %v5662_v33 = vpop.f32.mrf.mxu0 }
 0x179   : > { %v1794_v36 = vadd.f32 %v5606_v40, %v7209_v12  ;;  %v7361_v41 = vadd.f32 %v2155_v59, %v1791_v37 }
 0x17a   : > { %v1687_v57 = vpop.f32.mrf.mxu1  ;;  %v2174_v43 = vpop.f32.mrf.mxu0 }
 0x17b   : > { %v1792_v32 = vadd.f32 %v1687_v57, %v7216_v4  ;;  %v7364_v42 = vadd.f32 %v5658_v63, %v1794_v36  ;;  %v3935_v4 = vadd.s32 16, %v7366_v56 }
 0x17c   : > { %v5609_v39 = vpop.f32.mrf.mxu1  ;;  %v5665_v6 = vpop.f32.mrf.mxu0 }
 0x17d   : > { %v1797_v1 = vadd.f32 %v5609_v39, %v7219_v61  ;;  %v7369_v29 = vadd.f32 %v2158_v46, %v1792_v32 }
 0x17e   : > { %v1700_v16 = vpop.f32.mrf.mxu1  ;;  %v2187_v25 = vpop.f32.mrf.mxu0 }
 0x17f   : > { %v1795_v12 = vadd.f32 %v1700_v16, %v7222_v28  ;;  %v7372_v50 = vadd.f32 %v5661_v3, %v1797_v1  ;;  %v7381_v49 = vmul.u32.u64.low 3817748708, %v3935_v4  ;;  %v7382_v28 = vmul.u32.u64.high 3817748708, %v3935_v4, %v7381_v49 }
 0x180   : > { %v5610_v8 = vpop.f32.mrf.mxu1  ;;  %v5666_v59 = vpop.f32.mrf.mxu0 }
 0x181   : > { %v1798_v45 = vadd.f32 %v5610_v8, %v7225_v31  ;;  %v7376_v11 = vadd.f32 %v2171_v5, %v1795_v12  ;;  %v3997_v1 = vshrl.u32 %v7382_v28, 4 }
 0x182   : > { %v1703_v63 = vpop.f32.mrf.mxu1  ;;  %v2190_v2 = vpop.f32.mrf.mxu0 }
 0x183   : > { %v1796_v61 = vadd.f32 %v1703_v63, %v7232_v26  ;;  %v7379_v22 = vadd.f32 %v5662_v33, %v1798_v45 }
 0x184   : > { %v5613_v46 = vpop.f32.mrf.mxu1  ;;  %v5669_v13 = vpop.f32.mrf.mxu0 }
 0x185   : > { %v1801_v3 = vadd.f32 %v5613_v46, %v7235_v9  ;;  %v7385_v44 = vadd.f32 %v2174_v43, %v1796_v61  ;;  %v3998_v61 = vmul.u32 18, %v3997_v1 }
 0x186   : > { %v1716_v54 = vpop.f32.mrf.mxu1  ;;  %v2203_v37 = vpop.f32.mrf.mxu0 }
 0x187   : > { %v1799_v31 = vadd.f32 %v1716_v54, %v7238_v34  ;;  %v7388_v5 = vadd.f32 %v5665_v6, %v1801_v3  ;;  %v7398_v34 = vadd.s32 24, %v7366_v56 }
 0x188   : > { %v5614_v40 = vpop.f32.mrf.mxu1  ;;  %v5670_v10 = vpop.f32.mrf.mxu0 }
 0x189   : > { %v1802_v26 = vadd.f32 %v5614_v40, %v7241_v27  ;;  %v7391_v33 = vadd.f32 %v2187_v25, %v1799_v31  ;;  %v7404_v27 = vmul.u32.u64.low 3817748708, %v7366_v56  ;;  %v7405_v25 = vmul.u32.u64.high 3817748708, %v7366_v56, %v7404_v27 }
 0x18a   : > { %v1719_v36 = vpop.f32.mrf.mxu1  ;;  %v2206_v57 = vpop.f32.mrf.mxu0  ;;  %v7411_v46 = vmul.u32.u64.low 3817748708, %v7398_v34  ;;  %v7412_v49 = vmul.u32.u64.high 3817748708, %v7398_v34, %v7411_v46  ;;  %v7440_v27 = vadd.s32 56, %v7366_v56 }
 0x18b   : > { %v1800_v32 = vadd.f32 %v1719_v36, %v7248_v19  ;;  %v7394_v39 = vadd.f32 %v5666_v59, %v1802_v26 }
 0x18c   : > { %v5617_v9 = vpop.f32.mrf.mxu1  ;;  %v5673_v43 = vpop.f32.mrf.mxu0 }
 0x18d   : > { %v1805_v6 = vadd.f32 %v5617_v9, %v7254_v18  ;;  %v7401_v16 = vadd.f32 %v2190_v2, %v1800_v32  ;;  %v7415_v18 = vadd.s32 8, %v7366_v56  ;;  %v7429_v32 = vsub.s32 %v3935_v4, %v3998_v61 }
 0x18e   : > { %v1732_v12 = vpop.f32.mrf.mxu1  ;;  %v2219_v8 = vpop.f32.mrf.mxu0 }
 0x18f   : > { %v1803_v19 = vadd.f32 %v1732_v12, %v7257_v24  ;;  %v7408_v59 = vadd.f32 %v5669_v13, %v1805_v6  ;;  %v7421_v24 = vadd.s32 48, %v7366_v56  ;;  %v7424_v13 = vadd.s32 32, %v7366_v56  ;;  %9272 = vst [vmem:[#allocation6_spill] sm:$0xff] %v7429_v32 }
 0x190   : > { %v5618_v45 = vpop.f32.mrf.mxu1  ;;  %v5674_v63 = vpop.f32.mrf.mxu0  ;;  %v3975_v6 = vshrl.u32 %v7405_v25, 4  ;;  %vm4367_vm6 = vcmp.ne.s32.totalorder %v7429_v32, 0  ;;  %vm4403_vm7 = vcmp.lt.s32.totalorder %v7429_v32, 0  ;;  %v4008_v25 = vshrl.u32 %v7412_v49, 4 }
 0x191   : > { %v1806_v2 = vadd.f32 %v5618_v45, %v7263_v14  ;;  %v7418_v28 = vadd.f32 %v2203_v37, %v1803_v19  ;;  %v7432_v14 = vmul.u32.u64.low 3817748708, %v7415_v18  ;;  %v7433_v37 = vmul.u32.u64.high 3817748708, %v7415_v18, %v7432_v14  ;;  %vm7473_vm8 = vmand %vm4403_vm7, %vm4367_vm6 }
 0x192   : > { %v1735_v3 = vpop.f32.mrf.mxu1  ;;  %v2222_v54 = vpop.f32.mrf.mxu0  ;;  %v7443_v12 = vmul.u32.u64.low 3817748708, %v7421_v24  ;;  %v7444_v19 = vmul.u32.u64.high 3817748708, %v7421_v24, %v7443_v12  ;;  %v7447_v4 = vmul.u32.u64.low 3817748708, %v7424_v13  ;;  %v7448_v45 = vmul.u32.u64.high 3817748708, %v7424_v13, %v7447_v4 }
 0x193   : > { %9270 = vst [vmem:[#allocation5_spill] sm:$0xff] %v7418_v28  ;;  %v1804_v31 = vadd.f32 %v1735_v3, %v7272_v30  ;;  %v7427_v40 = vadd.f32 %v5670_v10, %v1806_v2  ;;  %v9275_v2 = vld [vmem:[#allocation2_spill] sm:$0xff] }
 0x194   : > { %v5621_v26 = vpop.f32.mrf.mxu1  ;;  %v5677_v36 = vpop.f32.mrf.mxu0 }
 0x195   : > { %9271 = vst [vmem:[#allocation7_spill] sm:$0xff] %v7427_v40  ;;  %v1809_v9 = vadd.f32 %v5621_v26, %v7278_v62  ;;  %v7436_v1 = vadd.f32 %v2206_v57, %v1804_v31  ;;  %v7460_v26 = vmul.u32.u64.low 3817748708, %v7440_v27  ;;  %v7461_v14 = vmul.u32.u64.high 3817748708, %v7440_v27, %v7460_v26 }
 0x196   : > { %v1748_v30 = vpop.f32.mrf.mxu1  ;;  %v2235_v10 = vpop.f32.mrf.mxu0 }
 0x197   : > { %9273 = vst [vmem:[#allocation8_spill] sm:$0xff] %v7436_v1  ;;  %v1807_v61 = vadd.f32 %v1748_v30, %v7282_v0  ;;  %v7451_v62 = vadd.f32 %v5673_v43, %v1809_v9  ;;  %v3976_v43 = vmul.u32 18, %v3975_v6  ;;  %v9277_v9 = vld [vmem:[#allocation4_spill] sm:$0xff]  ;;  %v7478_v6 = vadd.s32 40, %v7366_v56 }
 0x198   : > { %v5622_v57 = vpop.f32.mrf.mxu1  ;;  %v5678_v46 = vpop.f32.mrf.mxu0 }
 0x199   : > { %9274 = vst [vmem:[#allocation9_spill] sm:$0xff] %v7451_v62  ;;  %v1810_v3 = vadd.f32 %v5622_v57, %v9275_v2  ;;  %v7457_v31 = vadd.f32 %v2219_v8, %v1807_v61  ;;  %v7467_v62 = vadd.s32 18, %v7429_v32  ;;  %v9280_v8 = vmov 0  ;;  %v9283_v57 = vld [vmem:[#allocation3_spill] sm:$0xff] }
 0x19a   : > { %v1751_v12 = vpop.f32.mrf.mxu1  ;;  %v2238_v0 = vpop.f32.mrf.mxu0  ;;  %v9281_v8 = vsel %vm7473_vm8, 4294967295, %v9280_v8  ;;  %v4009_v61 = vmul.u32 18, %v4008_v25 }
 0x19b   : > { %9276 = vst [vmem:[#allocation11_spill] sm:$0xff] %v7457_v31  ;;  %v1808_v30 = vadd.f32 %v1751_v12, %v9277_v9  ;;  %v7464_v4 = vadd.f32 %v5674_v63, %v1810_v3  ;;  %9279 = vst [vmem:[#allocation12_spill] sm:$0xff] %v7467_v62  ;;  %v3986_v3 = vshrl.u32 %v7433_v37, 4  ;;  %v7485_v9 = vsub.s32 %v7366_v56, %v3976_v43 }
 0x19c   : > { %v5625_v1 = vpop.f32.mrf.mxu1  ;;  %v5749_v49 = vpop.f32.mrf.mxu0  ;;  %9282 = vst [vmem:[#allocation13_spill] sm:$0xff] %v9281_v8  ;;  %v4019_v31 = vshrl.u32 %v7448_v45, 4 }
 0x19d   : > { %9278 = vst [vmem:[#allocation10_spill] sm:$0xff] %v7464_v4  ;;  %v1813_v63 = vadd.f32 %v5625_v1, %v9283_v57  ;;  %v7481_v2 = vadd.f32 %v2222_v54, %v1808_v30  ;;  %9285 = vst [vmem:[#allocation15_spill] sm:$0xff] %v7485_v9  ;;  %v4041_v4 = vshrl.u32 %v7444_v19, 4  ;;  %v7497_v30 = vsub.s32 %v7398_v34, %v4009_v61 }
 0x19e   : > { %v1764_v26 = vpop.f32.mrf.mxu1  ;;  %v2908_v12 = vpop.f32.mrf.mxu0  ;;  %v7500_v43 = vmul.u32.u64.low 3817748708, %v7478_v6  ;;  %v7501_v57 = vmul.u32.u64.high 3817748708, %v7478_v6, %v7500_v43  ;;  %v7504_v19 = vadd.s32 80, %v7366_v56  ;;  %v3987_v45 = vmul.u32 18, %v3986_v3 }
 0x19f   : > { %9284 = vst [vmem:[#allocation14_spill] sm:$0xff] %v7481_v2  ;;  %v1811_v25 = vadd.f32 %v1764_v26, %v7307_v17  ;;  %v7490_v40 = vadd.f32 %v5677_v36, %v1813_v63  ;;  %v4052_v63 = vshrl.u32 %v7461_v14, 4  ;;  %vm4365_vm9 = vcmp.ne.s32.totalorder %v7485_v9, 0 }
 0x1a0   : > { %v5626_v1 = vpop.f32.mrf.mxu1  ;;  %v5750_v37 = vpop.f32.mrf.mxu0  ;;  %vm4401_vm10 = vcmp.lt.s32.totalorder %v7485_v9, 0  ;;  %v4042_v34 = vmul.u32 18, %v4041_v4  ;;  %v4020_v61 = vmul.u32 18, %v4019_v31  ;;  %v7516_v62 = vadd.s32 18, %v7485_v9 }
 0x1a1   : > { %9286 = vst [vmem:[#allocation20_spill] sm:$0xff] %v7490_v40  ;;  %v1814_v17 = vadd.f32 %v5626_v1, %v7312_v38  ;;  %v7507_v36 = vadd.f32 %v2235_v10, %v1811_v25  ;;  %v7519_v38 = vadd.s32 64, %v7366_v56  ;;  %vm4368_vm11 = vcmp.ne.s32.totalorder %v7497_v30, 0  ;;  %vm7582_vm1 = vmand %vm4401_vm10, %vm4365_vm9 }
 0x1a2   : > { %v1767_v26 = vpop.f32.mrf.mxu1  ;;  %v2911_v54 = vpop.f32.mrf.mxu0  ;;  %9289 = vst [vmem:[#allocation21_spill] sm:$0xff] %v7516_v62  ;;  %v7523_v3 = vmul.u32.u64.low 3817748708, %v7504_v19  ;;  %v7524_v25 = vmul.u32.u64.high 3817748708, %v7504_v19, %v7523_v3  ;;  %v7527_v31 = vadd.s32 88, %v7366_v56  ;;  %v7533_v4 = vsub.s32 %v7415_v18, %v3987_v45 }
 0x1a3   : > { %9287 = vst [vmem:[#allocation17_spill] sm:$0xff] %v7507_v36  ;;  %v1812_v43 = vadd.f32 %v1767_v26, %v7315_v53  ;;  %v7513_v32 = vadd.f32 %v5678_v46, %v1814_v17  ;;  %v4053_v1 = vmul.u32 18, %v4052_v63  ;;  %vm4404_vm12 = vcmp.lt.s32.totalorder %v7497_v30, 0 }
 0x1a4   : > { %v5697_v10 = vpop.f32.mrf.mxu1  ;;  %v5753_v14 = vpop.f32.mrf.mxu0  ;;  %v7537_v8 = vadd.s32 18, %v7497_v30  ;;  %v7540_v3 = vsub.s32 %v7421_v24, %v4042_v34  ;;  %v7549_v18 = vmul.u32.u64.low 3817748708, %v7519_v38  ;;  %v7550_v45 = vmul.u32.u64.high 3817748708, %v7519_v38, %v7549_v18  ;;  %vm7596_vm4 = vmand %vm4404_vm12, %vm4368_vm11 }
 0x1a5   : > { %9288 = vst [vmem:[#allocation19_spill] sm:$0xff] %v7513_v32  ;;  %v2590_v53 = vadd.f32 %v5697_v10, %v7318_v21  ;;  %v7530_v46 = vadd.f32 %v2238_v0, %v1812_v43  ;;  %v7543_v32 = vsub.s32 %v7424_v13, %v4020_v61  ;;  %v4030_v10 = vshrl.u32 %v7501_v57, 4 }
 0x1a6   : > { %v2445_v17 = vpop.f32.mrf.mxu1  ;;  %v2924_v26 = vpop.f32.mrf.mxu0  ;;  %9291 = vst [vmem:[#allocation16_spill] sm:$0xff] %v7540_v3  ;;  %v7560_v13 = vadd.s32 72, %v7366_v56  ;;  %vm4366_vm13 = vcmp.ne.s32.totalorder %v7533_v4, 0  ;;  %v7567_v34 = vsub.s32 %v7440_v27, %v4053_v1  ;;  %vm4402_vm14 = vcmp.lt.s32.totalorder %v7533_v4, 0 }
 0x1a7   : > { %9290 = vst [vmem:[#allocation22_spill] sm:$0xff] %v7530_v46  ;;  %v2588_v21 = vadd.f32 %v2445_v17, %v7323_v35  ;;  %v7546_v0 = vadd.f32 %v5749_v49, %v2590_v53  ;;  %v7556_v46 = vmul.u32.u64.low 3817748708, %v7527_v31  ;;  %v7557_v24 = vmul.u32.u64.high 3817748708, %v7527_v31, %v7556_v46  ;;  %vm7612_vm5 = vmand %vm4402_vm14, %vm4366_vm13 }
 0x1a8   : > { %v5698_v63 = vpop.f32.mrf.mxu1  ;;  %v7552_v43 = vpop.f32.mrf.mxu0  ;;  %9294 = vst [vmem:[#allocation23_spill] sm:$0xff] %v7567_v34  ;;  %vm4371_vm15 = vcmp.ne.s32.totalorder %v7540_v3, 0  ;;  %vm4407_vm0 = vcmp.lt.s32.totalorder %v7540_v3, 0  ;;  %v7575_v57 = vadd.s32 112, %v7366_v56  ;;  %v9295_v27 = vmov 0 }
 0x1a9   : > { %9292 = vst [vmem:[#allocation24_spill] sm:$0xff] %v7546_v0  ;;  %v2591_v35 = vadd.f32 %v5698_v63, %v7327_v15  ;;  %v7563_v49 = vadd.f32 %v2908_v12, %v2588_v21  ;;  %v9296_v27 = vsel %vm7582_vm1, 4294967295, %v9295_v27  ;;  %vm4369_vm2 = vcmp.ne.s32.totalorder %v7543_v32, 0  ;;  %vm7625_vm9 = vmand %vm4407_vm0, %vm4371_vm15 }
 0x1aa   : > { %v2448_v61 = vpop.f32.mrf.mxu1  ;;  %v7569_v53 = vpop.f32.mrf.mxu0  ;;  %9297 = vst [vmem:[#allocation26_spill] sm:$0xff] %v9296_v27  ;;  %vm4405_vm3 = vcmp.lt.s32.totalorder %v7543_v32, 0  ;;  %v4031_v17 = vmul.u32 18, %v4030_v10  ;;  %v4085_v21 = vshrl.u32 %v7524_v25, 4  ;;  %vm4372_vm6 = vcmp.ne.s32.totalorder %v7567_v34, 0 }
 0x1ab   : > { %9293 = vst [vmem:[#allocation18_spill] sm:$0xff] %v7563_v49  ;;  %v2589_v15 = vadd.f32 %v2448_v61, %v7330_v52  ;;  %v7586_v12 = vadd.f32 %v5750_v37, %v2591_v35  ;;  %v7602_v37 = vmul.u32.u64.low 3817748708, %v7560_v13  ;;  %v7603_v18 = vmul.u32.u64.high 3817748708, %v7560_v13, %v7602_v37  ;;  %vm7643_vm10 = vmand %vm4405_vm3, %vm4369_vm2 }
 0x1ac   : > { %v5701_v46 = vpop.f32.mrf.mxu1  ;;  %v7590_v1 = vpop.f32.mrf.mxu0  ;;  %vm4408_vm7 = vcmp.lt.s32.totalorder %v7567_v34, 0  ;;  %v7619_v37 = vadd.s32 18, %v7533_v4  ;;  %v7648_v0 = vadd.s32 18, %v7543_v32  ;;  %v7651_v36 = vadd.s32 18, %v7567_v34 }
 0x1ad   : > { %9298 = vst [vmem:[#allocation25_spill] sm:$0xff] %v7586_v12  ;;  %v2594_v63 = vadd.f32 %v5701_v46, %v7333_v60  ;;  %v7606_v35 = vadd.f32 %v2911_v54, %v2589_v15  ;;  %v7630_v54 = vadd.s32 18, %v7540_v3  ;;  %vm7661_vm11 = vmand %vm4408_vm7, %vm4372_vm6  ;;  %v7671_v27 = vsub.s32 %v7478_v6, %v4031_v17 }
 0x1ae   : > { %v2461_v25 = vpop.f32.mrf.mxu1  ;;  %v2940_v10 = vpop.f32.mrf.mxu0  ;;  %v7633_v15 = vmul.u32.u64.low 3817748708, %v7575_v57  ;;  %v7634_v46 = vmul.u32.u64.high 3817748708, %v7575_v57, %v7633_v15  ;;  %9310 = vst [vmem:[#allocation2_spill] sm:$0xff] %v7651_v36  ;;  %v7689_v6 = vadd.s32 120, %v7366_v56  ;;  %v8409_v49 = vadd.s32 248, %v7366_v56 }
 0x1af   : > { %9301 = vst [vmem:[#allocation27_spill] sm:$0xff] %v7606_v35  ;;  %9306 = vst [vmem:[#allocation28_spill] sm:$0xff] %v7630_v54  ;;  %v2592_v35 = vadd.f32 %v2461_v25, %v7337_v51  ;;  %v7637_v12 = vadd.f32 %v5753_v14, %v2594_v63  ;;  %v9311_v14 = vmov 0  ;;  %v4086_v63 = vmul.u32 18, %v4085_v21 }
 0x1b0   : > { %v5702_v40 = vpop.f32.mrf.mxu1  ;;  %v5758_v15 = vpop.f32.mrf.mxu0  ;;  %v9312_v14 = vsel %vm7661_vm11, 4294967295, %v9311_v14  ;;  %v4063_v25 = vshrl.u32 %v7550_v45, 4  ;;  %9315 = vst [vmem:[#allocation30_spill] sm:$0xff] %v7671_v27  ;;  %v7674_v51 = vadd.s32 96, %v7366_v56  ;;  %vm4370_vm12 = vcmp.ne.s32.totalorder %v7671_v27, 0  ;;  %v9456_v61 = vld [vmem:[#allocation24_spill] sm:$0xff] }
 0x1b1   : > { %9307 = vst [vmem:[#allocation29_spill] sm:$0xff] %v7637_v12  ;;  %9313 = vst [vmem:[#allocation4_spill] sm:$0xff] %v9312_v14  ;;  %v4096_v12 = vshrl.u32 %v7557_v24, 4  ;;  %v2595_v2 = vadd.f32 %v5702_v40, %v7340_v47  ;;  %v7668_v28 = vadd.f32 %v2924_v26, %v2592_v35  ;;  %v7704_v21 = vsub.s32 %v7504_v19, %v4086_v63 }
 0x1b2   : > { %v2464_v9 = vpop.f32.mrf.mxu1  ;;  %v2943_v62 = vpop.f32.mrf.mxu0  ;;  %v4064_v47 = vmul.u32 18, %v4063_v25  ;;  %v4129_v19 = vshrl.u32 %v7634_v46, 4  ;;  %vm4406_vm13 = vcmp.lt.s32.totalorder %v7671_v27, 0  ;;  %v7730_v25 = vadd.s32 144, %v7366_v56 }
 0x1b3   : > { %9314 = vst [vmem:[#allocation3_spill] sm:$0xff] %v7668_v28  ;;  %v2593_v26 = vadd.f32 %v2464_v9, %v7343_v55  ;;  %v7697_v24 = vadd.f32 %v7552_v43, %v2595_v2  ;;  %9317 = vst [vmem:[#allocation32_spill] sm:$0xff] %v7704_v21  ;;  %v4097_v55 = vmul.u32 18, %v4096_v12  ;;  %v4074_v9 = vshrl.u32 %v7603_v18, 4 }
 0x1b4   : > { %v5705_v35 = vpop.f32.mrf.mxu1  ;;  %v5761_v40 = vpop.f32.mrf.mxu0  ;;  %v7713_v2 = vmul.u32.u64.low 3817748708, %v7674_v51  ;;  %v7714_v43 = vmul.u32.u64.high 3817748708, %v7674_v51, %v7713_v2  ;;  %v7718_v63 = vmul.u32.u64.low 3817748708, %v7689_v6  ;;  %v7719_v12 = vmul.u32.u64.high 3817748708, %v7689_v6, %v7718_v63  ;;  %vm7802_vm6 = vmand %vm4406_vm13, %vm4370_vm12 }
 0x1b5   : > { %9316 = vst [vmem:[#allocation31_spill] sm:$0xff] %v7697_v24  ;;  %v2598_v28 = vadd.f32 %v5705_v35, %v7346_v20  ;;  %v7709_v45 = vadd.f32 %v7569_v53, %v2593_v26  ;;  %v7722_v18 = vadd.s32 104, %v7366_v56  ;;  %v7733_v46 = vadd.s32 18, %v7671_v27  ;;  %v9509_v60 = vld [vmem:[#allocation2_spill] sm:$0xff] }
 0x1b6   : > { %v2477_v17 = vpop.f32.mrf.mxu1  ;;  %v2956_v24 = vpop.f32.mrf.mxu0  ;;  %vm4375_vm14 = vcmp.ne.s32.totalorder %v7704_v21, 0  ;;  %v7737_v2 = vsub.s32 %v7519_v38, %v4064_v47  ;;  %v4075_v63 = vmul.u32 18, %v4074_v9  ;;  %vm4411_vm15 = vcmp.lt.s32.totalorder %v7704_v21, 0 }
 0x1b7   : > { %9318 = vst [vmem:[#allocation33_spill] sm:$0xff] %v7709_v45  ;;  %v2596_v20 = vadd.f32 %v2477_v17, %v7349_v7  ;;  %v7727_v53 = vadd.f32 %v7590_v1, %v2598_v28  ;;  %9320 = vst [vmem:[#allocation35_spill] sm:$0xff] %v7733_v46  ;;  %v7744_v1 = vsub.s32 %v7527_v31, %v4097_v55  ;;  %v4130_v45 = vmul.u32 18, %v4129_v19 }
 0x1b8   : > { %v5706_v26 = vpop.f32.mrf.mxu1  ;;  %v5762_v35 = vpop.f32.mrf.mxu0  ;;  %9321 = vst [vmem:[#allocation36_spill] sm:$0xff] %v7737_v2  ;;  %v7749_v34 = vmul.u32.u64.low 3817748708, %v7722_v18  ;;  %v7750_v36 = vmul.u32.u64.high 3817748708, %v7722_v18, %v7749_v34  ;;  %v7753_v38 = vadd.s32 128, %v7366_v56  ;;  %v7765_v19 = vadd.s32 18, %v7704_v21  ;;  %vm7817_vm0 = vmand %vm4411_vm15, %vm4375_vm14 }
 0x1b9   : > { %9319 = vst [vmem:[#allocation34_spill] sm:$0xff] %v7727_v53  ;;  %v2599_v7 = vadd.f32 %v5706_v26, %v7352_v23  ;;  %v7741_v28 = vadd.f32 %v2940_v10, %v2596_v20  ;;  %9323 = vst [vmem:[#allocation38_spill] sm:$0xff] %v7744_v1  ;;  %v7759_v10 = vmul.u32.u64.low 3817748708, %v7730_v25  ;;  %v7760_v9 = vmul.u32.u64.high 3817748708, %v7730_v25, %v7759_v10 }
 0x1ba   : > { %v2480_v17 = vpop.f32.mrf.mxu1  ;;  %v7746_v53 = vpop.f32.mrf.mxu0  ;;  %9325 = vst [vmem:[#allocation40_spill] sm:$0xff] %v7765_v19  ;;  %v7770_v34 = vsub.s32 %v7560_v13, %v4075_v63  ;;  %v7779_v26 = vadd.s32 152, %v7366_v56  ;;  %v7784_v10 = vsub.s32 %v7575_v57, %v4130_v45  ;;  %v9331_v57 = vmov 0 }
 0x1bb   : > { %9322 = vst [vmem:[#allocation37_spill] sm:$0xff] %v7741_v28  ;;  %v2597_v23 = vadd.f32 %v2480_v17, %v7355_v48  ;;  %v7756_v47 = vadd.f32 %v5758_v15, %v2599_v7  ;;  %v7774_v15 = vadd.s32 18, %v7737_v2  ;;  %v9332_v57 = vsel %vm7802_vm6, 4294967295, %v9331_v57 }
 0x1bc   : > { %v5709_v31 = vpop.f32.mrf.mxu1  ;;  %v7762_v55 = vpop.f32.mrf.mxu0  ;;  %9326 = vst [vmem:[#allocation41_spill] sm:$0xff] %v7770_v34  ;;  %9329 = vst [vmem:[#allocation44_spill] sm:$0xff] %v7784_v10  ;;  %v7788_v13 = vmul.u32.u64.low 3817748708, %v7753_v38  ;;  %v7789_v63 = vmul.u32.u64.high 3817748708, %v7753_v38, %v7788_v13  ;;  %vm4412_vm7 = vcmp.lt.s32.totalorder %v7744_v1, 0  ;;  %v9335_v45 = vmov 0 }
 0x1bd   : > { %9324 = vst [vmem:[#allocation39_spill] sm:$0xff] %v7756_v47  ;;  %v2602_v48 = vadd.f32 %v5709_v31, %v7358_v58  ;;  %9327 = vst [vmem:[#allocation42_spill] sm:$0xff] %v7774_v15  ;;  %v7776_v20 = vadd.f32 %v2943_v62, %v2597_v23  ;;  %v4107_v47 = vshrl.u32 %v7714_v43, 4  ;;  %v4140_v23 = vshrl.u32 %v7719_v12, 4 }
 0x1be   : > { %v2493_v7 = vpop.f32.mrf.mxu1  ;;  %v7781_v17 = vpop.f32.mrf.mxu0  ;;  %9333 = vst [vmem:[#allocation46_spill] sm:$0xff] %v9332_v57  ;;  %v9336_v45 = vsel %vm7817_vm0, 4294967295, %v9335_v45  ;;  %vm9339_vm12 = vcmp.ne.s32.totalorder %v7737_v2, 0  ;;  %vm9340_vm13 = vcmp.lt.s32.totalorder %v7737_v2, 0  ;;  %vm4379_vm14 = vcmp.ne.s32.totalorder %v7784_v10, 0 }
 0x1bf   : > { %9328 = vst [vmem:[#allocation43_spill] sm:$0xff] %v7776_v20  ;;  %v2600_v58 = vadd.f32 %v2493_v7, %v7361_v41  ;;  %v7793_v62 = vadd.f32 %v5761_v40, %v2602_v48  ;;  %v7808_v41 = vadd.s32 18, %v7744_v1  ;;  %9337 = vst [vmem:[#allocation48_spill] sm:$0xff] %v9336_v45  ;;  %vm4415_vm15 = vcmp.lt.s32.totalorder %v7784_v10, 0 }
 0x1c0   : > { %v5710_v31 = vpop.f32.mrf.mxu1  ;;  %v7796_v20 = vpop.f32.mrf.mxu0  ;;  %v7824_v12 = vmul.u32.u64.low 3817748708, %v7779_v26  ;;  %v7825_v48 = vmul.u32.u64.high 3817748708, %v7779_v26, %v7824_v12  ;;  %vm7833_vm2 = vmand %vm9340_vm13, %vm9339_vm12  ;;  %vm9344_vm3 = vcmp.ne.s32.totalorder %v7744_v1, 0  ;;  %v4173_v28 = vshrl.u32 %v7760_v9, 4 }
 0x1c1   : > { %9330 = vst [vmem:[#allocation45_spill] sm:$0xff] %v7793_v62  ;;  %9334 = vst [vmem:[#allocation47_spill] sm:$0xff] %v7808_v41  ;;  %v2603_v40 = vadd.f32 %v5710_v31, %v7364_v42  ;;  %v7821_v43 = vadd.f32 %v2956_v24, %v2600_v58  ;;  %v9341_v42 = vmov 0  ;;  %v4108_v24 = vmul.u32 18, %v4107_v47 }
 0x1c2   : > { %v2496_v7 = vpop.f32.mrf.mxu1  ;;  %v7827_v13 = vpop.f32.mrf.mxu0  ;;  %v9342_v42 = vsel %vm7833_vm2, 4294967295, %v9341_v42  ;;  %v4118_v58 = vshrl.u32 %v7750_v36, 4  ;;  %vm7845_vm11 = vmand %vm4412_vm7, %vm9344_vm3  ;;  %v9345_v12 = vmov 0  ;;  %v4141_v62 = vmul.u32 18, %v4140_v23 }
 0x1c3   : > { %9338 = vst [vmem:[#allocation49_spill] sm:$0xff] %v7821_v43  ;;  %9343 = vst [vmem:[#allocation50_spill] sm:$0xff] %v9342_v42  ;;  %v2601_v31 = vadd.f32 %v2496_v7, %v7369_v29  ;;  %v9346_v12 = vsel %vm7845_vm11, 4294967295, %v9345_v12  ;;  %v7849_v43 = vadd.f32 %v5762_v35, %v2603_v40  ;;  %v7861_v47 = vadd.s32 18, %v7770_v34 }
 0x1c4   : > { %9347 = vst [vmem:[#allocation51_spill] sm:$0xff] %v9346_v12  ;;  %v5713_v14 = vpop.f32.mrf.mxu1  ;;  %v5769_v3 = vpop.f32.mrf.mxu0  ;;  %v7864_v35 = vadd.s32 136, %v7366_v56  ;;  %vm9350_vm3 = vcmp.ne.s32.totalorder %v7770_v34, 0  ;;  %vm9351_vm7 = vcmp.lt.s32.totalorder %v7770_v34, 0  ;;  %v9352_v40 = vmov 0  ;;  %vm7893_vm13 = vmand %vm4415_vm15, %vm4379_vm14 }
 0x1c5   : > { %9348 = vst [vmem:[#allocation52_spill] sm:$0xff] %v7849_v43  ;;  %9349 = vst [vmem:[#allocation53_spill] sm:$0xff] %v7861_v47  ;;  %v2606_v9 = vadd.f32 %v5713_v14, %v7372_v50  ;;  %v7880_v7 = vadd.s32 18, %v7784_v10  ;;  %v7883_v36 = vadd.f32 %v7746_v53, %v2601_v31  ;;  %v9357_v29 = vmov 0 }
 0x1c6   : > { %vm7875_vm12 = vmand %vm9351_vm7, %vm9350_vm3  ;;  %v2509_v50 = vpop.f32.mrf.mxu1  ;;  %v2988_v14 = vpop.f32.mrf.mxu0  ;;  %v9358_v29 = vsel %vm7893_vm13, 4294967295, %v9357_v29  ;;  %v7898_v43 = vsub.s32 %v7674_v51, %v4108_v24  ;;  %v4119_v53 = vmul.u32 18, %v4118_v58  ;;  %v4151_v31 = vshrl.u32 %v7789_v63, 4 }
 0x1c7   : > { %v9353_v40 = vsel %vm7875_vm12, 4294967295, %v9352_v40  ;;  %9355 = vst [vmem:[#allocation55_spill] sm:$0xff] %v7880_v7  ;;  %9356 = vst [vmem:[#allocation56_spill] sm:$0xff] %v7883_v36  ;;  %v2604_v36 = vadd.f32 %v2509_v50, %v7376_v11  ;;  %v7903_v21 = vsub.s32 %v7689_v6, %v4141_v62  ;;  %v7906_v23 = vadd.f32 %v7762_v55, %v2606_v9 }
 0x1c8   : > { %9354 = vst [vmem:[#allocation54_spill] sm:$0xff] %v9353_v40  ;;  %9359 = vst [vmem:[#allocation57_spill] sm:$0xff] %v9358_v29  ;;  %v4174_v1 = vmul.u32 18, %v4173_v28  ;;  %v5714_v41 = vpop.f32.mrf.mxu1  ;;  %v5770_v12 = vpop.f32.mrf.mxu0  ;;  %v7913_v24 = vmul.u32.u64.low 3817748708, %v7864_v35  ;;  %v7914_v58 = vmul.u32.u64.high 3817748708, %v7864_v35, %v7913_v24  ;;  %v7917_v11 = vadd.s32 176, %v7366_v56 }
 0x1c9   : > { %9360 = vst [vmem:[#allocation58_spill] sm:$0xff] %v7906_v23  ;;  %v2607_v6 = vadd.f32 %v5714_v41, %v7379_v22  ;;  %v7925_v55 = vadd.f32 %v7781_v17, %v2604_v36  ;;  %v4184_v63 = vshrl.u32 %v7825_v48, 4  ;;  %vm4377_vm14 = vcmp.ne.s32.totalorder %v7898_v43, 0 }
 0x1ca   : > { %v2512_v62 = vpop.f32.mrf.mxu1  ;;  %v2991_v9 = vpop.f32.mrf.mxu0  ;;  %v7931_v50 = vadd.s32 18, %v7898_v43  ;;  %v7934_v22 = vsub.s32 %v7722_v18, %v4119_v53  ;;  %v4152_v41 = vmul.u32 18, %v4151_v31  ;;  %v7939_v17 = vsub.s32 %v7730_v25, %v4174_v1 }
 0x1cb   : > { %9361 = vst [vmem:[#allocation59_spill] sm:$0xff] %v7925_v55  ;;  %v2605_v24 = vadd.f32 %v2512_v62, %v7385_v44  ;;  %v7942_v48 = vadd.f32 %v7796_v20, %v2607_v6  ;;  %v7946_v51 = vmul.u32.u64.low 3817748708, %v7917_v11  ;;  %v7947_v55 = vmul.u32.u64.high 3817748708, %v7917_v11, %v7946_v51 }
 0x1cc   : > { %9362 = vst [vmem:[#allocation60_spill] sm:$0xff] %v7939_v17  ;;  %v5717_v36 = vpop.f32.mrf.mxu1  ;;  %v5773_v28 = vpop.f32.mrf.mxu0  ;;  %v7950_v18 = vadd.s32 160, %v7366_v56  ;;  %v7954_v53 = vadd.s32 18, %v7903_v21  ;;  %v4185_v25 = vmul.u32 18, %v4184_v63  ;;  %v7962_v51 = vsub.s32 %v7753_v38, %v4152_v41 }
 0x1cd   : > { %9363 = vst [vmem:[#allocation61_spill] sm:$0xff] %v7942_v48  ;;  %v2610_v44 = vadd.f32 %v5717_v36, %v7388_v5  ;;  %v7957_v1 = vadd.f32 %v7827_v13, %v2605_v24  ;;  %v7965_v6 = vadd.s32 184, %v7366_v56  ;;  %v7969_v62 = vadd.s32 18, %v7934_v22 }
 0x1ce   : > { %v2525_v20 = vpop.f32.mrf.mxu1  ;;  %v3004_v31 = vpop.f32.mrf.mxu0  ;;  %v4162_v36 = vshrl.u32 %v7914_v58, 4  ;;  %v7977_v38 = vmul.u32.u64.low 3817748708, %v7950_v18  ;;  %v7978_v41 = vmul.u32.u64.high 3817748708, %v7950_v18, %v7977_v38  ;;  %v8013_v23 = vadd.s32 192, %v7366_v56 }
 0x1cf   : > { %9364 = vst [vmem:[#allocation62_spill] sm:$0xff] %v7957_v1  ;;  %v2608_v5 = vadd.f32 %v2525_v20, %v7391_v33  ;;  %v7972_v13 = vadd.f32 %v5769_v3, %v2610_v44  ;;  %v7982_v33 = vadd.s32 18, %v7939_v17  ;;  %v7985_v20 = vsub.s32 %v7779_v26, %v4185_v25 }
 0x1d0   : > { %v5718_v63 = vpop.f32.mrf.mxu1  ;;  %v5774_v24 = vpop.f32.mrf.mxu0  ;;  %v7993_v58 = vmul.u32.u64.low 3817748708, %v7965_v6  ;;  %v7994_v48 = vmul.u32.u64.high 3817748708, %v7965_v6, %v7993_v58  ;;  %v7997_v38 = vadd.s32 168, %v7366_v56  ;;  %vm9369_vm15 = vcmp.lt.s32.totalorder %v7898_v43, 0 }
 0x1d1   : > { %9365 = vst [vmem:[#allocation63_spill] sm:$0xff] %v7972_v13  ;;  %v2611_v1 = vadd.f32 %v5718_v63, %v7394_v39  ;;  %9366 = vst [vmem:[#allocation64_spill] sm:$0xff] %v7985_v20  ;;  %v7987_v3 = vadd.f32 %v2988_v14, %v2608_v5  ;;  %v8004_v14 = vadd.s32 208, %v7366_v56  ;;  %v8009_v63 = vadd.s32 18, %v7962_v51 }
 0x1d2   : > { %v2528_v44 = vpop.f32.mrf.mxu1  ;;  %v7989_v13 = vpop.f32.mrf.mxu0  ;;  %v4217_v58 = vshrl.u32 %v7947_v55, 4  ;;  %vm8020_vm7 = vmand %vm9369_vm15, %vm4377_vm14  ;;  %vm9373_vm13 = vcmp.ne.s32.totalorder %v7903_v21, 0  ;;  %vm9374_vm11 = vcmp.lt.s32.totalorder %v7903_v21, 0  ;;  %vm9378_vm15 = vcmp.ne.s32.totalorder %v7934_v22, 0 }
 0x1d3   : > { %9367 = vst [vmem:[#allocation65_spill] sm:$0xff] %v7987_v3  ;;  %v2609_v39 = vadd.f32 %v2528_v44, %v7401_v16  ;;  %v8001_v26 = vadd.f32 %v5770_v12, %v2611_v1  ;;  %v4163_v3 = vmul.u32 18, %v4162_v36  ;;  %v9370_v12 = vmov 0  ;;  %vm8036_vm12 = vmand %vm9374_vm11, %vm9373_vm13 }
 0x1d4   : > { %v5721_v25 = vpop.f32.mrf.mxu1  ;;  %v8006_v5 = vpop.f32.mrf.mxu0  ;;  %v9371_v12 = vsel %vm8020_vm7, 4294967295, %v9370_v12  ;;  %v8028_v36 = vadd.s32 216, %v7366_v56  ;;  %vm9379_vm3 = vcmp.lt.s32.totalorder %v7934_v22, 0  ;;  %v9380_v10 = vmov 0 }
 0x1d5   : > { %9368 = vst [vmem:[#allocation66_spill] sm:$0xff] %v8001_v26  ;;  %v2614_v16 = vadd.f32 %v5721_v25, %v7408_v59  ;;  %v8025_v1 = vadd.f32 %v2991_v9, %v2609_v39  ;;  %v9375_v59 = vmov 0  ;;  %v8046_v39 = vadd.s32 200, %v7366_v56  ;;  %vm8053_vm0 = vmand %vm9379_vm3, %vm9378_vm15 }
 0x1d6   : > { %v2541_v55 = vpop.f32.mrf.mxu1  ;;  %v8030_v44 = vpop.f32.mrf.mxu0  ;;  %v9376_v59 = vsel %vm8036_vm12, 4294967295, %v9375_v59  ;;  %v8042_v25 = vmul.u32.u64.low 3817748708, %v7997_v38  ;;  %v8043_v9 = vmul.u32.u64.high 3817748708, %v7997_v38, %v8042_v25  ;;  %v9381_v10 = vsel %vm8053_vm0, 4294967295, %v9380_v10 }
 0x1d7   : > { %9372 = vst [vmem:[#allocation67_spill] sm:$0xff] %v8025_v1  ;;  %v9377_v1 = vld [vmem:[#allocation5_spill] sm:$0xff]  ;;  %v8057_v7 = vadd.f32 %v5773_v28, %v2614_v16  ;;  %v8060_v29 = vmul.u32.u64.low 3817748708, %v8004_v14  ;;  %v8061_v34 = vmul.u32.u64.high 3817748708, %v8004_v14, %v8060_v29  ;;  %vm9383_vm11 = vcmp.ne.s32.totalorder %v7939_v17, 0 }
 0x1d8   : > { %v2612_v26 = vadd.f32 %v2541_v55, %v9377_v1  ;;  %v5722_v25 = vpop.f32.mrf.mxu1  ;;  %v8063_v47 = vpop.f32.mrf.mxu0  ;;  %vm9384_vm13 = vcmp.lt.s32.totalorder %v7939_v17, 0  ;;  %v9385_v1 = vmov 0  ;;  %v8074_v55 = vadd.s32 18, %v7985_v20  ;;  %v9388_v29 = vld [vmem:[#allocation7_spill] sm:$0xff] }
 0x1d9   : > { %9382 = vst [vmem:[#allocation5_spill] sm:$0xff] %v8057_v7  ;;  %vm8069_vm14 = vmand %vm9384_vm13, %vm9383_vm11  ;;  %v4218_v28 = vmul.u32 18, %v4217_v58  ;;  %v8077_v16 = vmul.u32.u64.low 3817748708, %v8013_v23  ;;  %v8078_v7 = vmul.u32.u64.high 3817748708, %v8013_v23, %v8077_v16  ;;  %v2615_v40 = vadd.f32 %v5722_v25, %v9388_v29 }
 0x1da   : > { %v9386_v1 = vsel %vm8069_vm14, 4294967295, %v9385_v1  ;;  %9387 = vst [vmem:[#allocation68_spill] sm:$0xff] %v8074_v55  ;;  %vm9389_vm3 = vcmp.ne.s32.totalorder %v7962_v51, 0  ;;  %vm9390_vm15 = vcmp.lt.s32.totalorder %v7962_v51, 0  ;;  %v9391_v19 = vmov 0  ;;  %v2544_v58 = vpop.f32.mrf.mxu1  ;;  %v8095_v42 = vpop.f32.mrf.mxu0 }
 0x1db   : > { %vm8085_vm2 = vmand %vm9390_vm15, %vm9389_vm3  ;;  %v8089_v45 = vadd.f32 %v3004_v31, %v2612_v26  ;;  %v8092_v2 = vmul.u32.u64.low 3817748708, %v8028_v36  ;;  %v8093_v15 = vmul.u32.u64.high 3817748708, %v8028_v36, %v8092_v2  ;;  %vm9394_vm11 = vcmp.ne.s32.totalorder %v7985_v20, 0 }
 0x1dc   : > { %v9392_v19 = vsel %vm8085_vm2, 4294967295, %v9391_v19  ;;  %vm9395_vm13 = vcmp.lt.s32.totalorder %v7985_v20, 0  ;;  %v9396_v25 = vmov 0  ;;  %v8106_v16 = vsub.s32 %v7864_v35, %v4163_v3  ;;  %v9399_v2 = vld [vmem:[#allocation8_spill] sm:$0xff]  ;;  %v5725_v54 = vpop.f32.mrf.mxu1  ;;  %v5781_v35 = vpop.f32.mrf.mxu0 }
 0x1dd   : > { %9393 = vst [vmem:[#allocation7_spill] sm:$0xff] %v8089_v45  ;;  %vm8101_vm6 = vmand %vm9395_vm13, %vm9394_vm11  ;;  %v4195_v31 = vshrl.u32 %v7978_v41, 4  ;;  %v8110_v26 = vmul.u32.u64.low 3817748708, %v8046_v39  ;;  %v8111_v29 = vmul.u32.u64.high 3817748708, %v8046_v39, %v8110_v26  ;;  %v2613_v45 = vadd.f32 %v2544_v58, %v9399_v2 }
 0x1de   : > { %v9397_v25 = vsel %vm8101_vm6, 4294967295, %v9396_v25  ;;  %v4228_v46 = vshrl.u32 %v7994_v48, 4  ;;  %v8119_v57 = vadd.f32 %v5774_v24, %v2615_v40  ;;  %v8134_v40 = vsub.s32 %v7917_v11, %v4218_v28  ;;  %v9402_v48 = vld [vmem:[#allocation9_spill] sm:$0xff]  ;;  %v2557_v3 = vpop.f32.mrf.mxu1  ;;  %v3036_v58 = vpop.f32.mrf.mxu0  ;;  %v9404_v28 = vld [vmem:[#allocation11_spill] sm:$0xff] }
 0x1df   : > { %9398 = vst [vmem:[#allocation69_spill] sm:$0xff] %v9397_v25  ;;  %v2618_v24 = vadd.f32 %v5725_v54, %v9402_v48  ;;  %v8146_v41 = vadd.f32 %v7989_v13, %v2613_v45  ;;  %vm4382_vm3 = vcmp.ne.s32.totalorder %v8106_v16, 0  ;;  %vm4418_vm15 = vcmp.lt.s32.totalorder %v8106_v16, 0  ;;  %v9419_v25 = vld [vmem:[#allocation20_spill] sm:$0xff] }
 0x1e0   : > { %9400 = vst [vmem:[#allocation8_spill] sm:$0xff] %v8119_v57  ;;  %9401 = vst [vmem:[#allocation70_spill] sm:$0xff] %v8134_v40  ;;  %v4196_v54 = vmul.u32 18, %v4195_v31  ;;  %v4206_v11 = vshrl.u32 %v8043_v9, 4  ;;  %v2616_v48 = vadd.f32 %v2557_v3, %v9404_v28  ;;  %v4229_v26 = vmul.u32 18, %v4228_v46  ;;  %v5726_v2 = vpop.f32.mrf.mxu1  ;;  %v5782_v45 = vpop.f32.mrf.mxu0  ;;  %v9406_v9 = vld [vmem:[#allocation10_spill] sm:$0xff] }
 0x1e1   : > { %9403 = vst [vmem:[#allocation9_spill] sm:$0xff] %v8146_v41  ;;  %v4261_v27 = vshrl.u32 %v8061_v34, 4  ;;  %v8154_v57 = vadd.f32 %v8006_v5, %v2618_v24  ;;  %vm4387_vm11 = vcmp.ne.s32.totalorder %v8134_v40, 0  ;;  %v4239_v13 = vshrl.u32 %v8078_v7, 4  ;;  %vm8176_vm13 = vmand %vm4418_vm15, %vm4382_vm3 }
 0x1e2   : > { %v8160_v31 = vadd.s32 240, %v7366_v56  ;;  %v2619_v41 = vadd.f32 %v5726_v2, %v9406_v9  ;;  %v8164_v46 = vadd.s32 18, %v8106_v16  ;;  %v4272_v34 = vshrl.u32 %v8093_v15, 4  ;;  %v2560_v3 = vpop.f32.mrf.mxu1  ;;  %v8170_v24 = vpop.f32.mrf.mxu0 }
 0x1e3   : > { %9405 = vst [vmem:[#allocation11_spill] sm:$0xff] %v8154_v57  ;;  %v8168_v5 = vadd.f32 %v8030_v44, %v2616_v48  ;;  %v9408_v7 = vmov 0  ;;  %v8181_v2 = vadd.s32 18, %v8134_v40  ;;  %v8184_v28 = vsub.s32 %v7950_v18, %v4196_v54  ;;  %v9412_v48 = vld [vmem:[#allocation14_spill] sm:$0xff] }
 0x1e4   : > { %v9409_v7 = vsel %vm8176_vm13, 4294967295, %v9408_v7  ;;  %v4207_v15 = vmul.u32 18, %v4206_v11  ;;  %v4250_v44 = vshrl.u32 %v8111_v29, 4  ;;  %v2617_v9 = vadd.f32 %v2560_v3, %v9412_v48  ;;  %v5729_v54 = vpop.f32.mrf.mxu1  ;;  %v8202_v11 = vpop.f32.mrf.mxu0 }
 0x1e5   : > { %9407 = vst [vmem:[#allocation10_spill] sm:$0xff] %v8168_v5  ;;  %9410 = vst [vmem:[#allocation71_spill] sm:$0xff] %v8181_v2  ;;  %vm9413_vm6 = vcmp.lt.s32.totalorder %v8134_v40, 0  ;;  %v9414_v5 = vmov 0  ;;  %v8197_v57 = vsub.s32 %v7965_v6, %v4229_v26  ;;  %v4262_v20 = vmul.u32 18, %v4261_v27  ;;  %v9493_v2 = vld [vmem:[#allocation27_spill] sm:$0xff] }
 0x1e6   : > { %9411 = vst [vmem:[#allocation72_spill] sm:$0xff] %v8184_v28  ;;  %vm8192_vm14 = vmand %vm9413_vm6, %vm4387_vm11  ;;  %v8200_v18 = vadd.f32 %v8063_v47, %v2619_v41  ;;  %v4240_v29 = vmul.u32 18, %v4239_v13  ;;  %v8205_v3 = vmul.u32.u64.low 3817748708, %v8160_v31  ;;  %v8206_v48 = vmul.u32.u64.high 3817748708, %v8160_v31, %v8205_v3  ;;  %v2573_v41 = vpop.f32.mrf.mxu1  ;;  %v8219_v26 = vpop.f32.mrf.mxu0 }
 0x1e7   : > { %v9415_v5 = vsel %vm8192_vm14, 4294967295, %v9414_v5  ;;  %9417 = vst [vmem:[#allocation73_spill] sm:$0xff] %v8197_v57  ;;  %v8209_v55 = vadd.s32 224, %v7366_v56  ;;  %v2622_v17 = vadd.f32 %v5729_v54, %v9419_v25  ;;  %v4273_v47 = vmul.u32 18, %v4272_v34  ;;  %v9421_v3 = vld [vmem:[#allocation17_spill] sm:$0xff] }
 0x1e8   : > { %9416 = vst [vmem:[#allocation14_spill] sm:$0xff] %v9415_v5  ;;  %9418 = vst [vmem:[#allocation74_spill] sm:$0xff] %v8200_v18  ;;  %v8217_v6 = vadd.f32 %v8095_v42, %v2617_v9  ;;  %vm4385_vm6 = vcmp.ne.s32.totalorder %v8184_v28, 0  ;;  %v8227_v25 = vsub.s32 %v7997_v38, %v4207_v15  ;;  %v4251_v54 = vmul.u32 18, %v4250_v44  ;;  %v5730_v27 = vpop.f32.mrf.mxu1  ;;  %v9425_v44 = vld [vmem:[#allocation19_spill] sm:$0xff] }
 0x1e9   : > { %v2620_v34 = vadd.f32 %v2573_v41, %v9421_v3  ;;  %v8232_v42 = vsub.s32 %v8004_v14, %v4262_v20  ;;  %v8234_v9 = vadd.f32 %v5781_v35, %v2622_v17  ;;  %v8240_v13 = vsub.s32 %v8013_v23, %v4240_v29  ;;  %v9429_v3 = vld [vmem:[#allocation21_spill] sm:$0xff]  ;;  %v9430_v23 = vld [vmem:[#allocation15_spill] sm:$0xff] }
 0x1ea   : > { %9420 = vst [vmem:[#allocation20_spill] sm:$0xff] %v8217_v6  ;;  %v8236_v6 = vpop.f32.mrf.mxu0  ;;  %v8243_v38 = vmul.u32.u64.low 3817748708, %v8209_v55  ;;  %v8244_v15 = vmul.u32.u64.high 3817748708, %v8209_v55, %v8243_v38  ;;  %v2623_v41 = vadd.f32 %v5730_v27, %v9425_v44  ;;  %v8249_v20 = vsub.s32 %v8028_v36, %v4273_v47  ;;  %v2576_v14 = vpop.f32.mrf.mxu1 }
 0x1eb   : > { %9422 = vst [vmem:[#allocation17_spill] sm:$0xff] %v8232_v42  ;;  %9423 = vst [vmem:[#allocation75_spill] sm:$0xff] %v8234_v9  ;;  %v8251_v17 = vadd.f32 %v3036_v58, %v2620_v34  ;;  %v9431_v29 = vsel %vm7582_vm1, %v9429_v3, %v9430_v23  ;;  %v8266_v27 = vadd.s32 18, %v8184_v28  ;;  %v8271_v36 = vsub.s32 %v8046_v39, %v4251_v54  ;;  %v9436_v58 = vld [vmem:[#allocation22_spill] sm:$0xff]  ;;  %v9442_v39 = vld [vmem:[#allocation12_spill] sm:$0xff] }
 0x1ec   : > { %9424 = vst [vmem:[#allocation76_spill] sm:$0xff] %v8240_v13  ;;  %9426 = vst [vmem:[#allocation19_spill] sm:$0xff] %v8249_v20  ;;  %vm8259_vm15 = vcmp.lt.s32.totalorder %v9431_v29, 16  ;;  %v8263_v38 = vpop.f32.mrf.mxu0  ;;  %v2621_v47 = vadd.f32 %v2576_v14, %v9436_v58  ;;  %vm9437_vm1 = vcmp.lt.s32.totalorder %v8184_v28, 0  ;;  %v8284_v44 = vadd.f32 %v5782_v45, %v2623_v41  ;;  %v5801_v35 = vpop.f32.mrf.mxu1  ;;  %v9443_v54 = vld [vmem:[#allocation6_spill] sm:$0xff]  ;;  %v9518_v23 = vld [vmem:[#allocation36_spill] sm:$0xff] }
 0x1ed   : > { %9427 = vst [vmem:[#allocation77_spill] sm:$0xff] %v8251_v17  ;;  %9434 = vst [vmem:[#allocation26_spill] sm:$0xff] %v8266_v27  ;;  %v9444_v14 = vsel %vm7473_vm8, %v9442_v39, %v9443_v54  ;;  %v9447_v58 = vsel %vm7612_vm5, %v7619_v37, %v7533_v4  ;;  %vm9451_vm2 = vcmp.lt.s32.totalorder %v8197_v57, 0  ;;  %v9452_v41 = vmov 0  ;;  %v9522_v45 = vld [vmem:[#allocation31_spill] sm:$0xff] }
 0x1ee   : > { %9435 = vst [vmem:[#allocation21_spill] sm:$0xff] %v8271_v36  ;;  %vm8278_vm14 = vmand %vm9437_vm1, %vm4385_vm6  ;;  %vm8291_vm3 = vcmp.lt.s32.totalorder %v9444_v14, 16  ;;  %v8295_v29 = vpop.f32.mrf.mxu0  ;;  %vm8302_vm6 = vcmp.lt.s32.totalorder %v9447_v58, 16  ;;  %vm9450_vm1 = vcmp.ne.s32.totalorder %v8197_v57, 0  ;;  %v8315_v3 = vadd.s32 18, %v8197_v57 }
 0x1ef   : > { %9440 = vst [vmem:[#allocation15_spill] sm:$0xff] %v8284_v44  ;;  %vm8310_vm8 = vmand %vm9451_vm2, %vm9450_vm1  ;;  %vm4389_vm13 = vcmp.ne.s32.totalorder %v8240_v13, 0  ;;  %v4305_v4 = vshrl.u32 %v8206_v48, 4  ;;  %v3524_v37 = vadd.f32 %v5801_v35, %v9456_v61  ;;  %vm9457_vm5 = vcmp.ne.s32.totalorder %v8227_v25, 0  ;;  %v3379_v48 = vpop.f32.mrf.mxu1 }
 0x1f0   : > { %v9453_v41 = vsel %vm8310_vm8, 4294967295, %v9452_v41  ;;  %9455 = vst [vmem:[#allocation13_spill] sm:$0xff] %v8315_v3  ;;  %vm9458_vm12 = vcmp.lt.s32.totalorder %v8227_v25, 0  ;;  %v8332_v54 = vadd.f32 %v8170_v24, %v2621_v47  ;;  %v9462_v35 = vsel %vm7596_vm4, %v7537_v8, %v7497_v30  ;;  %v8348_v58 = vpop.f32.mrf.mxu0  ;;  %v9471_v30 = vld [vmem:[#allocation18_spill] sm:$0xff] }
 0x1f1   : > { %9454 = vst [vmem:[#allocation22_spill] sm:$0xff] %v9453_v41  ;;  %vm8325_vm0 = vmand %vm9458_vm12, %vm9457_vm5  ;;  %vm8344_vm12 = vcmp.lt.s32.totalorder %v9462_v35, 16  ;;  %v8351_v24 = vadd.s32 18, %v8227_v25  ;;  %vm9465_vm5 = vcmp.ne.s32.totalorder %v8232_v42, 0  ;;  %vm9466_vm1 = vcmp.lt.s32.totalorder %v8232_v42, 0  ;;  %v5802_v17 = vpop.f32.mrf.mxu1 }
 0x1f2   : > { %9461 = vst [vmem:[#allocation12_spill] sm:$0xff] %v8332_v54  ;;  %vm8357_vm2 = vmand %vm9466_vm1, %vm9465_vm5  ;;  %v9467_v47 = vmov 0  ;;  %v8362_v52 = vadd.s32 18, %v8232_v42  ;;  %vm4390_vm4 = vcmp.ne.s32.totalorder %v8271_v36, 0  ;;  %v3862_v8 = vadd.f32 %v8202_v11, %v3524_v37  ;;  %v8382_v18 = vpop.f32.mrf.mxu0 }
 0x1f3   : > { %v9468_v47 = vsel %vm8357_vm2, 4294967295, %v9467_v47  ;;  %v3522_v61 = vadd.f32 %v3379_v48, %v9471_v30  ;;  %vm9472_vm7 = vcmp.lt.s32.totalorder %v8240_v13, 0  ;;  %v9473_v35 = vmov 0  ;;  %v9487_v48 = vld [vmem:[#allocation25_spill] sm:$0xff]  ;;  %v3382_v28 = vpop.f32.mrf.mxu1 }
 0x1f4   : > { %9469 = vst [vmem:[#allocation6_spill] sm:$0xff] %v9468_v47  ;;  %9470 = vst [vmem:[#allocation24_spill] sm:$0xff] %v8362_v52  ;;  %v8377_v54 = vadd.s32 18, %v8240_v13  ;;  %v8380_v44 = vadd.s32 18, %v8249_v20  ;;  %v9478_v11 = vsel %vm7643_vm10, %v7648_v0, %v7543_v32  ;;  %v9483_v30 = vmov 0  ;;  %v8427_v27 = vpop.f32.mrf.mxu0  ;;  %v9494_v52 = vld [vmem:[#allocation28_spill] sm:$0xff] }
 0x1f5   : > { %vm8372_vm1 = vmand %vm9472_vm7, %vm4389_vm13  ;;  %vm8389_vm5 = vcmp.lt.s32.totalorder %v9478_v11, 16  ;;  %vm9481_vm7 = vcmp.ne.s32.totalorder %v8249_v20, 0  ;;  %vm9482_vm13 = vcmp.lt.s32.totalorder %v8249_v20, 0  ;;  %v8406_v32 = vadd.s32 18, %v8271_v36  ;;  %3898 = vst [vmem:[%s8337_s29 + $0x10] sm:$0xff] %v3862_v8  ;;  %v5805_v42 = vpop.f32.mrf.mxu1  ;;  %v9495_v47 = vld [vmem:[#allocation16_spill] sm:$0xff] }
 0x1f6   : > { %v9474_v35 = vsel %vm8372_vm1, 4294967295, %v9473_v35  ;;  %9476 = vst [vmem:[#allocation78_spill] sm:$0xff] %v8377_v54  ;;  %9477 = vst [vmem:[#allocation79_spill] sm:$0xff] %v8380_v44  ;;  %v4306_v0 = vmul.u32 18, %v4305_v4  ;;  %v3860_v11 = vadd.f32 %v8219_v26, %v3522_v61  ;;  %v3525_v40 = vadd.f32 %v5802_v17, %v9487_v48  ;;  %v9502_v26 = vld [vmem:[#allocation30_spill] sm:$0xff] }
 0x1f7   : > { %9475 = vst [vmem:[#allocation18_spill] sm:$0xff] %v9474_v35  ;;  %vm8401_vm11 = vmand %vm9482_vm13, %vm9481_vm7  ;;  %vm9488_vm10 = vcmp.lt.s32.totalorder %v8271_v36, 0  ;;  %v9489_v5 = vmov 0  ;;  %v4283_v4 = vshrl.u32 %v8244_v15, 4  ;;  %v8438_v61 = vadd.s32 232, %v7366_v56  ;;  %v3395_v44 = vpop.f32.mrf.mxu1  ;;  %v9510_v36 = vld [vmem:[#allocation23_spill] sm:$0xff] }
 0x1f8   : > { %v9484_v30 = vsel %vm8401_vm11, 4294967295, %v9483_v30  ;;  %9486 = vst [vmem:[#allocation81_spill] sm:$0xff] %v8406_v32  ;;  %vm8422_vm7 = vmand %vm9488_vm10, %vm4390_vm4  ;;  %v8441_v48 = vadd.s32 272, %v7366_v56  ;;  %v3863_v15 = vadd.f32 %v8236_v6, %v3525_v40  ;;  %v3523_v57 = vadd.f32 %v3382_v28, %v9493_v2  ;;  %v8463_v2 = vpop.f32.mrf.mxu0  ;;  %v9499_v28 = vld [vmem:[#allocation46_spill] sm:$0xff]  ;;  %v9501_v6 = vld [vmem:[#allocation35_spill] sm:$0xff] }
 0x1f9   : > { %9485 = vst [vmem:[#allocation80_spill] sm:$0xff] %v9484_v30  ;;  %v9490_v5 = vsel %vm8422_vm7, 4294967295, %v9489_v5  ;;  %3896 = vst [vmem:[%s8337_s29] sm:$0xff] %v3860_v11  ;;  %v9496_v3 = vsel %vm7625_vm9, %v9494_v52, %v9495_v47  ;;  %vm9500_vm13 = vnez %v9499_v28  ;;  %v9506_v28 = vld [vmem:[#allocation29_spill] sm:$0xff]  ;;  %v4284_v20 = vmul.u32 18, %v4283_v4  ;;  %v9507_v30 = vld [vmem:[#allocation4_spill] sm:$0xff] }
 0x1fa   : > { %9491 = vst [vmem:[#allocation25_spill] sm:$0xff] %v9490_v5  ;;  %9492 = vst [vmem:[#allocation82_spill] sm:$0xff] %v8441_v48  ;;  %vm8459_vm4 = vcmp.lt.s32.totalorder %v9496_v3, 16  ;;  %v9503_v13 = vsel %vm9500_vm13, %v9501_v6, %v9502_v26  ;;  %v8479_v3 = vsub.s32 %v8160_v31, %v4306_v0  ;;  %v4653_v26 = vsel %vm8259_vm15, %v3860_v11, 0.0  ;;  %v9514_v4 = vld [vmem:[#allocation3_spill] sm:$0xff] }
 0x1fb   : > { %vm8470_vm10 = vcmp.lt.s32.totalorder %v9503_v13, 16  ;;  %v8482_v47 = vmul.u32.u64.low 3817748708, %v8409_v49  ;;  %v8483_v52 = vmul.u32.u64.high 3817748708, %v8409_v49, %v8482_v47  ;;  %3899 = vst [vmem:[%s8337_s29 + $0x18] sm:$0xff] %v3863_v15  ;;  %v3861_v13 = vadd.f32 %v8263_v38, %v3523_v57 }
 0x1fc   : > { %v3528_v6 = vadd.f32 %v5805_v42, %v9506_v28  ;;  %vm9508_vm9 = vnez %v9507_v30  ;;  %v8499_v47 = vpop.f32.mrf.mxu0  ;;  %v8502_v9 = vmul.u32.u64.low 3817748708, %v8438_v61  ;;  %v8503_v11 = vmul.u32.u64.high 3817748708, %v8438_v61, %v8502_v9 }
 0x1fd   : > { %v9511_v31 = vsel %vm9508_vm9, %v9509_v60, %v9510_v36  ;;  %v8507_v57 = vmul.u32.u64.low 3817748708, %v8441_v48  ;;  %v8508_v42 = vmul.u32.u64.high 3817748708, %v8441_v48, %v8507_v57  ;;  %v4655_v38 = vsel %vm8291_vm3, %v3862_v8, 0.0  ;;  %3897 = vst [vmem:[%s8337_s29 + $0x8] sm:$0xff] %v3861_v13  ;;  %v5806_v9 = vpop.f32.mrf.mxu1  ;;  %v9515_v48 = vld [vmem:[#allocation50_spill] sm:$0xff] }
 0x1fe   : > { %vm8495_vm13 = vcmp.lt.s32.totalorder %v9511_v31, 16  ;;  %v4654_v36 = vsel %vm8302_vm6, %v3861_v13, 0.0  ;;  %v3866_v30 = vadd.f32 %v8295_v29, %v3528_v6  ;;  %v3526_v60 = vadd.f32 %v3395_v44, %v9514_v4  ;;  %v8518_v5 = vpop.f32.mrf.mxu0  ;;  %v9517_v57 = vld [vmem:[#allocation42_spill] sm:$0xff] }
 0x1ff   : > { %v4731_v28 = vmul.f32 %v4653_v26, %v4653_v26  ;;  %v4689_v31 = vadd.f32 %v4654_v36, %v4653_v26  ;;  %v4732_v32 = vmul.f32 %v4654_v36, %v4654_v36  ;;  %vm9516_vm15 = vnez %v9515_v48  ;;  %v3398_v4 = vpop.f32.mrf.mxu1 }
 0x200   : > { %v9519_v8 = vsel %vm9516_vm15, %v9517_v57, %v9518_v23  ;;  %vm4395_vm6 = vcmp.ne.s32.totalorder %v8479_v3, 0  ;;  %v4656_v44 = vsel %vm8344_vm12, %v3863_v15, 0.0  ;;  %3902 = vst [vmem:[%s8337_s29 + $0x30] sm:$0xff] %v3866_v30  ;;  %v3864_v29 = vadd.f32 %v8348_v58, %v3526_v60  ;;  %v8538_v57 = vpop.f32.mrf.mxu0  ;;  %v9524_v15 = vld [vmem:[#allocation33_spill] sm:$0xff] }
 0x201   : > { %vm8525_vm3 = vcmp.lt.s32.totalorder %v9519_v8, 16  ;;  %v3529_v26 = vadd.f32 %v5806_v9, %v9522_v45  ;;  %v8536_v13 = vadd.s32 256, %v7366_v56  ;;  %v4733_v48 = vmul.f32 %v4655_v38, %v4655_v38  ;;  %v9527_v8 = vld [vmem:[#allocation40_spill] sm:$0xff] }
 0x202   : > { %v4690_v6 = vadd.f32 %v4689_v31, %v4655_v38  ;;  %v4767_v36 = vadd.f32 %v4732_v32, %v4731_v28  ;;  %3900 = vst [vmem:[%s8337_s29 + $0x20] sm:$0xff] %v3864_v29  ;;  %v4657_v14 = vsel %vm8389_vm5, %v3864_v29, 0.0  ;;  %v3527_v60 = vadd.f32 %v3398_v4, %v9524_v15  ;;  %v5809_v28 = vpop.f32.mrf.mxu1  ;;  %v9525_v31 = vld [vmem:[#allocation48_spill] sm:$0xff]  ;;  %v8558_v37 = vpop.f32.mrf.mxu0  ;;  %v9534_v29 = vld [vmem:[#allocation53_spill] sm:$0xff] }
 0x203   : > { %9523 = vst [vmem:[#allocation27_spill] sm:$0xff] %v8536_v13  ;;  %v3867_v58 = vadd.f32 %v8382_v18, %v3529_v26  ;;  %v8547_v9 = vadd.s32 18, %v8479_v3  ;;  %v4734_v23 = vmul.f32 %v4656_v44, %v4656_v44  ;;  %vm9526_vm12 = vnez %v9525_v31  ;;  %v9528_v45 = vld [vmem:[#allocation32_spill] sm:$0xff]  ;;  %v9532_v18 = vld [vmem:[#allocation54_spill] sm:$0xff]  ;;  %v9535_v26 = vld [vmem:[#allocation41_spill] sm:$0xff] }
 0x204   : > { %v4768_v38 = vadd.f32 %v4767_v36, %v4733_v48  ;;  %v4691_v32 = vadd.f32 %v4690_v6, %v4656_v44  ;;  %v9529_v35 = vsel %vm9526_vm12, %v9527_v8, %v9528_v45  ;;  %vm9533_vm5 = vnez %v9532_v18  ;;  %v9539_v6 = vld [vmem:[#allocation34_spill] sm:$0xff]  ;;  %v3411_v18 = vpop.f32.mrf.mxu1 }
 0x205   : > { %vm8554_vm15 = vcmp.lt.s32.totalorder %v9529_v35, 16  ;;  %v9536_v4 = vsel %vm9533_vm5, %v9534_v29, %v9535_v26  ;;  %v8570_v48 = vsub.s32 %v8209_v55, %v4284_v20  ;;  %3903 = vst [vmem:[%s8337_s29 + $0x38] sm:$0xff] %v3867_v58  ;;  %v3865_v35 = vadd.f32 %v8427_v27, %v3527_v60  ;;  %v9543_v27 = vld [vmem:[#allocation51_spill] sm:$0xff] }
 0x206   : > { %vm8565_vm9 = vcmp.lt.s32.totalorder %v9536_v4, 16  ;;  %v3532_v36 = vadd.f32 %v5809_v28, %v9539_v6  ;;  %vm9540_vm12 = vcmp.lt.s32.totalorder %v8479_v3, 0  ;;  %v4692_v55 = vadd.f32 %v4691_v32, %v4657_v14  ;;  %v9545_v60 = vld [vmem:[#allocation47_spill] sm:$0xff]  ;;  %v9546_v28 = vld [vmem:[#allocation38_spill] sm:$0xff]  ;;  %v8597_v4 = vpop.f32.mrf.mxu0 }
 0x207   : > { %vm8579_vm11 = vmand %vm9540_vm12, %vm4395_vm6  ;;  %v8584_v31 = vmul.u32.u64.low 3817748708, %v8536_v13  ;;  %v8585_v8 = vmul.u32.u64.high 3817748708, %v8536_v13, %v8584_v31  ;;  %v4735_v20 = vmul.f32 %v4657_v14, %v4657_v14  ;;  %v4769_v45 = vadd.f32 %v4768_v38, %v4734_v23  ;;  %3901 = vst [vmem:[%s8337_s29 + $0x28] sm:$0xff] %v3865_v35  ;;  %v9550_v38 = vld [vmem:[#allocation37_spill] sm:$0xff] }
 0x208   : > { %vm9544_vm5 = vnez %v9543_v27  ;;  %v4316_v6 = vshrl.u32 %v8483_v52, 4  ;;  %v4659_v32 = vsel %vm8459_vm4, %v3866_v30, 0.0  ;;  %v4658_v14 = vsel %vm8470_vm10, %v3865_v35, 0.0  ;;  %v8607_v13 = vpop.f32.mrf.mxu0 }
 0x209   : > { %v9547_v29 = vsel %vm9544_vm5, %v9545_v60, %v9546_v28  ;;  %v3870_v23 = vadd.f32 %v8463_v2, %v3532_v36  ;;  %v3530_v31 = vadd.f32 %v3411_v18, %v9550_v38  ;;  %v4770_v27 = vadd.f32 %v4769_v45, %v4735_v20  ;;  %v9556_v18 = vld [vmem:[#allocation43_spill] sm:$0xff] }
 0x20a   : > { %vm8593_vm7 = vcmp.lt.s32.totalorder %v9547_v29, 16  ;;  %v4693_v60 = vadd.f32 %v4692_v55, %v4658_v14  ;;  %v4736_v28 = vmul.f32 %v4658_v14, %v4658_v14  ;;  %v5810_v29 = vpop.f32.mrf.mxu1  ;;  %vm9551_vm6 = vnez %v9371_v12  ;;  %v9555_v12 = vld [vmem:[#allocation39_spill] sm:$0xff]  ;;  %v8630_v45 = vpop.f32.mrf.mxu0 }
 0x20b   : > { %v9552_v40 = vsel %vm9551_vm6, %v7931_v50, %v7898_v43  ;;  %v4539_v17 = vsel %vm8579_vm11, %v8547_v9, %v8479_v3  ;;  %v4660_v2 = vsel %vm8495_vm13, %v3867_v58, 0.0  ;;  %3906 = vst [vmem:[%s8337_s29 + $0x50] sm:$0xff] %v3870_v23  ;;  %v3868_v30 = vadd.f32 %v8499_v47, %v3530_v31 }
 0x20c   : > { %vm8614_vm4 = vcmp.lt.s32.totalorder %v9552_v40, 16  ;;  %v3533_v35 = vadd.f32 %v5810_v29, %v9555_v12  ;;  %v8628_v43 = vadd.s32 280, %v7366_v56  ;;  %v4737_v50 = vmul.f32 %v4659_v32, %v4659_v32  ;;  %v3414_v20 = vpop.f32.mrf.mxu1  ;;  %v9559_v29 = vld [vmem:[#allocation55_spill] sm:$0xff]  ;;  %v9560_v40 = vld [vmem:[#allocation44_spill] sm:$0xff] }
 0x20d   : > { %v4694_v36 = vadd.f32 %v4693_v60, %v4659_v32  ;;  %v4771_v55 = vadd.f32 %v4770_v27, %v4736_v28  ;;  %vm4393_vm10 = vcmp.ne.s32.totalorder %v8570_v48, 0  ;;  %v4317_v0 = vmul.u32 18, %v4316_v6  ;;  %3904 = vst [vmem:[%s8337_s29 + $0x40] sm:$0xff] %v3868_v30  ;;  %v9557_v28 = vld [vmem:[#allocation57_spill] sm:$0xff]  ;;  %v9602_v12 = vld [vmem:[#allocation72_spill] sm:$0xff] }
 0x20e   : > { %v4661_v47 = vsel %vm8525_vm3, %v3868_v30, 0.0  ;;  %v3871_v58 = vadd.f32 %v8518_v5, %v3533_v35  ;;  %v3531_v14 = vadd.f32 %v3414_v20, %v9556_v18  ;;  %v8640_v32 = vadd.s32 18, %v8570_v48  ;;  %v5813_v60 = vpop.f32.mrf.mxu1  ;;  %v8651_v5 = vpop.f32.mrf.mxu0 }
 0x20f   : > { %v4738_v38 = vmul.f32 %v4660_v2, %v4660_v2  ;;  %v4772_v31 = vadd.f32 %v4771_v55, %v4737_v50  ;;  %v4695_v27 = vadd.f32 %v4694_v36, %v4660_v2  ;;  %vm9558_vm13 = vnez %v9557_v28  ;;  %v9568_v50 = vld [vmem:[#allocation45_spill] sm:$0xff] }
 0x210   : > { %v9561_v6 = vsel %vm9558_vm13, %v9559_v29, %v9560_v40  ;;  %vm9564_vm3 = vnez %v9381_v10  ;;  %v4294_v30 = vshrl.u32 %v8503_v11, 4  ;;  %3907 = vst [vmem:[%s8337_s29 + $0x58] sm:$0xff] %v3871_v58  ;;  %v3869_v35 = vadd.f32 %v8538_v57, %v3531_v14  ;;  %v8680_v57 = vpop.f32.mrf.mxu0 }
 0x211   : > { %vm8647_vm5 = vcmp.lt.s32.totalorder %v9561_v6, 16  ;;  %v9565_v54 = vsel %vm9564_vm3, %v7969_v62, %v7934_v22  ;;  %v3536_v36 = vadd.f32 %v5813_v60, %v9568_v50  ;;  %v4696_v10 = vadd.f32 %v4695_v27, %v4661_v47  ;;  %v3427_v22 = vpop.f32.mrf.mxu1 }
 0x212   : > { %vm8658_vm6 = vcmp.lt.s32.totalorder %v9565_v54, 16  ;;  %v8667_v55 = vmul.u32.u64.low 3817748708, %v8628_v43  ;;  %v8668_v20 = vmul.u32.u64.high 3817748708, %v8628_v43, %v8667_v55  ;;  %v4739_v18 = vmul.f32 %v4661_v47, %v4661_v47  ;;  %3905 = vst [vmem:[%s8337_s29 + $0x48] sm:$0xff] %v3869_v35  ;;  %v8692_v40 = vpop.f32.mrf.mxu0 }
 0x213   : > { %v4773_v28 = vadd.f32 %v4772_v31, %v4738_v38  ;;  %vm9569_vm13 = vnez %v9376_v59  ;;  %v8683_v14 = vsub.s32 %v8409_v49, %v4317_v0  ;;  %v4663_v47 = vsel %vm8554_vm15, %v3870_v23, 0.0  ;;  %v5814_v29 = vpop.f32.mrf.mxu1  ;;  %v9578_v0 = vld [vmem:[#allocation52_spill] sm:$0xff] }
 0x214   : > { %v9570_v62 = vsel %vm9569_vm13, %v7954_v53, %v7903_v21  ;;  %v4662_v59 = vsel %vm8565_vm9, %v3869_v35, 0.0  ;;  %v3874_v38 = vadd.f32 %v8558_v37, %v3536_v36  ;;  %v9573_v21 = vld [vmem:[#allocation49_spill] sm:$0xff]  ;;  %vm9574_vm13 = vnez %v9392_v19 }
 0x215   : > { %vm8676_vm3 = vcmp.lt.s32.totalorder %v9570_v62, 16  ;;  %v3534_v53 = vadd.f32 %v3427_v22, %v9573_v21  ;;  %v4774_v31 = vadd.f32 %v4773_v28, %v4739_v18  ;;  %v4697_v27 = vadd.f32 %v4696_v10, %v4662_v59  ;;  %v9581_v28 = vld [vmem:[#allocation60_spill] sm:$0xff]  ;;  %v9655_v62 = vld [vmem:[#allocation27_spill] sm:$0xff] }
 0x216   : > { %v4740_v60 = vmul.f32 %v4662_v59, %v4662_v59  ;;  %v9575_v41 = vsel %vm9574_vm13, %v8009_v63, %v7962_v51  ;;  %v8704_v37 = vadd.s32 264, %v7366_v56  ;;  %v4664_v44 = vsel %vm8593_vm7, %v3871_v58, 0.0  ;;  %3910 = vst [vmem:[%s8337_s29 + $0x70] sm:$0xff] %v3874_v38  ;;  %v3430_v51 = vpop.f32.mrf.mxu1  ;;  %v8711_v63 = vpop.f32.mrf.mxu0  ;;  %v9579_v58 = vld [vmem:[#allocation56_spill] sm:$0xff] }
 0x217   : > { %vm8699_vm15 = vcmp.lt.s32.totalorder %v9575_v41, 16  ;;  %v3872_v23 = vadd.f32 %v8597_v4, %v3534_v53  ;;  %v3537_v6 = vadd.f32 %v5814_v29, %v9578_v0  ;;  %v4295_v54 = vmul.u32 18, %v4294_v30 }
 0x218   : > { %v4741_v19 = vmul.f32 %v4663_v47, %v4663_v47  ;;  %v4698_v35 = vadd.f32 %v4697_v27, %v4663_v47  ;;  %v4775_v50 = vadd.f32 %v4774_v31, %v4740_v60  ;;  %v4349_v36 = vshrl.u32 %v8508_v42, 4  ;;  %v5817_v18 = vpop.f32.mrf.mxu1  ;;  %v8729_v52 = vpop.f32.mrf.mxu0  ;;  %v9595_v27 = vld [vmem:[#allocation68_spill] sm:$0xff] }
 0x219   : > { %3908 = vst [vmem:[%s8337_s29 + $0x60] sm:$0xff] %v3872_v23  ;;  %v4665_v56 = vsel %vm8614_vm4, %v3872_v23, 0.0  ;;  %v3875_v26 = vadd.f32 %v8607_v13, %v3537_v6  ;;  %v3535_v4 = vadd.f32 %v3430_v51, %v9579_v58  ;;  %v4742_v30 = vmul.f32 %v4664_v44, %v4664_v44  ;;  %v9596_v60 = vld [vmem:[#allocation64_spill] sm:$0xff] }
 0x21a   : > { %v4776_v55 = vadd.f32 %v4775_v50, %v4741_v19  ;;  %v4699_v10 = vadd.f32 %v4698_v35, %v4664_v44  ;;  %vm9580_vm9 = vnez %v9386_v1  ;;  %vm9585_vm4 = vnez %v9409_v7  ;;  %v9589_v1 = vld [vmem:[#allocation58_spill] sm:$0xff]  ;;  %v3443_v31 = vpop.f32.mrf.mxu1  ;;  %v8766_v44 = vpop.f32.mrf.mxu0  ;;  %v9600_v35 = vld [vmem:[#allocation59_spill] sm:$0xff] }
 0x21b   : > { %v9582_v22 = vsel %vm9580_vm9, %v7982_v33, %v9581_v28  ;;  %v9586_v13 = vsel %vm9585_vm4, %v8164_v46, %v8106_v16  ;;  %3911 = vst [vmem:[%s8337_s29 + $0x78] sm:$0xff] %v3875_v26  ;;  %v3873_v33 = vadd.f32 %v8630_v45, %v3535_v4  ;;  %v3540_v47 = vadd.f32 %v5817_v18, %v9589_v1  ;;  %v9593_v45 = vld [vmem:[#allocation69_spill] sm:$0xff] }
 0x21c   : > { %vm8725_vm13 = vcmp.lt.s32.totalorder %v9582_v22, 16  ;;  %vm8736_vm7 = vcmp.lt.s32.totalorder %v9586_v13, 16  ;;  %vm9590_vm9 = vcmp.lt.s32.totalorder %v8570_v48, 0  ;;  %v4700_v59 = vadd.f32 %v4699_v10, %v4665_v56  ;;  %v5818_v4 = vpop.f32.mrf.mxu1  ;;  %v9606_v10 = vld [vmem:[#allocation61_spill] sm:$0xff] }
 0x21d   : > { %vm8748_vm11 = vmand %vm9590_vm9, %vm4393_vm10  ;;  %v8753_v16 = vmul.u32.u64.low 3817748708, %v8704_v37  ;;  %v8754_v46 = vmul.u32.u64.high 3817748708, %v8704_v37, %v8753_v16  ;;  %v4743_v21 = vmul.f32 %v4665_v56, %v4665_v56  ;;  %v4777_v53 = vadd.f32 %v4776_v55, %v4742_v30  ;;  %3909 = vst [vmem:[%s8337_s29 + $0x68] sm:$0xff] %v3873_v33  ;;  %v8778_v30 = vpop.f32.mrf.mxu0 }
 0x21e   : > { %vm9594_vm4 = vnez %v9593_v45  ;;  %v8769_v23 = vsub.s32 %v8438_v61, %v4295_v54  ;;  %v4667_v0 = vsel %vm8647_vm5, %v3874_v38, 0.0  ;;  %v4666_v6 = vsel %vm8658_vm6, %v3873_v33, 0.0  ;;  %v9601_v61 = vld [vmem:[#allocation26_spill] sm:$0xff]  ;;  %v3446_v33 = vpop.f32.mrf.mxu1 }
 0x21f   : > { %v9597_v29 = vsel %vm9594_vm4, %v9595_v27, %v9596_v60  ;;  %v3878_v19 = vadd.f32 %v8651_v5, %v3540_v47  ;;  %v3538_v50 = vadd.f32 %v3443_v31, %v9600_v35  ;;  %v4778_v51 = vadd.f32 %v4777_v53, %v4743_v21  ;;  %v8801_v1 = vpop.f32.mrf.mxu0  ;;  %v9611_v16 = vld [vmem:[#allocation62_spill] sm:$0xff]  ;;  %v9614_v60 = vld [vmem:[#allocation71_spill] sm:$0xff] }
 0x220   : > { %vm8762_vm12 = vcmp.lt.s32.totalorder %v9597_v29, 16  ;;  %v4701_v56 = vadd.f32 %v4700_v59, %v4666_v6  ;;  %v4744_v58 = vmul.f32 %v4666_v6, %v4666_v6  ;;  %v9603_v38 = vsel %vm8278_vm14, %v9601_v61, %v9602_v12  ;;  %v5821_v45 = vpop.f32.mrf.mxu1  ;;  %v9612_v27 = vld [vmem:[#allocation14_spill] sm:$0xff]  ;;  %v9624_v12 = vld [vmem:[#allocation13_spill] sm:$0xff] }
 0x221   : > { %vm8785_vm10 = vcmp.lt.s32.totalorder %v9603_v38, 16  ;;  %v4537_v5 = vsel %vm8748_vm11, %v8640_v32, %v8570_v48  ;;  %v4668_v2 = vsel %vm8676_vm3, %v3875_v26, 0.0  ;;  %3914 = vst [vmem:[%s8337_s29 + $0x90] sm:$0xff] %v3878_v19  ;;  %v3876_v55 = vadd.f32 %v8680_v57, %v3538_v50  ;;  %v9615_v29 = vld [vmem:[#allocation70_spill] sm:$0xff]  ;;  %v8826_v49 = vpop.f32.mrf.mxu0  ;;  %v9622_v50 = vld [vmem:[#allocation63_spill] sm:$0xff]  ;;  %v9625_v38 = vld [vmem:[#allocation73_spill] sm:$0xff] }
 0x222   : > { %v3541_v34 = vadd.f32 %v5818_v4, %v9606_v10  ;;  %v8799_v18 = vadd.s32 18, %v8683_v14  ;;  %v4745_v28 = vmul.f32 %v4667_v0, %v4667_v0  ;;  %v4702_v22 = vadd.f32 %v4701_v56, %v4667_v0  ;;  %v3459_v4 = vpop.f32.mrf.mxu1 }
 0x223   : > { %v4779_v13 = vadd.f32 %v4778_v51, %v4744_v58  ;;  %vm9607_vm14 = vcmp.ne.s32.totalorder %v8683_v14, 0  ;;  %vm9608_vm5 = vcmp.lt.s32.totalorder %v8683_v14, 0  ;;  %v4350_v57 = vmul.u32 18, %v4349_v36  ;;  %3912 = vst [vmem:[%s8337_s29 + $0x80] sm:$0xff] %v3876_v55 }
 0x224   : > { %vm8807_vm6 = vmand %vm9608_vm5, %vm9607_vm14  ;;  %v4669_v26 = vsel %vm8699_vm15, %v3876_v55, 0.0  ;;  %v3879_v47 = vadd.f32 %v8692_v40, %v3541_v34  ;;  %v3539_v59 = vadd.f32 %v3446_v33, %v9611_v16  ;;  %vm4394_vm3 = vcmp.ne.s32.totalorder %v8769_v23, 0  ;;  %v8855_v55 = vpop.f32.mrf.mxu0  ;;  %v9650_v33 = vld [vmem:[#allocation21_spill] sm:$0xff] }
 0x225   : > { %v4746_v21 = vmul.f32 %v4668_v2, %v4668_v2  ;;  %v4780_v53 = vadd.f32 %v4779_v13, %v4745_v28  ;;  %v4703_v31 = vadd.f32 %v4702_v22, %v4668_v2  ;;  %vm9613_vm9 = vnez %v9612_v27  ;;  %v9629_v22 = vld [vmem:[#allocation65_spill] sm:$0xff] }
 0x226   : > { %v9616_v0 = vsel %vm9613_vm9, %v9614_v60, %v9615_v29  ;;  %v9619_v40 = vsel %vm8325_vm0, %v8351_v24, %v8227_v25  ;;  %vm4430_vm14 = vcmp.lt.s32.totalorder %v8769_v23, 0  ;;  %3915 = vst [vmem:[%s8337_s29 + $0x98] sm:$0xff] %v3879_v47  ;;  %v3877_v35 = vadd.f32 %v8711_v63, %v3539_v59  ;;  %v8875_v59 = vpop.f32.mrf.mxu0 }
 0x227   : > { %vm8822_vm4 = vcmp.lt.s32.totalorder %v9616_v0, 16  ;;  %vm8833_vm15 = vcmp.lt.s32.totalorder %v9619_v40, 16  ;;  %v3544_v51 = vadd.f32 %v5821_v45, %v9622_v50  ;;  %v4540_v39 = vsel %vm8807_vm6, %v8799_v18, %v8683_v14  ;;  %v9638_v45 = vld [vmem:[#allocation82_spill] sm:$0xff] }
 0x228   : > { %v4327_v56 = vshrl.u32 %v8585_v8, 4  ;;  %v4704_v25 = vadd.f32 %v4703_v31, %v4669_v26  ;;  %v4747_v24 = vmul.f32 %v4669_v26, %v4669_v26  ;;  %v4781_v58 = vadd.f32 %v4780_v53, %v4746_v21  ;;  %3913 = vst [vmem:[%s8337_s29 + $0x88] sm:$0xff] %v3877_v35  ;;  %v9634_v21 = vld [vmem:[#allocation76_spill] sm:$0xff]  ;;  %v9639_v0 = vld [vmem:[#allocation66_spill] sm:$0xff] }
 0x229   : > { %v9626_v2 = vsel %vm8310_vm8, %v9624_v12, %v9625_v38  ;;  %v8858_v10 = vadd.s32 18, %v8769_v23  ;;  %v4671_v8 = vsel %vm8725_vm13, %v3878_v19, 0.0  ;;  %v4670_v34 = vsel %vm8736_vm7, %v3877_v35, 0.0  ;;  %vm8871_vm8 = vmand %vm4430_vm14, %vm4394_vm3  ;;  %v5822_v19 = vpop.f32.mrf.mxu1 }
 0x22a   : > { %vm8851_vm0 = vcmp.lt.s32.totalorder %v9626_v2, 16  ;;  %v3882_v28 = vadd.f32 %v8729_v52, %v3544_v51  ;;  %v3542_v13 = vadd.f32 %v3459_v4, %v9629_v22  ;;  %v4782_v26 = vadd.f32 %v4781_v58, %v4747_v24  ;;  %v9633_v52 = vld [vmem:[#allocation78_spill] sm:$0xff]  ;;  %v8894_v58 = vpop.f32.mrf.mxu0  ;;  %v9643_v22 = vld [vmem:[#allocation17_spill] sm:$0xff] }
 0x22b   : > { %v4705_v16 = vadd.f32 %v4704_v25, %v4670_v34  ;;  %v4748_v42 = vmul.f32 %v4670_v34, %v4670_v34  ;;  %v9635_v53 = vsel %vm8372_vm1, %v9633_v52, %v9634_v21  ;;  %v8887_v27 = vsub.s32 %v9638_v45, %v4350_v57  ;;  %v3462_v24 = vpop.f32.mrf.mxu1  ;;  %v9642_v34 = vld [vmem:[#allocation24_spill] sm:$0xff] }
 0x22c   : > { %vm8882_vm7 = vcmp.lt.s32.totalorder %v9635_v53, 16  ;;  %v4672_v60 = vsel %vm8762_vm12, %v3879_v47, 0.0  ;;  %3918 = vst [vmem:[%s8337_s29 + $0xb0] sm:$0xff] %v3882_v28  ;;  %v3880_v29 = vadd.f32 %v8766_v44, %v3542_v13  ;;  %v3545_v40 = vadd.f32 %v5822_v19, %v9639_v0  ;;  %v9640_v47 = vld [vmem:[#allocation67_spill] sm:$0xff]  ;;  %v8915_v54 = vpop.f32.mrf.mxu0 }
 0x22d   : > { %v4328_v35 = vmul.u32 18, %v4327_v56  ;;  %v4749_v50 = vmul.f32 %v4671_v8, %v4671_v8  ;;  %v4706_v51 = vadd.f32 %v4705_v16, %v4671_v8  ;;  %v4783_v25 = vadd.f32 %v4782_v26, %v4748_v42  ;;  %v5825_v2 = vpop.f32.mrf.mxu1  ;;  %v9654_v42 = vld [vmem:[#allocation5_spill] sm:$0xff]  ;;  %v9658_v0 = vld [vmem:[#allocation79_spill] sm:$0xff] }
 0x22e   : > { %v4538_v57 = vsel %vm8871_vm8, %v8858_v10, %v8769_v23  ;;  %3916 = vst [vmem:[%s8337_s29 + $0xa0] sm:$0xff] %v3880_v29  ;;  %v4673_v41 = vsel %vm8785_vm10, %v3880_v29, 0.0  ;;  %v3883_v44 = vadd.f32 %v8778_v30, %v3545_v40  ;;  %v3543_v56 = vadd.f32 %v3462_v24, %v9640_v47  ;;  %v9647_v30 = vld [vmem:[#allocation25_spill] sm:$0xff]  ;;  %v9656_v29 = vld [vmem:[#allocation80_spill] sm:$0xff]  ;;  %v9659_v40 = vld [vmem:[#allocation19_spill] sm:$0xff] }
 0x22f   : > { %v4360_v4 = vshrl.u32 %v8668_v20, 4  ;;  %v4750_v61 = vmul.f32 %v4672_v60, %v4672_v60  ;;  %v4784_v12 = vadd.f32 %v4783_v25, %v4749_v50  ;;  %v4707_v38 = vadd.f32 %v4706_v51, %v4672_v60  ;;  %v9649_v10 = vld [vmem:[#allocation81_spill] sm:$0xff]  ;;  %v3475_v60 = vpop.f32.mrf.mxu1  ;;  %v9663_v47 = vld [vmem:[#allocation7_spill] sm:$0xff] }
 0x230   : > { %v9644_v13 = vsel %vm8357_vm2, %v9642_v34, %v9643_v22  ;;  %vm9648_vm12 = vnez %v9647_v30  ;;  %vm4399_vm10 = vcmp.ne.s32.totalorder %v8887_v27, 0  ;;  %3919 = vst [vmem:[%s8337_s29 + $0xb8] sm:$0xff] %v3883_v44  ;;  %v3881_v16 = vadd.f32 %v8801_v1, %v3543_v56  ;;  %v8943_v1 = vpop.f32.mrf.mxu0 }
 0x231   : > { %vm8911_vm1 = vcmp.lt.s32.totalorder %v9644_v13, 16  ;;  %v9651_v20 = vsel %vm9648_vm12, %v9649_v10, %v9650_v33  ;;  %v3548_v19 = vadd.f32 %v5825_v2, %v9654_v42  ;;  %vm4435_vm2 = vcmp.lt.s32.totalorder %v8887_v27, 0  ;;  %v5826_v2 = vpop.f32.mrf.mxu1  ;;  %v9669_v13 = vld [vmem:[#allocation9_spill] sm:$0xff] }
 0x232   : > { %vm8922_vm13 = vcmp.lt.s32.totalorder %v9651_v20, 16  ;;  %v8932_v52 = vsub.s32 %v9655_v62, %v4328_v35  ;;  %v4708_v21 = vadd.f32 %v4707_v38, %v4673_v41  ;;  %v4751_v53 = vmul.f32 %v4673_v41, %v4673_v41  ;;  %3917 = vst [vmem:[%s8337_s29 + $0xa8] sm:$0xff] %v3881_v16  ;;  %v5882_v8 = vpop.f32.mrf.mxu0  ;;  %vm8975_vm11 = vmand %vm4435_vm2, %vm4399_vm10 }
 0x233   : > { %v4785_v45 = vadd.f32 %v4784_v12, %v4750_v61  ;;  %vm9657_vm5 = vnez %v9656_v29  ;;  %v4338_v25 = vshrl.u32 %v8754_v46, 4  ;;  %v4675_v35 = vsel %vm8822_vm4, %v3882_v28, 0.0  ;;  %v9666_v28 = vld [vmem:[#allocation8_spill] sm:$0xff]  ;;  %v3478_v32 = vpop.f32.mrf.mxu1 }
 0x234   : > { %v9660_v50 = vsel %vm9657_vm5, %v9658_v0, %v9659_v40  ;;  %v4674_v24 = vsel %vm8833_vm15, %v3881_v16, 0.0  ;;  %v3886_v41 = vadd.f32 %v8826_v49, %v3548_v19  ;;  %v3546_v56 = vadd.f32 %v3475_v60, %v9663_v47  ;;  %v3832_v31 = vpop.f32.mrf.mxu0 }
 0x235   : > { %vm8939_vm3 = vcmp.lt.s32.totalorder %v9660_v50, 16  ;;  %v4786_v61 = vadd.f32 %v4785_v45, %v4751_v53  ;;  %v4709_v12 = vadd.f32 %v4708_v21, %v4674_v24  ;;  %v4752_v38 = vmul.f32 %v4674_v24, %v4674_v24  ;;  %v5829_v16 = vpop.f32.mrf.mxu1  ;;  %v9675_v21 = vld [vmem:[#allocation11_spill] sm:$0xff]  ;;  %v9681_v24 = vld [vmem:[#allocation74_spill] sm:$0xff] }
 0x236   : > { %vm8958_vm9 = vcmp.lt.s32.totalorder %v4537_v5, 16  ;;  %v8963_v36 = vadd.s32 18, %v8887_v27  ;;  %v4676_v49 = vsel %vm8851_vm0, %v3883_v44, 0.0  ;;  %3922 = vst [vmem:[%s8337_s29 + $0xd0] sm:$0xff] %v3886_v41  ;;  %v3884_v6 = vadd.f32 %v8855_v55, %v3546_v56 }
 0x237   : > { %v3549_v34 = vadd.f32 %v5826_v2, %v9666_v28  ;;  %vm4397_vm4 = vcmp.ne.s32.totalorder %v8932_v52, 0  ;;  %v4753_v7 = vmul.f32 %v4675_v35, %v4675_v35  ;;  %v4710_v22 = vadd.f32 %v4709_v12, %v4675_v35  ;;  %v5885_v35 = vpop.f32.mrf.mxu0 }
 0x238   : > { %v4787_v48 = vadd.f32 %v4786_v61, %v4752_v38  ;;  %v4339_v63 = vmul.u32 18, %v4338_v25  ;;  %3920 = vst [vmem:[%s8337_s29 + $0xc0] sm:$0xff] %v3884_v6  ;;  %v4677_v55 = vsel %vm8882_vm7, %v3884_v6, 0.0  ;;  %v3547_v30 = vadd.f32 %v3478_v32, %v9669_v13  ;;  %v9682_v38 = vld [vmem:[#allocation20_spill] sm:$0xff] }
 0x239   : > { %v3887_v44 = vadd.f32 %v8875_v59, %v3549_v34  ;;  %vm4433_vm15 = vcmp.lt.s32.totalorder %v8932_v52, 0  ;;  %v4754_v10 = vmul.f32 %v4676_v49, %v4676_v49  ;;  %v4711_v20 = vadd.f32 %v4710_v22, %v4676_v49 }
 0x23a   : > { %v4788_v33 = vadd.f32 %v4787_v48, %v4753_v7  ;;  %vm8990_vm0 = vcmp.lt.s32.totalorder %v4539_v17, 16  ;;  %vm8994_vm8 = vcmp.lt.s32.totalorder %v4538_v57, 16  ;;  %v4361_v19 = vmul.u32 18, %v4360_v4  ;;  %v3491_v57 = vpop.f32.mrf.mxu1  ;;  %vm9019_vm12 = vmand %vm4433_vm15, %vm4397_vm4  ;;  %v9683_v7 = vld [vmem:[#allocation75_spill] sm:$0xff] }
 0x23b   : > { %3923 = vst [vmem:[%s8337_s29 + $0xd8] sm:$0xff] %v3887_v44  ;;  %v3885_v62 = vadd.f32 %v8894_v58, %v3547_v30  ;;  %v3552_v53 = vadd.f32 %v5829_v16, %v9675_v21  ;;  %v4543_v3 = vsel %vm8975_vm11, %v8963_v36, %v8887_v27  ;;  %v4505_v9 = vadd.s32 18, %v8932_v52 }
 0x23c   : > { %v4712_v15 = vadd.f32 %v4711_v20, %v4677_v55  ;;  %v4755_v17 = vmul.f32 %v4677_v55, %v4677_v55  ;;  %v4789_v45 = vadd.f32 %v4788_v33, %v4754_v10  ;;  %vm9011_vm7 = vcmp.lt.s32.totalorder %v4540_v39, 16  ;;  %v9680_v39 = vld [vmem:[#allocation10_spill] sm:$0xff]  ;;  %v5830_v25 = vpop.f32.mrf.mxu1  ;;  %v9686_v33 = vld [vmem:[#allocation77_spill] sm:$0xff] }
 0x23d   : > { %v9024_v60 = vsub.s32 %v8704_v37, %v4339_v63  ;;  %v4679_v11 = vsel %vm8911_vm1, %v3886_v41, 0.0  ;;  %3921 = vst [vmem:[%s8337_s29 + $0xc8] sm:$0xff] %v3885_v62  ;;  %v4678_v14 = vsel %vm8922_vm13, %v3885_v62, 0.0  ;;  %v3890_v18 = vadd.f32 %v8915_v54, %v3552_v53 }
 0x23e   : > { %v3550_v29 = vadd.f32 %v3491_v57, %v9680_v39  ;;  %v4790_v0 = vadd.f32 %v4789_v45, %v4755_v17  ;;  %v4713_v40 = vadd.f32 %v4712_v15, %v4678_v14  ;;  %v4756_v50 = vmul.f32 %v4678_v14, %v4678_v14  ;;  %v3494_v12 = vpop.f32.mrf.mxu1  ;;  %v9692_v39 = vld [vmem:[#allocation12_spill] sm:$0xff] }
 0x23f   : > { %v9034_v37 = vsub.s32 %v8628_v43, %v4361_v19  ;;  %v4680_v23 = vsel %vm8939_vm3, %v3887_v44, 0.0  ;;  %3926 = vst [vmem:[%s8337_s29 + $0xf0] sm:$0xff] %v3890_v18  ;;  %v3553_v41 = vadd.f32 %v5830_v25, %v9681_v24  ;;  %v4541_v54 = vsel %vm9019_vm12, %v4505_v9, %v8932_v52  ;;  %v3845_v52 = vpop.f32.mrf.mxu0  ;;  %v9689_v9 = vld [vmem:[#allocation15_spill] sm:$0xff] }
 0x240   : > { %v3888_v26 = vadd.f32 %v8943_v1, %v3550_v29  ;;  %v4757_v47 = vmul.f32 %v4679_v11, %v4679_v11  ;;  %v4714_v56 = vadd.f32 %v4713_v40, %v4679_v11  ;;  %v4791_v61 = vadd.f32 %v4790_v0, %v4756_v50  ;;  %v5833_v28 = vpop.f32.mrf.mxu1 }
 0x241   : > { %vm4398_vm6 = vcmp.ne.s32.totalorder %v9024_v60, 0  ;;  %v3891_v51 = vadd.f32 %v5882_v8, %v3553_v41  ;;  %v3551_v1 = vadd.f32 %v3494_v12, %v9682_v38  ;;  %vm4434_vm1 = vcmp.lt.s32.totalorder %v9024_v60, 0  ;;  %v5886_v62 = vpop.f32.mrf.mxu0 }
 0x242   : > { %3924 = vst [vmem:[%s8337_s29 + $0xe0] sm:$0xff] %v3888_v26  ;;  %v4681_v43 = vsel %vm8958_vm9, %v3888_v26, 0.0  ;;  %v4758_v2 = vmul.f32 %v4680_v23, %v4680_v23  ;;  %v4792_v49 = vadd.f32 %v4791_v61, %v4757_v47  ;;  %v4715_v6 = vadd.f32 %v4714_v56, %v4680_v23  ;;  %v3507_v63 = vpop.f32.mrf.mxu1  ;;  %vm9060_vm2 = vmand %vm4434_vm1, %vm4398_vm6 }
 0x243   : > { %vm4400_vm13 = vcmp.ne.s32.totalorder %v9034_v37, 0  ;;  %3927 = vst [vmem:[%s8337_s29 + $0xf8] sm:$0xff] %v3891_v51  ;;  %v3889_v34 = vadd.f32 %v3832_v31, %v3551_v1  ;;  %v3556_v22 = vadd.f32 %v5833_v28, %v9683_v7  ;;  %vm4436_vm10 = vcmp.lt.s32.totalorder %v9034_v37, 0  ;;  %v3848_v50 = vpop.f32.mrf.mxu0 }
 0x244   : > { %v4506_v8 = vadd.s32 18, %v9024_v60  ;;  %v4716_v46 = vadd.f32 %v4715_v6, %v4681_v43  ;;  %v4759_v48 = vmul.f32 %v4681_v43, %v4681_v43  ;;  %v4793_v32 = vadd.f32 %v4792_v49, %v4758_v2  ;;  %v5834_v21 = vpop.f32.mrf.mxu1  ;;  %vm9074_vm3 = vmand %vm4436_vm10, %vm4400_vm13 }
 0x245   : > { %v4508_v55 = vadd.s32 18, %v9034_v37  ;;  %v4683_v13 = vsel %vm8990_vm0, %v3890_v18, 0.0  ;;  %3925 = vst [vmem:[%s8337_s29 + $0xe8] sm:$0xff] %v3889_v34  ;;  %v4682_v30 = vsel %vm8994_vm8, %v3889_v34, 0.0  ;;  %v3894_v10 = vadd.f32 %v5885_v35, %v3556_v22 }
 0x246   : > { %v3554_v20 = vadd.f32 %v3507_v63, %v9686_v33  ;;  %v4794_v16 = vadd.f32 %v4793_v32, %v4759_v48  ;;  %v4717_v31 = vadd.f32 %v4716_v46, %v4682_v30  ;;  %v4760_v19 = vmul.f32 %v4682_v30, %v4682_v30  ;;  %v3510_v11 = vpop.f32.mrf.mxu1 }
 0x247   : > { %vm4577_vm5 = vcmp.lt.s32.totalorder %v4541_v54, 16  ;;  %v4684_v59 = vsel %vm9011_vm7, %v3891_v51, 0.0  ;;  %3930 = vst [vmem:[%s8337_s29 + $0x110] sm:$0xff] %v3894_v10  ;;  %v3557_v15 = vadd.f32 %v5834_v21, %v9689_v9  ;;  %v4542_v17 = vsel %vm9060_vm2, %v4506_v8, %v9024_v60 }
 0x248   : > { %v3892_v53 = vadd.f32 %v3845_v52, %v3554_v20  ;;  %v4761_v45 = vmul.f32 %v4683_v13, %v4683_v13  ;;  %v4718_v57 = vadd.f32 %v4717_v31, %v4683_v13  ;;  %v4795_v4 = vadd.f32 %v4794_v16, %v4760_v19 }
 0x249   : > { %vm9090_vm9 = vcmp.lt.s32.totalorder %v4543_v3, 16  ;;  %v3895_v18 = vadd.f32 %v5886_v62, %v3557_v15  ;;  %v4544_v60 = vsel %vm9074_vm3, %v4508_v55, %v9034_v37  ;;  %v3555_v29 = vadd.f32 %v3510_v11, %v9692_v39 }
 0x24a   : > { %3928 = vst [vmem:[%s8337_s29 + $0x100] sm:$0xff] %v3892_v53  ;;  %v4685_v14 = vsel %vm4577_vm5, %v3892_v53, 0.0  ;;  %v4762_v0 = vmul.f32 %v4684_v59, %v4684_v59  ;;  %v4796_v5 = vadd.f32 %v4795_v4, %v4761_v45  ;;  %v4719_v40 = vadd.f32 %v4718_v57, %v4684_v59 }
 0x24b   : > { %vm4578_vm4 = vcmp.lt.s32.totalorder %v4542_v17, 16  ;;  %3931 = vst [vmem:[%s8337_s29 + $0x118] sm:$0xff] %v3895_v18  ;;  %v3893_v27 = vadd.f32 %v3848_v50, %v3555_v29  ;;  %v4763_v3 = vmul.f32 %v4685_v14, %v4685_v14  ;;  %vm4580_vm11 = vcmp.lt.s32.totalorder %v4544_v60, 16 }
 0x24c   : > { %v4720_v36 = vadd.f32 %v4719_v40, %v4685_v14  ;;  %v4797_v25 = vadd.f32 %v4796_v5, %v4762_v0  ;;  %v4687_v35 = vsel %vm9090_vm9, %v3894_v10, 0.0  ;;  %v4688_v41 = vsel %vm4580_vm11, %v3895_v18, 0.0 }
 0x24d   : > { %3929 = vst [vmem:[%s8337_s29 + $0x108] sm:$0xff] %v3893_v27  ;;  %v4686_v23 = vsel %vm4578_vm4, %v3893_v27, 0.0  ;;  %v4765_v54 = vmul.f32 %v4687_v35, %v4687_v35  ;;  %v4766_v61 = vmul.f32 %v4688_v41, %v4688_v41 }
 0x24e   : > { %v4798_v26 = vadd.f32 %v4797_v25, %v4763_v3  ;;  %v4721_v37 = vadd.f32 %v4720_v36, %v4686_v23  ;;  %v4764_v24 = vmul.f32 %v4686_v23, %v4686_v23 }
 0x250   : > { %v4722_v47 = vadd.f32 %v4721_v37, %v4687_v35  ;;  %v4799_v56 = vadd.f32 %v4798_v26, %v4764_v24 }
 0x252   : > { %v4723_v12 = vadd.f32 %v4722_v47, %v4688_v41  ;;  %v4800_v43 = vadd.f32 %v4799_v56, %v4765_v54 }
 0x254   : > { %v4724_v51 = vrot.slane %v4723_v12, 4  ;;  %v4801_v38 = vadd.f32 %v4800_v43, %v4766_v61 }
 0x256   : > { %v4725_v1 = vadd.f32 %v4724_v51, %v4723_v12  ;;  %v4802_v2 = vrot.slane %v4801_v38, 4 }
 0x258   : > { %v4726_v49 = vrot.slane %v4725_v1, 2  ;;  %v4803_v6 = vadd.f32 %v4802_v2, %v4801_v38 }
 0x25a   : > { %v4727_v52 = vadd.f32 %v4726_v49, %v4725_v1  ;;  %v4804_v28 = vrot.slane %v4803_v6, 2 }
 0x25c   : > { %v4728_v34 = vrot.slane %v4727_v52, 1  ;;  %v4805_v7 = vadd.f32 %v4804_v28, %v4803_v6 }
 0x25e   : > { %v4729_v22 = vadd.f32 %v4728_v34, %v4727_v52  ;;  %v4806_v8 = vrot.slane %v4805_v7, 1 }
 0x260   : > { %4730 = vst [vmem:[%s211_s6] sm:$0x1] %v4729_v22  ;;  %v4807_v46 = vadd.f32 %v4806_v8, %v4805_v7 }
 0x262   : > { %4808 = vst [vmem:[%s214_s9] sm:$0x1] %v4807_v46 }
 0x263 PF: > { %s15_s15 = sadd.s32 1, %s6125_s15  }
 0x264   : > { %p12_p4 = scmp.ge.s32.totalorder %s15_s15, 4  }
 0x266   :  { %14 = sbr.rel (!%p12_p4) target bundleno = 1 (0x1), region = 90 }

// kernel: residual_block_forward.7
= control target key start
LH: loop header
LB: loop body
LE: loop exit
PB: predicated region body
PF: predicated region fallthrough
CT: control target
= control target key end

     0   :  { %s821_s15 = smov 0   ;;  %s1173_s0 = inlined_call_operand.vmem [shape: f32[2,288,128], index: 0, kind: input, shape index: {}]   ;;  %s1174_s1 = inlined_call_operand.vmem [shape: f32[1,128], index: 1, kind: input, shape index: {}]   ;;  %s1175_s2 = inlined_call_operand.vmem [shape: f32[1,128], index: 2, kind: input, shape index: {}]   ;;  %s1176_s3 = inlined_call_operand.vmem [shape: f32[2,288,128], index: 3, kind: input, shape index: {}]   ;;  %s1177_s4 = inlined_call_operand.vmem [shape: f32[2,288,128], index: 4, kind: output, shape index: {}]  }
   0x1 LB: > { %s695_s16 = sadd.s32 4294967295, %s794_s15   ;;  %p699_p0 = scmp.ge.s32.totalorder %s794_s15, 1  ;;  %s794_s15 = sphi %s821_s15, %s14_s15  }
   0x2   : > { %p172_p1 = scmp.lt.s32.totalorder %s794_s15, 3 }
   0x4   : > { %p173_p2 = pnand %p699_p0, %p172_p1 }
   0x5   : > { %p203_p3 = scmp.lt.s32.totalorder (!%p173_p2), %s695_s16, 1 }
   0x6   : > { %176 = sbr.rel (%p173_p2) target bundleno = 99 (0x63), region = 36 }
   0xb   : > { %s1179_s16 = smov (!%p203_p3, %s695_s16), 1  ;;  %v834_v0 = vld [vmem:[%s1174_s1] ss:$0 sm:$0xff] }
   0xc   : > { %s829_s17 = smul.u32 288, %s1179_s16  ;;  %v846_v2 = vld [vmem:[%s1175_s2] ss:$0 sm:$0xff] }
   0xe   : > { %s840_s22 = scalar_lea.vmem %s1173_s0, %s829_s17  ;;  %s917_s27 = scalar_lea.vmem %s1176_s3, %s829_s17 }
   0xf   : > { %v218_v1 = vld [vmem:[%s840_s22] sm:$0xff]  ;;  %v219_v3 = vld [vmem:[%s840_s22 + $0x8] sm:$0xff]  ;;  %v220_v6 = vld [vmem:[%s840_s22 + $0x10] sm:$0xff]  ;;  %s948_s30 = scalar_lea.vmem %s1177_s4, %s829_s17 }
  0x10   : > { %v261_v4 = vmul.f32 %v834_v0, %v218_v1  ;;  %v262_v5 = vmul.f32 %v834_v0, %v219_v3  ;;  %v263_v7 = vmul.f32 %v834_v0, %v220_v6  ;;  %v221_v8 = vld [vmem:[%s840_s22 + $0x18] sm:$0xff]  ;;  %v222_v9 = vld [vmem:[%s840_s22 + $0x20] sm:$0xff]  ;;  %v223_v14 = vld [vmem:[%s840_s22 + $0x28] sm:$0xff] }
  0x11   : > { %v264_v12 = vmul.f32 %v834_v0, %v221_v8  ;;  %v265_v13 = vmul.f32 %v834_v0, %v222_v9  ;;  %v266_v16 = vmul.f32 %v834_v0, %v223_v14  ;;  %v224_v17 = vld [vmem:[%s840_s22 + $0x30] sm:$0xff]  ;;  %v225_v18 = vld [vmem:[%s840_s22 + $0x38] sm:$0xff]  ;;  %v226_v28 = vld [vmem:[%s840_s22 + $0x40] sm:$0xff] }
  0x12   : > { %v304_v10 = vadd.f32 %v846_v2, %v261_v4  ;;  %v305_v11 = vadd.f32 %v846_v2, %v262_v5  ;;  %v306_v15 = vadd.f32 %v846_v2, %v263_v7  ;;  %v267_v26 = vmul.f32 %v834_v0, %v224_v17  ;;  %v227_v31 = vld [vmem:[%s840_s22 + $0x48] sm:$0xff]  ;;  %v228_v32 = vld [vmem:[%s840_s22 + $0x50] sm:$0xff]  ;;  %v229_v33 = vld [vmem:[%s840_s22 + $0x58] sm:$0xff] }
  0x13   : > { %v307_v23 = vadd.f32 %v846_v2, %v264_v12  ;;  %v308_v24 = vadd.f32 %v846_v2, %v265_v13  ;;  %v309_v25 = vadd.f32 %v846_v2, %v266_v16  ;;  %v268_v27 = vmul.f32 %v834_v0, %v225_v18  ;;  %v230_v43 = vld [vmem:[%s840_s22 + $0x60] sm:$0xff]  ;;  %v231_v44 = vld [vmem:[%s840_s22 + $0x68] sm:$0xff]  ;;  %v232_v57 = vld [vmem:[%s840_s22 + $0x70] sm:$0xff] }
  0x14   : > { %v376_v19 = vmul.f32 0.70710677, %v304_v10  ;;  %v377_v20 = vmul.f32 0.70710677, %v305_v11  ;;  %v864_v21 = vmul.f32 0.5, %v304_v10  ;;  %v872_v29 = vmul.f32 0.5, %v305_v11 }
  0x15   : > { %v378_v22 = vmul.f32 0.70710677, %v306_v15  ;;  %v379_v30 = vmul.f32 0.70710677, %v307_v23  ;;  %v877_v34 = vmul.f32 0.5, %v306_v15  ;;  %v310_v37 = vadd.f32 %v846_v2, %v267_v26  ;;  %v233_v58 = vld [vmem:[%s840_s22 + $0x78] sm:$0xff] }
  0x16   : > { %716 = verf.f32 %v376_v19  ;;  %v380_v35 = vmul.f32 0.70710677, %v308_v24  ;;  %v381_v36 = vmul.f32 0.70710677, %v309_v25  ;;  %v311_v38 = vadd.f32 %v846_v2, %v268_v27  ;;  %v234_v59 = vld [vmem:[%s840_s22 + $0x80] sm:$0xff]  ;;  %v235_v15 = vld [vmem:[%s840_s22 + $0x88] sm:$0xff] }
  0x17   : > { %718 = verf.f32 %v377_v20  ;;  %v269_v39 = vmul.f32 %v834_v0, %v226_v28  ;;  %v270_v40 = vmul.f32 %v834_v0, %v227_v31  ;;  %v271_v41 = vmul.f32 %v834_v0, %v228_v32  ;;  %v521_v28 = vld [vmem:[%s917_s27 + $0x8] sm:$0xff] }
  0x18   : > { %720 = verf.f32 %v378_v22  ;;  %v272_v42 = vmul.f32 %v834_v0, %v229_v33  ;;  %v887_v45 = vmul.f32 0.5, %v307_v23  ;;  %v889_v46 = vmul.f32 0.5, %v308_v24  ;;  %v520_v22 = vld [vmem:[%s917_s27] sm:$0xff] }
  0x19   : > { %722 = verf.f32 %v379_v30  ;;  %v382_v47 = vmul.f32 0.70710677, %v310_v37  ;;  %v383_v48 = vmul.f32 0.70710677, %v311_v38  ;;  %v312_v49 = vadd.f32 %v846_v2, %v269_v39 }
  0x1a   : > { %724 = verf.f32 %v380_v35  ;;  %v313_v50 = vadd.f32 %v846_v2, %v270_v40  ;;  %v314_v51 = vadd.f32 %v846_v2, %v271_v41  ;;  %v315_v52 = vadd.f32 %v846_v2, %v272_v42  ;;  %v523_v42 = vld [vmem:[%s917_s27 + $0x18] sm:$0xff] }
  0x1b   : > { %726 = verf.f32 %v381_v36  ;;  %v273_v53 = vmul.f32 %v834_v0, %v230_v43  ;;  %v274_v54 = vmul.f32 %v834_v0, %v231_v44  ;;  %v897_v55 = vmul.f32 0.5, %v309_v25  ;;  %v522_v36 = vld [vmem:[%s917_s27 + $0x10] sm:$0xff] }
  0x1c   : > { %728 = verf.f32 %v382_v47  ;;  %v384_v56 = vmul.f32 0.70710677, %v312_v49  ;;  %v902_v60 = vmul.f32 0.5, %v310_v37  ;;  %v904_v61 = vmul.f32 0.5, %v311_v38  ;;  %v236_v38 = vld [vmem:[%s840_s22 + $0x90] sm:$0xff]  ;;  %v524_v47 = vld [vmem:[%s917_s27 + $0x20] sm:$0xff] }
  0x1d   : > { %730 = verf.f32 %v383_v48  ;;  %v385_v62 = vmul.f32 0.70710677, %v313_v50  ;;  %v386_v63 = vmul.f32 0.70710677, %v314_v51  ;;  %v387_v1 = vmul.f32 0.70710677, %v315_v52 }
  0x1e   : > { %732 = verf.f32 %v384_v56  ;;  %v316_v3 = vadd.f32 %v846_v2, %v273_v53  ;;  %v908_v4 = vadd.f32 %v846_v2, %v274_v54  ;;  %v275_v5 = vmul.f32 %v834_v0, %v232_v57 }
  0x1f   : > { %734 = verf.f32 %v385_v62  ;;  %v276_v6 = vmul.f32 %v834_v0, %v233_v58  ;;  %v277_v7 = vmul.f32 %v834_v0, %v234_v59  ;;  %v919_v8 = vmul.f32 0.5, %v312_v49  ;;  %v238_v62 = vld [vmem:[%s840_s22 + $0xa0] sm:$0xff] }
  0x20   : > { %v921_v9 = vmul.f32 0.5, %v313_v50  ;;  %736 = verf.f32 %v386_v63  ;;  %v388_v10 = vmul.f32 0.70710677, %v316_v3  ;;  %v389_v12 = vmul.f32 0.70710677, %v908_v4  ;;  %v526_v63 = vld [vmem:[%s917_s27 + $0x30] sm:$0xff] }
  0x21   : > { %738 = verf.f32 %v387_v1  ;;  %v925_v13 = vadd.f32 %v846_v2, %v275_v5  ;;  %v928_v14 = vadd.f32 %v846_v2, %v276_v6  ;;  %v931_v18 = vmul.f32 0.5, %v314_v51 }
  0x22   : > { %v933_v19 = vmul.f32 0.5, %v315_v52  ;;  %740 = verf.f32 %v388_v10  ;;  %v938_v25 = vadd.f32 %v846_v2, %v277_v7  ;;  %v278_v32 = vmul.f32 %v834_v0, %v235_v15  ;;  %v525_v52 = vld [vmem:[%s917_s27 + $0x28] sm:$0xff] }
  0x23   : > { %v717_v11 = vpop.eup %716  ;;  %742 = verf.f32 %v389_v12  ;;  %v390_v24 = vmul.f32 0.70710677, %v925_v13  ;;  %v391_v31 = vmul.f32 0.70710677, %v928_v14  ;;  %v279_v54 = vmul.f32 %v834_v0, %v236_v38 }
  0x24   : > { %v719_v16 = vpop.eup %718  ;;  %v448_v17 = vadd.f32 1.0, %v717_v11  ;;  %v392_v49 = vmul.f32 0.70710677, %v938_v25  ;;  %v964_v53 = vadd.f32 %v846_v2, %v278_v32 }
  0x25   : > { %v721_v20 = vpop.eup %720  ;;  %v449_v23 = vadd.f32 1.0, %v719_v16  ;;  %744 = verf.f32 %v390_v24  ;;  %v979_v11 = vadd.f32 %v846_v2, %v279_v54  ;;  %v354_v24 = vmul.f32 0.5, %v925_v13 }
  0x26   : > { %v723_v26 = vpop.eup %722  ;;  %v484_v27 = vmul.f32 %v448_v17, %v864_v21  ;;  %v450_v30 = vadd.f32 1.0, %v721_v20  ;;  %v952_v21 = vmul.f32 0.5, %v316_v3  ;;  %746 = verf.f32 %v391_v31 }
  0x27   : > { %v725_v33 = vpop.eup %724  ;;  %v485_v35 = vmul.f32 %v449_v23, %v872_v29  ;;  %v451_v37 = vadd.f32 1.0, %v723_v26  ;;  %748 = verf.f32 %v392_v49  ;;  %v353_v3 = vmul.f32 0.5, %v908_v4 }
  0x28   : > { %v727_v39 = vpop.eup %726  ;;  %v556_v40 = vadd.f32 %v520_v22, %v484_v27  ;;  %v486_v41 = vmul.f32 %v450_v30, %v877_v34  ;;  %v452_v43 = vadd.f32 1.0, %v725_v33  ;;  %v393_v5 = vmul.f32 0.70710677, %v964_v53  ;;  %v528_v22 = vld [vmem:[%s917_s27 + $0x40] sm:$0xff]  ;;  %v529_v30 = vld [vmem:[%s917_s27 + $0x48] sm:$0xff] }
  0x29   : > { %v557_v44 = vadd.f32 %v521_v28, %v485_v35  ;;  %v487_v29 = vmul.f32 %v451_v37, %v887_v45  ;;  %v453_v48 = vadd.f32 1.0, %v727_v39  ;;  %v729_v50 = vpop.eup %728  ;;  %v237_v45 = vld [vmem:[%s840_s22 + $0x98] sm:$0xff]  ;;  %v281_v17 = vmul.f32 %v834_v0, %v238_v62  ;;  %v534_v62 = vld [vmem:[%s917_s27 + $0x70] sm:$0xff] }
  0x2a   : > { %592 = vst [vmem:[%s948_s30] sm:$0xff] %v556_v40  ;;  %v558_v51 = vadd.f32 %v522_v36, %v486_v41  ;;  %v488_v34 = vmul.f32 %v452_v43, %v889_v46  ;;  %v731_v56 = vpop.eup %730  ;;  %v454_v59 = vadd.f32 1.0, %v729_v50  ;;  %v280_v12 = vmul.f32 %v834_v0, %v237_v45  ;;  %v530_v36 = vld [vmem:[%s917_s27 + $0x50] sm:$0xff]  ;;  %v531_v40 = vld [vmem:[%s917_s27 + $0x58] sm:$0xff] }
  0x2b   : > { %593 = vst [vmem:[%s948_s30 + $0x8] sm:$0xff] %v557_v44  ;;  %v559_v57 = vadd.f32 %v523_v42, %v487_v29  ;;  %v489_v58 = vmul.f32 %v453_v48, %v897_v55  ;;  %v455_v1 = vadd.f32 1.0, %v731_v56  ;;  %v733_v6 = vpop.eup %732  ;;  %v527_v55 = vld [vmem:[%s917_s27 + $0x38] sm:$0xff]  ;;  %750 = verf.f32 %v393_v5  ;;  %v532_v44 = vld [vmem:[%s917_s27 + $0x60] sm:$0xff]  ;;  %v239_v48 = vld [vmem:[%s840_s22 + $0xa8] sm:$0xff] }
  0x2c   : > { %594 = vst [vmem:[%s948_s30 + $0x10] sm:$0xff] %v558_v51  ;;  %v560_v46 = vadd.f32 %v524_v47, %v488_v34  ;;  %v490_v10 = vmul.f32 %v454_v59, %v902_v60  ;;  %v735_v15 = vpop.eup %734  ;;  %v456_v16 = vadd.f32 1.0, %v733_v6  ;;  %v394_v26 = vmul.f32 0.70710677, %v979_v11  ;;  %v533_v51 = vld [vmem:[%s917_s27 + $0x68] sm:$0xff]  ;;  %v535_v5 = vld [vmem:[%s917_s27 + $0x78] sm:$0xff] }
  0x2d   : > { %595 = vst [vmem:[%s948_s30 + $0x18] sm:$0xff] %v559_v57  ;;  %v561_v7 = vadd.f32 %v525_v52, %v489_v58  ;;  %v491_v4 = vmul.f32 %v455_v1, %v904_v61  ;;  %v737_v20 = vpop.eup %736  ;;  %v457_v23 = vadd.f32 1.0, %v735_v15  ;;  %v992_v32 = vadd.f32 %v846_v2, %v280_v12  ;;  %v241_v52 = vld [vmem:[%s840_s22 + $0xb8] sm:$0xff]  ;;  %v242_v58 = vld [vmem:[%s840_s22 + $0xc0] sm:$0xff]  ;;  %v243_v59 = vld [vmem:[%s840_s22 + $0xc8] sm:$0xff] }
  0x2e   : > { %596 = vst [vmem:[%s948_s30 + $0x20] sm:$0xff] %v560_v46  ;;  %v562_v60 = vadd.f32 %v526_v63, %v490_v10  ;;  %v739_v27 = vpop.eup %738  ;;  %v492_v61 = vmul.f32 %v456_v16, %v919_v8  ;;  %v458_v31 = vadd.f32 1.0, %v737_v20  ;;  %752 = verf.f32 %v394_v26 }
  0x2f   : > { %597 = vst [vmem:[%s948_s30 + $0x28] sm:$0xff] %v561_v7  ;;  %v563_v28 = vadd.f32 %v527_v55, %v491_v4  ;;  %v741_v33 = vpop.eup %740  ;;  %v493_v35 = vmul.f32 %v457_v23, %v921_v9  ;;  %v459_v13 = vadd.f32 1.0, %v739_v27  ;;  %v998_v37 = vadd.f32 %v846_v2, %v281_v17 }
  0x30   : > { %598 = vst [vmem:[%s948_s30 + $0x30] sm:$0xff] %v562_v60  ;;  %v743_v38 = vpop.eup %742  ;;  %v564_v8 = vadd.f32 %v528_v22, %v492_v61  ;;  %v494_v39 = vmul.f32 %v458_v31, %v931_v18  ;;  %v460_v41 = vadd.f32 1.0, %v741_v33  ;;  %v355_v9 = vmul.f32 0.5, %v928_v14  ;;  %v536_v22 = vld [vmem:[%s917_s27 + $0x80] sm:$0xff]  ;;  %v245_v31 = vld [vmem:[%s840_s22 + $0xd8] sm:$0xff] }
  0x31   : > { %599 = vst [vmem:[%s948_s30 + $0x38] sm:$0xff] %v563_v28  ;;  %v565_v42 = vadd.f32 %v529_v30, %v493_v35  ;;  %v495_v43 = vmul.f32 %v459_v13, %v933_v19  ;;  %v461_v29 = vadd.f32 1.0, %v743_v38  ;;  %v395_v47 = vmul.f32 0.70710677, %v992_v32  ;;  %v240_v19 = vld [vmem:[%s840_s22 + $0xb0] sm:$0xff]  ;;  %v537_v13 = vld [vmem:[%s917_s27 + $0x88] sm:$0xff] }
  0x32   : > { %v745_v49 = vpop.eup %744  ;;  %600 = vst [vmem:[%s948_s30 + $0x40] sm:$0xff] %v564_v8  ;;  %v566_v18 = vadd.f32 %v530_v36, %v494_v39  ;;  %v496_v50 = vmul.f32 %v460_v41, %v952_v21  ;;  %v356_v14 = vmul.f32 0.5, %v938_v25  ;;  %v396_v34 = vmul.f32 0.70710677, %v998_v37  ;;  %v244_v30 = vld [vmem:[%s840_s22 + $0xd0] sm:$0xff]  ;;  %v246_v39 = vld [vmem:[%s840_s22 + $0xe0] sm:$0xff] }
  0x33   : > { %v747_v54 = vpop.eup %746  ;;  %601 = vst [vmem:[%s948_s30 + $0x48] sm:$0xff] %v565_v42  ;;  %v567_v45 = vadd.f32 %v531_v40, %v495_v43  ;;  %v497_v56 = vmul.f32 %v461_v29, %v353_v3  ;;  %v462_v57 = vadd.f32 1.0, %v745_v49  ;;  %754 = verf.f32 %v395_v47  ;;  %v247_v42 = vld [vmem:[%s840_s22 + $0xe8] sm:$0xff]  ;;  %v248_v43 = vld [vmem:[%s840_s22 + $0xf0] sm:$0xff] }
  0x34   : > { %602 = vst [vmem:[%s948_s30 + $0x50] sm:$0xff] %v566_v18  ;;  %v568_v21 = vadd.f32 %v532_v44, %v496_v50  ;;  %v463_v25 = vadd.f32 1.0, %v747_v54  ;;  %756 = verf.f32 %v396_v34  ;;  %v282_v46 = vmul.f32 %v834_v0, %v239_v48  ;;  %v749_v7 = vpop.eup %748  ;;  %v538_v49 = vld [vmem:[%s917_s27 + $0x90] sm:$0xff] }
  0x35   : > { %603 = vst [vmem:[%s948_s30 + $0x58] sm:$0xff] %v567_v45  ;;  %v569_v63 = vadd.f32 %v533_v51, %v497_v56  ;;  %v498_v1 = vmul.f32 %v462_v57, %v354_v24  ;;  %v283_v3 = vmul.f32 %v834_v0, %v240_v19  ;;  %v284_v6 = vmul.f32 %v834_v0, %v241_v52  ;;  %v249_v19 = vld [vmem:[%s840_s22 + $0xf8] sm:$0xff] }
  0x36   : > { %604 = vst [vmem:[%s948_s30 + $0x60] sm:$0xff] %v568_v21  ;;  %v499_v10 = vmul.f32 %v463_v25, %v355_v9  ;;  %v1027_v55 = vadd.f32 %v846_v2, %v282_v46  ;;  %v285_v12 = vmul.f32 %v834_v0, %v242_v58  ;;  %v286_v15 = vmul.f32 %v834_v0, %v243_v59  ;;  %v539_v25 = vld [vmem:[%s917_s27 + $0x98] sm:$0xff] }
  0x37   : > { %605 = vst [vmem:[%s948_s30 + $0x68] sm:$0xff] %v569_v63  ;;  %v570_v4 = vadd.f32 %v534_v62, %v498_v1  ;;  %v464_v16 = vadd.f32 1.0, %v749_v7  ;;  %v1033_v17 = vadd.f32 %v846_v2, %v283_v3  ;;  %v1036_v20 = vadd.f32 %v846_v2, %v284_v6  ;;  %v250_v6 = vld [vmem:[%s840_s22 + $0x100] sm:$0xff]  ;;  %v251_v7 = vld [vmem:[%s840_s22 + $0x108] sm:$0xff] }
  0x38   : > { %v571_v60 = vadd.f32 %v535_v5, %v499_v10  ;;  %v357_v23 = vmul.f32 0.5, %v964_v53  ;;  %v397_v24 = vmul.f32 0.70710677, %v1027_v55  ;;  %v1042_v26 = vadd.f32 %v846_v2, %v285_v12  ;;  %v751_v27 = vpop.eup %750  ;;  %v540_v5 = vld [vmem:[%s917_s27 + $0xa0] sm:$0xff] }
  0x39   : > { %606 = vst [vmem:[%s948_s30 + $0x70] sm:$0xff] %v570_v4  ;;  %v500_v28 = vmul.f32 %v464_v16, %v356_v14  ;;  %v398_v61 = vmul.f32 0.70710677, %v1033_v17  ;;  %v465_v33 = vadd.f32 1.0, %v751_v27  ;;  %v358_v35 = vmul.f32 0.5, %v979_v11  ;;  %v252_v4 = vld [vmem:[%s840_s22 + $0x110] sm:$0xff] }
  0x3a   : > { %607 = vst [vmem:[%s948_s30 + $0x78] sm:$0xff] %v571_v60  ;;  %758 = verf.f32 %v397_v24  ;;  %v399_v53 = vmul.f32 0.70710677, %v1036_v20  ;;  %v400_v38 = vmul.f32 0.70710677, %v1042_v26  ;;  %v1054_v8 = vadd.f32 %v846_v2, %v286_v15 }
  0x3b   : > { %v572_v36 = vadd.f32 %v536_v22, %v500_v28  ;;  %760 = verf.f32 %v398_v61  ;;  %v753_v40 = vpop.eup %752  ;;  %v501_v41 = vmul.f32 %v465_v33, %v357_v23  ;;  %v287_v9 = vmul.f32 %v834_v0, %v244_v30  ;;  %v253_v28 = vld [vmem:[%s840_s22 + $0x118] sm:$0xff] }
  0x3c   : > { %762 = verf.f32 %v399_v53  ;;  %v288_v11 = vmul.f32 %v834_v0, %v245_v31  ;;  %v466_v44 = vadd.f32 1.0, %v753_v40  ;;  %v359_v29 = vmul.f32 0.5, %v992_v32 }
  0x3d   : > { %608 = vst [vmem:[%s948_s30 + $0x80] sm:$0xff] %v572_v36  ;;  %764 = verf.f32 %v400_v38  ;;  %v401_v47 = vmul.f32 0.70710677, %v1054_v8  ;;  %v573_v48 = vadd.f32 %v537_v13, %v501_v41  ;;  %v1066_v18 = vadd.f32 %v846_v2, %v287_v9 }
  0x3e   : > { %v1069_v50 = vadd.f32 %v846_v2, %v288_v11  ;;  %v289_v51 = vmul.f32 %v834_v0, %v246_v39  ;;  %v502_v14 = vmul.f32 %v466_v44, %v358_v35  ;;  %v290_v34 = vmul.f32 %v834_v0, %v247_v42  ;;  %v542_v42 = vld [vmem:[%s917_s27 + $0xb0] sm:$0xff] }
  0x3f   : > { %766 = verf.f32 %v401_v47  ;;  %v291_v32 = vmul.f32 %v834_v0, %v248_v43  ;;  %609 = vst [vmem:[%s948_s30 + $0x88] sm:$0xff] %v573_v48  ;;  %v360_v54 = vmul.f32 0.5, %v998_v37  ;;  %v402_v45 = vmul.f32 0.70710677, %v1066_v18  ;;  %v543_v47 = vld [vmem:[%s917_s27 + $0xb8] sm:$0xff] }
  0x40   : > { %v755_v52 = vpop.eup %754  ;;  %v403_v56 = vmul.f32 0.70710677, %v1069_v50  ;;  %v574_v58 = vadd.f32 %v538_v49, %v502_v14  ;;  %v1080_v21 = vadd.f32 %v846_v2, %v289_v51  ;;  %v1083_v62 = vadd.f32 %v846_v2, %v290_v34  ;;  %v544_v34 = vld [vmem:[%s917_s27 + $0xc0] sm:$0xff] }
  0x41   : > { %v757_v57 = vpop.eup %756  ;;  %v467_v59 = vadd.f32 1.0, %v755_v52  ;;  %768 = verf.f32 %v402_v45  ;;  %v1087_v37 = vadd.f32 %v846_v2, %v291_v32  ;;  %v292_v63 = vmul.f32 %v834_v0, %v249_v19  ;;  %v545_v45 = vld [vmem:[%s917_s27 + $0xc8] sm:$0xff] }
  0x42   : > { %v468_v46 = vadd.f32 1.0, %v757_v57  ;;  %610 = vst [vmem:[%s948_s30 + $0x90] sm:$0xff] %v574_v58  ;;  %770 = verf.f32 %v403_v56  ;;  %v404_v3 = vmul.f32 0.70710677, %v1080_v21  ;;  %v361_v12 = vmul.f32 0.5, %v1027_v55 }
  0x43   : > { %v503_v1 = vmul.f32 %v467_v59, %v359_v29  ;;  %v405_v15 = vmul.f32 0.70710677, %v1083_v62  ;;  %v406_v60 = vmul.f32 0.70710677, %v1087_v37  ;;  %v1100_v22 = vadd.f32 %v846_v2, %v292_v63 }
  0x44   : > { %v504_v10 = vmul.f32 %v468_v46, %v360_v54  ;;  %772 = verf.f32 %v404_v3  ;;  %v293_v24 = vmul.f32 %v834_v0, %v250_v6  ;;  %v294_v27 = vmul.f32 %v834_v0, %v251_v7  ;;  %v546_v3 = vld [vmem:[%s917_s27 + $0xd0] sm:$0xff] }
  0x45   : > { %v575_v16 = vadd.f32 %v539_v25, %v503_v1  ;;  %774 = verf.f32 %v405_v15  ;;  %v362_v61 = vmul.f32 0.5, %v1033_v17  ;;  %v407_v30 = vmul.f32 0.70710677, %v1100_v22  ;;  %v541_v17 = vld [vmem:[%s917_s27 + $0xa8] sm:$0xff] }
  0x46   : > { %v576_v23 = vadd.f32 %v540_v5, %v504_v10  ;;  %776 = verf.f32 %v406_v60  ;;  %v295_v31 = vmul.f32 %v834_v0, %v252_v4  ;;  %v363_v53 = vmul.f32 0.5, %v1036_v20 }
  0x47   : > { %v759_v55 = vpop.eup %758  ;;  %611 = vst [vmem:[%s948_s30 + $0x98] sm:$0xff] %v575_v16  ;;  %v1112_v36 = vadd.f32 %v846_v2, %v293_v24  ;;  %v1115_v13 = vadd.f32 %v846_v2, %v294_v27  ;;  %v364_v40 = vmul.f32 0.5, %v1042_v26  ;;  %778 = verf.f32 %v407_v30  ;;  %v548_v27 = vld [vmem:[%s917_s27 + $0xe0] sm:$0xff] }
  0x48   : > { %v761_v33 = vpop.eup %760  ;;  %612 = vst [vmem:[%s948_s30 + $0xa0] sm:$0xff] %v576_v23  ;;  %v469_v35 = vadd.f32 1.0, %v759_v55  ;;  %v296_v41 = vmul.f32 %v834_v0, %v253_v28  ;;  %v1123_v44 = vadd.f32 %v846_v2, %v295_v31  ;;  %v365_v26 = vmul.f32 0.5, %v1054_v8 }
  0x49   : > { %v763_v38 = vpop.eup %762  ;;  %v470_v39 = vadd.f32 1.0, %v761_v33  ;;  %v408_v43 = vmul.f32 0.70710677, %v1112_v36  ;;  %v409_v49 = vmul.f32 0.70710677, %v1115_v13  ;;  %v366_v8 = vmul.f32 0.5, %v1066_v18 }
  0x4a   : > { %v765_v9 = vpop.eup %764  ;;  %v505_v11 = vmul.f32 %v469_v35, %v361_v12  ;;  %v471_v20 = vadd.f32 1.0, %v763_v38  ;;  %v410_v56 = vmul.f32 0.70710677, %v1123_v44  ;;  %v1134_v57 = vadd.f32 %v846_v2, %v296_v41  ;;  %v547_v12 = vld [vmem:[%s917_s27 + $0xd8] sm:$0xff]  ;;  %v550_v35 = vld [vmem:[%s917_s27 + $0xf0] sm:$0xff] }
  0x4b   : > { %v506_v29 = vmul.f32 %v470_v39, %v362_v61  ;;  %v472_v48 = vadd.f32 1.0, %v765_v9  ;;  %780 = verf.f32 %v408_v43  ;;  %v367_v46 = vmul.f32 0.5, %v1069_v50  ;;  %v549_v61 = vld [vmem:[%s917_s27 + $0xe8] sm:$0xff]  ;;  %v551_v39 = vld [vmem:[%s917_s27 + $0xf8] sm:$0xff] }
  0x4c   : > { %v767_v51 = vpop.eup %766  ;;  %v577_v0 = vadd.f32 %v541_v17, %v505_v11  ;;  %v507_v14 = vmul.f32 %v471_v20, %v363_v53  ;;  %782 = verf.f32 %v409_v49  ;;  %v411_v5 = vmul.f32 0.70710677, %v1134_v57 }
  0x4d   : > { %v578_v32 = vadd.f32 %v542_v42, %v506_v29  ;;  %v508_v19 = vmul.f32 %v472_v48, %v364_v40  ;;  %v473_v52 = vadd.f32 1.0, %v767_v51  ;;  %784 = verf.f32 %v410_v56  ;;  %v552_v29 = vld [vmem:[%s917_s27 + $0x100] sm:$0xff] }
  0x4e   : > { %613 = vst [vmem:[%s948_s30 + $0xa8] sm:$0xff] %v577_v0  ;;  %v579_v54 = vadd.f32 %v543_v47, %v507_v14  ;;  %v769_v58 = vpop.eup %768  ;;  %v368_v6 = vmul.f32 0.5, %v1080_v21  ;;  %v369_v50 = vmul.f32 0.5, %v1083_v62  ;;  %786 = verf.f32 %v411_v5 }
  0x4f   : > { %614 = vst [vmem:[%s948_s30 + $0xb0] sm:$0xff] %v578_v32  ;;  %v580_v59 = vadd.f32 %v544_v34, %v508_v19  ;;  %v509_v25 = vmul.f32 %v473_v52, %v365_v26  ;;  %v771_v63 = vpop.eup %770  ;;  %v474_v1 = vadd.f32 1.0, %v769_v58  ;;  %v370_v60 = vmul.f32 0.5, %v1087_v37  ;;  %v554_v19 = vld [vmem:[%s917_s27 + $0x110] sm:$0xff] }
  0x50   : > { %615 = vst [vmem:[%s948_s30 + $0xb8] sm:$0xff] %v579_v54  ;;  %v475_v2 = vadd.f32 1.0, %v771_v63  ;;  %v371_v30 = vmul.f32 0.5, %v1100_v22  ;;  %v372_v40 = vmul.f32 0.5, %v1112_v36  ;;  %v373_v11 = vmul.f32 0.5, %v1115_v13  ;;  %v553_v36 = vld [vmem:[%s917_s27 + $0x108] sm:$0xff] }
  0x51   : > { %616 = vst [vmem:[%s948_s30 + $0xc0] sm:$0xff] %v580_v59  ;;  %v581_v18 = vadd.f32 %v545_v45, %v509_v25  ;;  %v773_v7 = vpop.eup %772  ;;  %v510_v10 = vmul.f32 %v474_v1, %v366_v8  ;;  %v374_v26 = vmul.f32 0.5, %v1123_v44  ;;  %v375_v14 = vmul.f32 0.5, %v1134_v57  ;;  %v555_v45 = vld [vmem:[%s917_s27 + $0x118] sm:$0xff] }
  0x52   : > { %v775_v15 = vpop.eup %774  ;;  %v511_v4 = vmul.f32 %v475_v2, %v367_v46  ;;  %v476_v16 = vadd.f32 1.0, %v773_v7 }
  0x53   : > { %617 = vst [vmem:[%s948_s30 + $0xc8] sm:$0xff] %v581_v18  ;;  %v777_v23 = vpop.eup %776  ;;  %v582_v24 = vadd.f32 %v546_v3, %v510_v10  ;;  %v477_v21 = vadd.f32 1.0, %v775_v15 }
  0x54   : > { %v583_v28 = vadd.f32 %v547_v12, %v511_v4  ;;  %v512_v55 = vmul.f32 %v476_v16, %v368_v6  ;;  %v478_v62 = vadd.f32 1.0, %v777_v23  ;;  %v779_v31 = vpop.eup %778 }
  0x55   : > { %618 = vst [vmem:[%s948_s30 + $0xd0] sm:$0xff] %v582_v24  ;;  %v513_v33 = vmul.f32 %v477_v21, %v369_v50  ;;  %v479_v38 = vadd.f32 1.0, %v779_v31 }
  0x56   : > { %619 = vst [vmem:[%s948_s30 + $0xd8] sm:$0xff] %v583_v28  ;;  %v584_v37 = vadd.f32 %v548_v27, %v512_v55  ;;  %v514_v53 = vmul.f32 %v478_v62, %v370_v60 }
  0x57   : > { %v585_v17 = vadd.f32 %v549_v61, %v513_v33  ;;  %v515_v9 = vmul.f32 %v479_v38, %v371_v30 }
  0x58   : > { %v781_v41 = vpop.eup %780  ;;  %620 = vst [vmem:[%s948_s30 + $0xe0] sm:$0xff] %v584_v37  ;;  %v586_v22 = vadd.f32 %v550_v35, %v514_v53 }
  0x59   : > { %v783_v42 = vpop.eup %782  ;;  %621 = vst [vmem:[%s948_s30 + $0xe8] sm:$0xff] %v585_v17  ;;  %v480_v20 = vadd.f32 1.0, %v781_v41  ;;  %v587_v43 = vadd.f32 %v551_v39, %v515_v9 }
  0x5a   : > { %622 = vst [vmem:[%s948_s30 + $0xf0] sm:$0xff] %v586_v22  ;;  %v481_v47 = vadd.f32 1.0, %v783_v42  ;;  %v785_v49 = vpop.eup %784 }
  0x5b   : > { %v516_v48 = vmul.f32 %v480_v20, %v372_v40  ;;  %623 = vst [vmem:[%s948_s30 + $0xf8] sm:$0xff] %v587_v43  ;;  %v482_v0 = vadd.f32 1.0, %v785_v49  ;;  %v787_v34 = vpop.eup %786 }
  0x5c   : > { %v517_v51 = vmul.f32 %v481_v47, %v373_v11  ;;  %v483_v54 = vadd.f32 1.0, %v787_v34 }
  0x5d   : > { %v588_v13 = vadd.f32 %v552_v29, %v516_v48  ;;  %v518_v52 = vmul.f32 %v482_v0, %v374_v26 }
  0x5e   : > { %v589_v32 = vadd.f32 %v553_v36, %v517_v51  ;;  %v519_v56 = vmul.f32 %v483_v54, %v375_v14 }
  0x5f   : > { %624 = vst [vmem:[%s948_s30 + $0x100] sm:$0xff] %v588_v13  ;;  %v590_v8 = vadd.f32 %v554_v19, %v518_v52 }
  0x60   : > { %625 = vst [vmem:[%s948_s30 + $0x108] sm:$0xff] %v589_v32  ;;  %v591_v44 = vadd.f32 %v555_v45, %v519_v56 }
  0x61   : > { %626 = vst [vmem:[%s948_s30 + $0x110] sm:$0xff] %v590_v8 }
  0x62   : > { %627 = vst [vmem:[%s948_s30 + $0x118] sm:$0xff] %v591_v44 }
  0x63 PF: > { %s14_s15 = sadd.s32 1, %s794_s15  }
  0x64   : > { %p11_p4 = scmp.ge.s32.totalorder %s14_s15, 4  }
  0x66   :  { %13 = sbr.rel (!%p11_p4) target bundleno = 1 (0x1), region = 69 }

</bundles_post_ra>
